<compile_context>
chip_gen: v6e
topology: v6e:2x2x1
jax: 0.10.0
libtpu: 0.0.40
codegen_flags: <defaults>
</compile_context>

<pallas_src>
import math

import jax
import jax.numpy as jnp
from jax import lax
from jax.experimental import pallas as pl
from jax.experimental.pallas import tpu as pltpu

jax.config.update("jax_default_matmul_precision", "highest")


# ----------------------------------------------------------------------------
# Shared math (used identically inside the Pallas kernel and in the reference)
# ----------------------------------------------------------------------------
def _layernorm(x, g, b, eps=1e-5):
    mu = jnp.mean(x, axis=-1, keepdims=True)
    var = jnp.mean((x - mu) ** 2, axis=-1, keepdims=True)
    return (x - mu) * lax.rsqrt(var + eps) * g + b


def _sigmoid(z):
    # tanh form: numerically safe for the +/-1e30 sentinels and lowers to EUP.
    return 0.5 * (jnp.tanh(0.5 * z) + 1.0)


def _softmax_rows(s):
    m = jnp.max(s, axis=-1, keepdims=True)
    e = jnp.exp(s - m)
    return e / jnp.sum(e, axis=-1, keepdims=True)


def _forward_tokens(xf, k_wide, v_wide, P, cfg):
    """Forward pass over ALL flattened tokens.

    xf:     (B*T, d_in)
    k_wide: (h, B*S, k)   encoder keys, head j occupies lane block [j*dh,(j+1)*dh)
    v_wide: (h, B*S, k)   encoder values, same wide layout
    returns (B*T, C*d_in) probabilities, class-major column blocks.
    """
    n, h, q = cfg["n"], cfg["h"], cfg["q"]
    f32 = jnp.float32

    x = xf.astype(f32)

    # embedding MLP: relu on all but the last layer
    for i in range(q):
        x = jnp.dot(x, P["emb_w"][i], preferred_element_type=f32) + P["emb_b"][i]
        if i < q - 1:
            x = jnp.maximum(x, 0.0)
    x = x + P["pos_bt"]

    bias_s = P["bias_self"]     # (BT, BT) block-diagonal + causal additive bias
    bias_c = P["bias_cross"]    # (BT, BS)

    for i in range(n):
        if i != 0:
            x = _layernorm(x, P["ln1_g"][i - 1], P["ln1_b"][i - 1])

        # ---- masked multi-head self attention (AttentionHead, masking=True) ----
        # Full-width Q/K/V (all heads at once); query weights pre-scaled 1/sqrt(k).
        Q = jnp.dot(x, P["wq1"][i], preferred_element_type=f32)
        K = jnp.dot(x, P["wk1"][i], preferred_element_type=f32)
        V = jnp.dot(x, P["wv1"][i], preferred_element_type=f32)
        attn = None
        for j in range(h):
            m_j = P["hmask"][j]                                  # (1, k) 0/1 lane mask
            s = lax.dot_general(Q * m_j, K, (((1,), (1,)), ((), ())),
                                preferred_element_type=f32) + bias_s
            p = _softmax_rows(s)
            oh = jnp.dot(p, V * m_j, preferred_element_type=f32)  # head j lane block
            attn = oh if attn is None else attn + oh
        x = x + attn
        x = _layernorm(x, P["ln2_g"][i], P["ln2_b"][i])

        # ---- cross attention with encoder K/V (DecoderHead) ----
        Q = jnp.dot(x, P["wq2"][i], preferred_element_type=f32)
        attn = None
        for j in range(h):
            s = lax.dot_general(Q, k_wide[j], (((1,), (1,)), ((), ())),
                                preferred_element_type=f32) + bias_c
            p = _softmax_rows(s)
            oh = jnp.dot(p, v_wide[j], preferred_element_type=f32)
            attn = oh if attn is None else attn + oh
        x = x + attn
        x = _layernorm(x, P["ln3_g"][i], P["ln3_b"][i])

        # ---- FC + residual ----
        y = jnp.dot(x, P["fc_w"][i], preferred_element_type=f32) + P["fc_b"][i]
        x = jnp.maximum(y, 0.0) + x

    # fused final projection + ordinal (cumulative logit) head:
    # out_w tiled C times so one matmul produces all class column blocks, then
    # probs = sigmoid(b_hi - y) - sigmoid(b_lo - y) with +/-1e30 sentinels.
    yt = jnp.dot(x, P["outw_t"], preferred_element_type=f32) + P["outb_t"]
    return _sigmoid(P["b_hi"] - yt) - _sigmoid(P["b_lo"] - yt)


# ----------------------------------------------------------------------------
# Host-side packing (layout plumbing, outside the kernel)
# ----------------------------------------------------------------------------
def _block_causal_bias(B, T, S):
    r = jnp.arange(B * T)[:, None]
    c = jnp.arange(B * S)[None, :]
    allowed = ((r // T) == (c // S)) & ((c % S) <= (r % T))
    return jnp.where(allowed, 0.0, -1e30).astype(jnp.float32)


def _widen_heads(enc):
    """(B, h, S, dh) -> (h, B*S, h*dh) with head j in lane block [j*dh,(j+1)*dh)."""
    B, h, S, dh = enc.shape
    k = h * dh
    flat = jnp.transpose(enc, (1, 0, 2, 3)).reshape(h, B * S, dh).astype(jnp.float32)
    wide = jnp.zeros((h, B * S, k), jnp.float32)
    for j in range(h):
        wide = wide.at[j, :, j * dh:(j + 1) * dh].set(flat[j])
    return wide


def _pack_inputs(x, k_enc, v_enc, P, cfg):
    B, T, d_in = x.shape
    _, h, S, dh = k_enc.shape
    k = h * dh
    C = cfg["nb_class"]

    xf = x.reshape(B * T, d_in).astype(jnp.float32)
    kw = _widen_heads(k_enc)
    vw = _widen_heads(v_enc)

    Pk = dict(P)
    Pk["pos_bt"] = jnp.tile(P["pos"], (B, 1))                 # (B*T, k)
    Pk["bias_self"] = _block_causal_bias(B, T, T)             # (B*T, B*T)
    Pk["bias_cross"] = _block_causal_bias(B, T, S)            # (B*T, B*S)

    lane = jnp.arange(k)
    hm = jnp.stack([((lane >= j * dh) & (lane < (j + 1) * dh)).astype(jnp.float32)
                    for j in range(h)])
    Pk["hmask"] = hm[:, None, :]                              # (h, 1, k)

    # fused ordinal head constants
    Pk["outw_t"] = jnp.tile(P["out_w"], (1, C))               # (k, C*d)
    Pk["outb_t"] = jnp.tile(P["out_b"], (1, C))               # (1, C*d)
    big = jnp.array([1e30], jnp.float32)
    hi = jnp.concatenate([P["bcut"][0], big])                 # (C,)
    lo = jnp.concatenate([-big, P["bcut"][0]])                # (C,)
    Pk["b_hi"] = jnp.repeat(hi, d_in)[None, :]                # (1, C*d)
    Pk["b_lo"] = jnp.repeat(lo, d_in)[None, :]                # (1, C*d)

    for key in ("pos", "out_w", "out_b", "bcut"):
        del Pk[key]
    return Pk, xf, kw, vw


def _unpack_output(out2d, B, T, d_in, C):
    # (B*T, C*d) class-major column blocks -> PyTorch layout (B, T, d, C)
    return jnp.transpose(out2d.reshape(B, T, C, d_in), (0, 1, 3, 2))


# ----------------------------------------------------------------------------
# Pallas wrapper: single invocation, whole batch, everything resident in VMEM
# ----------------------------------------------------------------------------
def decoder_forward(x, k_enc, v_enc, P, cfg):
    B, T, d_in = x.shape
    C = cfg["nb_class"]
    BT = B * T

    Pk, xf, kw, vw = _pack_inputs(x, k_enc, v_enc, P, cfg)
    flat_params, treedef = jax.tree_util.tree_flatten(Pk)
    n_leaves = len(flat_params)

    def kernel(*refs):
        xf_ref, kw_ref, vw_ref = refs[0], refs[1], refs[2]
        param_refs = refs[3:3 + n_leaves]
        out_ref = refs[3 + n_leaves]
        leaves = [r[...] for r in param_refs]
        Pv = jax.tree_util.tree_unflatten(treedef, leaves)
        out_ref[...] = _forward_tokens(xf_ref[...], kw_ref[...], vw_ref[...],
                                       Pv, cfg)

    out2d = pl.pallas_call(
        kernel,
        out_shape=jax.ShapeDtypeStruct((BT, C * d_in), jnp.float32),
    )(xf, kw, vw, *flat_params)

    return _unpack_output(out2d, B, T, d_in, C)


def reference_forward(x, k_enc, v_enc, P, cfg):
    B, T, d_in = x.shape
    C = cfg["nb_class"]
    Pk, xf, kw, vw = _pack_inputs(x, k_enc, v_enc, P, cfg)
    out2d = _forward_tokens(xf, kw, vw, Pk, cfg)
    return _unpack_output(out2d, B, T, d_in, C)


# ----------------------------------------------------------------------------
# Parameter construction (deterministic, mirrors Decoder.__init__ shapes)
# ----------------------------------------------------------------------------
def positional_encoding(d_model, t_in):
    t = jnp.arange(1, t_in + 1, dtype=jnp.float32)[:, None]
    kk = jnp.arange(d_model // 2, dtype=jnp.float32)
    omega = 1.0 / (1000.0 ** (2.0 * kk / d_model))
    omega = jnp.repeat(omega, 2)[None, :]
    phase = jnp.tile(jnp.array([0.0, math.pi / 2], jnp.float32),
                     d_model // 2)[None, :]
    return jnp.sin(t * omega + phase)


def init_params(key, param):
    n, h = param["dim"]
    emb_dim = list(param["emb"])
    k = emb_dim[-1]
    d = 1 if param["predict_spot"] else param["nb_lon"] * param["nb_lat"]
    C = param["nb_classes"]
    T = param["T_out"] + 1
    keys = iter(jax.random.split(key, 1024))

    def lin_w(fan_in, fan_out):
        bound = 1.0 / math.sqrt(fan_in)
        return jax.random.uniform(next(keys), (fan_in, fan_out), jnp.float32,
                                  -bound, bound)

    def lin_b(fan_in, fan_out):
        bound = 1.0 / math.sqrt(fan_in)
        return jax.random.uniform(next(keys), (1, fan_out), jnp.float32,
                                  -bound, bound)

    inv_rd = 1.0 / math.sqrt(k)   # fold attention scale into query weights

    P = {}
    P["pos"] = positional_encoding(k, T)

    dims = [d] + emb_dim
    P["emb_w"], P["emb_b"] = [], []
    for i in range(len(emb_dim)):
        P["emb_w"].append(lin_w(dims[i], dims[i + 1]))
        P["emb_b"].append(lin_b(dims[i], dims[i + 1]))

    m1 = max(n - 1, 1)
    P["ln1_g"] = jnp.ones((m1, 1, k), jnp.float32)
    P["ln1_b"] = jnp.zeros((m1, 1, k), jnp.float32)
    P["ln2_g"] = jnp.ones((n, 1, k), jnp.float32)
    P["ln2_b"] = jnp.zeros((n, 1, k), jnp.float32)
    P["ln3_g"] = jnp.ones((n, 1, k), jnp.float32)
    P["ln3_b"] = jnp.zeros((n, 1, k), jnp.float32)

    P["wq1"] = jnp.stack([lin_w(k, k) * inv_rd for _ in range(n)])   # (n, k, k)
    P["wk1"] = jnp.stack([lin_w(k, k) for _ in range(n)])
    P["wv1"] = jnp.stack([lin_w(k, k) for _ in range(n)])
    P["wq2"] = jnp.stack([lin_w(k, k) * inv_rd for _ in range(n)])

    P["fc_w"] = jnp.stack([lin_w(k, k) for _ in range(n)])           # (n, k, k)
    P["fc_b"] = jnp.stack([lin_b(k, k) for _ in range(n)])           # (n, 1, k)

    P["out_w"] = lin_w(k, d)
    P["out_b"] = lin_b(k, d)

    # cutoff: xavier_uniform on (1, C-1); precompute cumulative cutoffs b
    bound = math.sqrt(6.0 / ((C - 1) + 1))
    cutoff = jax.random.uniform(next(keys), (1, C - 1), jnp.float32,
                                -bound, bound)
    bvals = jnp.concatenate([cutoff[:, :1], cutoff[:, 1:] ** 2], axis=1)
    P["bcut"] = jnp.cumsum(bvals, axis=1)                            # (1, C-1)
    return P


# ----------------------------------------------------------------------------
# Main
# ----------------------------------------------------------------------------
if __name__ == "__main__":
    # Decoder hyper-parameters (small, consistent with the module's forward)
    param = dict(dim=(2, 2),            # n=2 decoder blocks, h=2 heads
                 emb=[16, 32],          # q=2 embedding layers, k=32
                 predict_spot=False,
                 nb_lon=2, nb_lat=2,    # d = 4
                 nb_classes=3,
                 T_out=7)               # T = T_out + 1 = 8

    n, h = param["dim"]
    emb_dim = param["emb"]
    k_dim = emb_dim[-1]
    d = param["nb_lon"] * param["nb_lat"]
    C = param["nb_classes"]
    T = param["T_out"] + 1
    S = T                               # encoder sequence length
    dh = k_dim // h
    cfg = dict(n=n, h=h, q=len(emb_dim), nb_class=C, k=k_dim, dh=dh,
               T=T, S=S, d=d)

    root = jax.random.PRNGKey(0)
    kp, kx, kk_, kv_ = jax.random.split(root, 4)

    P = init_params(kp, param)

    B = 2
    x = jax.random.normal(kx, (B, T, d), jnp.float32)
    k_enc = jax.random.normal(kk_, (B, h, S, dh), jnp.float32)
    v_enc = jax.random.normal(kv_, (B, h, S, dh), jnp.float32)

    probs = decoder_forward(x, k_enc, v_enc, P, cfg)
    probs = jax.block_until_ready(probs)

    assert probs.shape == (B, T, d, C), probs.shape

    # cross-check against a pure-JAX reference built from the same math
    ref = jax.block_until_ready(reference_forward(x, k_enc, v_enc, P, cfg))
    max_err = float(jnp.max(jnp.abs(probs - ref)))
    if not math.isfinite(max_err) or max_err > 2e-3:
        raise AssertionError(f"Pallas kernel mismatch vs reference: {max_err}")

    print("KERNEL_OK")
</pallas_src>

<mosaic_0001>
module attributes {stable_mosaic.version = 11 : i64} {
  func.func @kernel(%arg0: memref<16x4xf32, #tpu.memory_space<vmem>>, %arg1: memref<2x16x32xf32, #tpu.memory_space<vmem>>, %arg2: memref<2x16x32xf32, #tpu.memory_space<vmem>>, %arg3: memref<1x12xf32, #tpu.memory_space<vmem>>, %arg4: memref<1x12xf32, #tpu.memory_space<vmem>>, %arg5: memref<16x16xf32, #tpu.memory_space<vmem>>, %arg6: memref<16x16xf32, #tpu.memory_space<vmem>>, %arg7: memref<1x16xf32, #tpu.memory_space<vmem>>, %arg8: memref<1x32xf32, #tpu.memory_space<vmem>>, %arg9: memref<4x16xf32, #tpu.memory_space<vmem>>, %arg10: memref<16x32xf32, #tpu.memory_space<vmem>>, %arg11: memref<2x1x32xf32, #tpu.memory_space<vmem>>, %arg12: memref<2x32x32xf32, #tpu.memory_space<vmem>>, %arg13: memref<2x1x32xf32, #tpu.memory_space<vmem>>, %arg14: memref<1x1x32xf32, #tpu.memory_space<vmem>>, %arg15: memref<1x1x32xf32, #tpu.memory_space<vmem>>, %arg16: memref<2x1x32xf32, #tpu.memory_space<vmem>>, %arg17: memref<2x1x32xf32, #tpu.memory_space<vmem>>, %arg18: memref<2x1x32xf32, #tpu.memory_space<vmem>>, %arg19: memref<2x1x32xf32, #tpu.memory_space<vmem>>, %arg20: memref<1x12xf32, #tpu.memory_space<vmem>>, %arg21: memref<32x12xf32, #tpu.memory_space<vmem>>, %arg22: memref<16x32xf32, #tpu.memory_space<vmem>>, %arg23: memref<2x32x32xf32, #tpu.memory_space<vmem>>, %arg24: memref<2x32x32xf32, #tpu.memory_space<vmem>>, %arg25: memref<2x32x32xf32, #tpu.memory_space<vmem>>, %arg26: memref<2x32x32xf32, #tpu.memory_space<vmem>>, %arg27: memref<16x12xf32, #tpu.memory_space<vmem>>) attributes {dimension_semantics = [], scalar_prefetch = 0 : i64, scratch_operands = 0 : i64, tpu.core_type = #tpu.core_type<tc>} {
    %c0 = arith.constant 0 : index
    %c0_0 = arith.constant 0 : index
    %0 = vector.load %arg3[%c0, %c0_0] : memref<1x12xf32, #tpu.memory_space<vmem>>, vector<1x12xf32>
    %c0_1 = arith.constant 0 : index
    %c0_2 = arith.constant 0 : index
    %1 = vector.load %arg4[%c0_1, %c0_2] : memref<1x12xf32, #tpu.memory_space<vmem>>, vector<1x12xf32>
    %c0_3 = arith.constant 0 : index
    %c0_4 = arith.constant 0 : index
    %2 = vector.load %arg5[%c0_3, %c0_4] : memref<16x16xf32, #tpu.memory_space<vmem>>, vector<16x16xf32>
    %c0_5 = arith.constant 0 : index
    %c0_6 = arith.constant 0 : index
    %3 = vector.load %arg6[%c0_5, %c0_6] : memref<16x16xf32, #tpu.memory_space<vmem>>, vector<16x16xf32>
    %c0_7 = arith.constant 0 : index
    %c0_8 = arith.constant 0 : index
    %4 = vector.load %arg7[%c0_7, %c0_8] : memref<1x16xf32, #tpu.memory_space<vmem>>, vector<1x16xf32>
    %c0_9 = arith.constant 0 : index
    %c0_10 = arith.constant 0 : index
    %5 = vector.load %arg8[%c0_9, %c0_10] : memref<1x32xf32, #tpu.memory_space<vmem>>, vector<1x32xf32>
    %c0_11 = arith.constant 0 : index
    %c0_12 = arith.constant 0 : index
    %6 = vector.load %arg9[%c0_11, %c0_12] : memref<4x16xf32, #tpu.memory_space<vmem>>, vector<4x16xf32>
    %c0_13 = arith.constant 0 : index
    %c0_14 = arith.constant 0 : index
    %7 = vector.load %arg10[%c0_13, %c0_14] : memref<16x32xf32, #tpu.memory_space<vmem>>, vector<16x32xf32>
    %c0_15 = arith.constant 0 : index
    %c0_16 = arith.constant 0 : index
    %c0_17 = arith.constant 0 : index
    %8 = vector.load %arg11[%c0_15, %c0_16, %c0_17] : memref<2x1x32xf32, #tpu.memory_space<vmem>>, vector<2x1x32xf32>
    %c0_18 = arith.constant 0 : index
    %c0_19 = arith.constant 0 : index
    %c0_20 = arith.constant 0 : index
    %9 = vector.load %arg12[%c0_18, %c0_19, %c0_20] : memref<2x32x32xf32, #tpu.memory_space<vmem>>, vector<2x32x32xf32>
    %c0_21 = arith.constant 0 : index
    %c0_22 = arith.constant 0 : index
    %c0_23 = arith.constant 0 : index
    %10 = vector.load %arg13[%c0_21, %c0_22, %c0_23] : memref<2x1x32xf32, #tpu.memory_space<vmem>>, vector<2x1x32xf32>
    %c0_24 = arith.constant 0 : index
    %c0_25 = arith.constant 0 : index
    %c0_26 = arith.constant 0 : index
    %11 = vector.load %arg14[%c0_24, %c0_25, %c0_26] : memref<1x1x32xf32, #tpu.memory_space<vmem>>, vector<1x1x32xf32>
    %c0_27 = arith.constant 0 : index
    %c0_28 = arith.constant 0 : index
    %c0_29 = arith.constant 0 : index
    %12 = vector.load %arg15[%c0_27, %c0_28, %c0_29] : memref<1x1x32xf32, #tpu.memory_space<vmem>>, vector<1x1x32xf32>
    %c0_30 = arith.constant 0 : index
    %c0_31 = arith.constant 0 : index
    %c0_32 = arith.constant 0 : index
    %13 = vector.load %arg16[%c0_30, %c0_31, %c0_32] : memref<2x1x32xf32, #tpu.memory_space<vmem>>, vector<2x1x32xf32>
    %c0_33 = arith.constant 0 : index
    %c0_34 = arith.constant 0 : index
    %c0_35 = arith.constant 0 : index
    %14 = vector.load %arg17[%c0_33, %c0_34, %c0_35] : memref<2x1x32xf32, #tpu.memory_space<vmem>>, vector<2x1x32xf32>
    %c0_36 = arith.constant 0 : index
    %c0_37 = arith.constant 0 : index
    %c0_38 = arith.constant 0 : index
    %15 = vector.load %arg18[%c0_36, %c0_37, %c0_38] : memref<2x1x32xf32, #tpu.memory_space<vmem>>, vector<2x1x32xf32>
    %c0_39 = arith.constant 0 : index
    %c0_40 = arith.constant 0 : index
    %c0_41 = arith.constant 0 : index
    %16 = vector.load %arg19[%c0_39, %c0_40, %c0_41] : memref<2x1x32xf32, #tpu.memory_space<vmem>>, vector<2x1x32xf32>
    %c0_42 = arith.constant 0 : index
    %c0_43 = arith.constant 0 : index
    %17 = vector.load %arg20[%c0_42, %c0_43] : memref<1x12xf32, #tpu.memory_space<vmem>>, vector<1x12xf32>
    %c0_44 = arith.constant 0 : index
    %c0_45 = arith.constant 0 : index
    %18 = vector.load %arg21[%c0_44, %c0_45] : memref<32x12xf32, #tpu.memory_space<vmem>>, vector<32x12xf32>
    %c0_46 = arith.constant 0 : index
    %c0_47 = arith.constant 0 : index
    %19 = vector.load %arg22[%c0_46, %c0_47] : memref<16x32xf32, #tpu.memory_space<vmem>>, vector<16x32xf32>
    %c0_48 = arith.constant 0 : index
    %c0_49 = arith.constant 0 : index
    %c0_50 = arith.constant 0 : index
    %20 = vector.load %arg23[%c0_48, %c0_49, %c0_50] : memref<2x32x32xf32, #tpu.memory_space<vmem>>, vector<2x32x32xf32>
    %c0_51 = arith.constant 0 : index
    %c0_52 = arith.constant 0 : index
    %c0_53 = arith.constant 0 : index
    %21 = vector.load %arg24[%c0_51, %c0_52, %c0_53] : memref<2x32x32xf32, #tpu.memory_space<vmem>>, vector<2x32x32xf32>
    %c0_54 = arith.constant 0 : index
    %c0_55 = arith.constant 0 : index
    %c0_56 = arith.constant 0 : index
    %22 = vector.load %arg25[%c0_54, %c0_55, %c0_56] : memref<2x32x32xf32, #tpu.memory_space<vmem>>, vector<2x32x32xf32>
    %c0_57 = arith.constant 0 : index
    %c0_58 = arith.constant 0 : index
    %c0_59 = arith.constant 0 : index
    %23 = vector.load %arg26[%c0_57, %c0_58, %c0_59] : memref<2x32x32xf32, #tpu.memory_space<vmem>>, vector<2x32x32xf32>
    %c0_60 = arith.constant 0 : index
    %c0_61 = arith.constant 0 : index
    %24 = vector.load %arg0[%c0_60, %c0_61] : memref<16x4xf32, #tpu.memory_space<vmem>>, vector<16x4xf32>
    %c0_62 = arith.constant 0 : index
    %c0_63 = arith.constant 0 : index
    %c0_64 = arith.constant 0 : index
    %25 = vector.load %arg1[%c0_62, %c0_63, %c0_64] : memref<2x16x32xf32, #tpu.memory_space<vmem>>, vector<2x16x32xf32>
    %c0_65 = arith.constant 0 : index
    %c0_66 = arith.constant 0 : index
    %c0_67 = arith.constant 0 : index
    %26 = vector.load %arg2[%c0_65, %c0_66, %c0_67] : memref<2x16x32xf32, #tpu.memory_space<vmem>>, vector<2x16x32xf32>
    %cst = arith.constant dense<0.000000e+00> : vector<16x16xf32>
    %27 = tpu.matmul %24, %6, %cst {dimension_numbers = #tpu.dot_dimension_numbers<[1], [0], [0], [1], [0, 0, 1, 1], [], []>, precision = #tpu.contract_precision<fp32>} : vector<16x4xf32>, vector<4x16xf32>, vector<16x16xf32> -> vector<16x16xf32>
    %28 = vector.broadcast %4 : vector<1x16xf32> to vector<16x16xf32>
    %29 = arith.addf %27, %28 : vector<16x16xf32>
    %cst_68 = arith.constant 0.000000e+00 : f32
    %30 = vector.broadcast %cst_68 : f32 to vector<16x16xf32>
    %31 = arith.maximumf %29, %30 : vector<16x16xf32>
    %cst_69 = arith.constant dense<0.000000e+00> : vector<16x32xf32>
    %32 = tpu.matmul %31, %7, %cst_69 {dimension_numbers = #tpu.dot_dimension_numbers<[1], [0], [0], [1], [0, 0, 1, 1], [], []>, precision = #tpu.contract_precision<fp32>} : vector<16x16xf32>, vector<16x32xf32>, vector<16x32xf32> -> vector<16x32xf32>
    %33 = vector.broadcast %5 : vector<1x32xf32> to vector<16x32xf32>
    %34 = arith.addf %32, %33 : vector<16x32xf32>
    %35 = arith.addf %34, %19 : vector<16x32xf32>
    %36 = vector.extract_strided_slice %21 {offsets = [0, 0, 0], sizes = [1, 32, 32], strides = [1, 1, 1]} : vector<2x32x32xf32> to vector<1x32x32xf32>
    %37 = vector.shape_cast %36 : vector<1x32x32xf32> to vector<32x32xf32>
    %cst_70 = arith.constant dense<0.000000e+00> : vector<16x32xf32>
    %38 = tpu.matmul %35, %37, %cst_70 {dimension_numbers = #tpu.dot_dimension_numbers<[1], [0], [0], [1], [0, 0, 1, 1], [], []>, precision = #tpu.contract_precision<fp32>} : vector<16x32xf32>, vector<32x32xf32>, vector<16x32xf32> -> vector<16x32xf32>
    %39 = vector.extract_strided_slice %20 {offsets = [0, 0, 0], sizes = [1, 32, 32], strides = [1, 1, 1]} : vector<2x32x32xf32> to vector<1x32x32xf32>
    %40 = vector.shape_cast %39 : vector<1x32x32xf32> to vector<32x32xf32>
    %cst_71 = arith.constant dense<0.000000e+00> : vector<16x32xf32>
    %41 = tpu.matmul %35, %40, %cst_71 {dimension_numbers = #tpu.dot_dimension_numbers<[1], [0], [0], [1], [0, 0, 1, 1], [], []>, precision = #tpu.contract_precision<fp32>} : vector<16x32xf32>, vector<32x32xf32>, vector<16x32xf32> -> vector<16x32xf32>
    %42 = vector.extract_strided_slice %23 {offsets = [0, 0, 0], sizes = [1, 32, 32], strides = [1, 1, 1]} : vector<2x32x32xf32> to vector<1x32x32xf32>
    %43 = vector.shape_cast %42 : vector<1x32x32xf32> to vector<32x32xf32>
    %cst_72 = arith.constant dense<0.000000e+00> : vector<16x32xf32>
    %44 = tpu.matmul %35, %43, %cst_72 {dimension_numbers = #tpu.dot_dimension_numbers<[1], [0], [0], [1], [0, 0, 1, 1], [], []>, precision = #tpu.contract_precision<fp32>} : vector<16x32xf32>, vector<32x32xf32>, vector<16x32xf32> -> vector<16x32xf32>
    %45 = vector.extract_strided_slice %10 {offsets = [0, 0, 0], sizes = [1, 1, 32], strides = [1, 1, 1]} : vector<2x1x32xf32> to vector<1x1x32xf32>
    %46 = vector.shape_cast %45 : vector<1x1x32xf32> to vector<1x32xf32>
    %47 = vector.broadcast %46 : vector<1x32xf32> to vector<16x32xf32>
    %48 = arith.mulf %38, %47 : vector<16x32xf32>
    %cst_73 = arith.constant dense<0.000000e+00> : vector<16x16xf32>
    %49 = tpu.matmul %48, %41, %cst_73 {dimension_numbers = #tpu.dot_dimension_numbers<[1], [1], [0], [0], [0, 0, 1, 0], [], []>, precision = #tpu.contract_precision<fp32>} : vector<16x32xf32>, vector<16x32xf32>, vector<16x16xf32> -> vector<16x16xf32>
    %50 = arith.addf %49, %3 : vector<16x16xf32>
    %cst_74 = arith.constant dense<0xFF800000> : vector<16xf32>
    %51 = vector.multi_reduction <maximumf>, %50, %cst_74 [1] : vector<16x16xf32> to vector<16xf32>
    %52 = vector.shape_cast %51 : vector<16xf32> to vector<16x1xf32>
    %53 = vector.broadcast %52 : vector<16x1xf32> to vector<16x16xf32>
    %54 = arith.subf %50, %53 : vector<16x16xf32>
    %55 = math.exp %54 : vector<16x16xf32>
    %cst_75 = arith.constant dense<0.000000e+00> : vector<16xf32>
    %56 = vector.multi_reduction <add>, %55, %cst_75 [1] : vector<16x16xf32> to vector<16xf32>
    %57 = vector.shape_cast %56 : vector<16xf32> to vector<16x1xf32>
    %58 = vector.broadcast %57 : vector<16x1xf32> to vector<16x16xf32>
    %59 = arith.divf %55, %58 : vector<16x16xf32>
    %60 = vector.broadcast %46 : vector<1x32xf32> to vector<16x32xf32>
    %61 = arith.mulf %44, %60 : vector<16x32xf32>
    %cst_76 = arith.constant dense<0.000000e+00> : vector<16x32xf32>
    %62 = tpu.matmul %59, %61, %cst_76 {dimension_numbers = #tpu.dot_dimension_numbers<[1], [0], [0], [1], [0, 0, 1, 1], [], []>, precision = #tpu.contract_precision<fp32>} : vector<16x16xf32>, vector<16x32xf32>, vector<16x32xf32> -> vector<16x32xf32>
    %63 = vector.extract_strided_slice %10 {offsets = [1, 0, 0], sizes = [1, 1, 32], strides = [1, 1, 1]} : vector<2x1x32xf32> to vector<1x1x32xf32>
    %64 = vector.shape_cast %63 : vector<1x1x32xf32> to vector<1x32xf32>
    %65 = vector.broadcast %64 : vector<1x32xf32> to vector<16x32xf32>
    %66 = arith.mulf %38, %65 : vector<16x32xf32>
    %cst_77 = arith.constant dense<0.000000e+00> : vector<16x16xf32>
    %67 = tpu.matmul %66, %41, %cst_77 {dimension_numbers = #tpu.dot_dimension_numbers<[1], [1], [0], [0], [0, 0, 1, 0], [], []>, precision = #tpu.contract_precision<fp32>} : vector<16x32xf32>, vector<16x32xf32>, vector<16x16xf32> -> vector<16x16xf32>
    %68 = arith.addf %67, %3 : vector<16x16xf32>
    %cst_78 = arith.constant dense<0xFF800000> : vector<16xf32>
    %69 = vector.multi_reduction <maximumf>, %68, %cst_78 [1] : vector<16x16xf32> to vector<16xf32>
    %70 = vector.shape_cast %69 : vector<16xf32> to vector<16x1xf32>
    %71 = vector.broadcast %70 : vector<16x1xf32> to vector<16x16xf32>
    %72 = arith.subf %68, %71 : vector<16x16xf32>
    %73 = math.exp %72 : vector<16x16xf32>
    %cst_79 = arith.constant dense<0.000000e+00> : vector<16xf32>
    %74 = vector.multi_reduction <add>, %73, %cst_79 [1] : vector<16x16xf32> to vector<16xf32>
    %75 = vector.shape_cast %74 : vector<16xf32> to vector<16x1xf32>
    %76 = vector.broadcast %75 : vector<16x1xf32> to vector<16x16xf32>
    %77 = arith.divf %73, %76 : vector<16x16xf32>
    %78 = vector.broadcast %64 : vector<1x32xf32> to vector<16x32xf32>
    %79 = arith.mulf %44, %78 : vector<16x32xf32>
    %cst_80 = arith.constant dense<0.000000e+00> : vector<16x32xf32>
    %80 = tpu.matmul %77, %79, %cst_80 {dimension_numbers = #tpu.dot_dimension_numbers<[1], [0], [0], [1], [0, 0, 1, 1], [], []>, precision = #tpu.contract_precision<fp32>} : vector<16x16xf32>, vector<16x32xf32>, vector<16x32xf32> -> vector<16x32xf32>
    %81 = arith.addf %62, %80 : vector<16x32xf32>
    %82 = arith.addf %35, %81 : vector<16x32xf32>
    %83 = vector.extract_strided_slice %14 {offsets = [0, 0, 0], sizes = [1, 1, 32], strides = [1, 1, 1]} : vector<2x1x32xf32> to vector<1x1x32xf32>
    %84 = vector.shape_cast %83 : vector<1x1x32xf32> to vector<1x32xf32>
    %85 = vector.extract_strided_slice %13 {offsets = [0, 0, 0], sizes = [1, 1, 32], strides = [1, 1, 1]} : vector<2x1x32xf32> to vector<1x1x32xf32>
    %86 = vector.shape_cast %85 : vector<1x1x32xf32> to vector<1x32xf32>
    %cst_81 = arith.constant dense<0.000000e+00> : vector<16xf32>
    %87 = vector.multi_reduction <add>, %82, %cst_81 [1] : vector<16x32xf32> to vector<16xf32>
    %88 = vector.shape_cast %87 : vector<16xf32> to vector<16x1xf32>
    %cst_82 = arith.constant 3.200000e+01 : f32
    %89 = vector.broadcast %cst_82 : f32 to vector<16x1xf32>
    %90 = arith.divf %88, %89 : vector<16x1xf32>
    %91 = vector.broadcast %90 : vector<16x1xf32> to vector<16x32xf32>
    %92 = arith.subf %82, %91 : vector<16x32xf32>
    %93 = arith.mulf %92, %92 : vector<16x32xf32>
    %cst_83 = arith.constant dense<0.000000e+00> : vector<16xf32>
    %94 = vector.multi_reduction <add>, %93, %cst_83 [1] : vector<16x32xf32> to vector<16xf32>
    %95 = vector.shape_cast %94 : vector<16xf32> to vector<16x1xf32>
    %cst_84 = arith.constant 3.200000e+01 : f32
    %96 = vector.broadcast %cst_84 : f32 to vector<16x1xf32>
    %97 = arith.divf %95, %96 : vector<16x1xf32>
    %98 = vector.broadcast %90 : vector<16x1xf32> to vector<16x32xf32>
    %99 = arith.subf %82, %98 : vector<16x32xf32>
    %cst_85 = arith.constant 9.99999974E-6 : f32
    %100 = vector.broadcast %cst_85 : f32 to vector<16x1xf32>
    %101 = arith.addf %97, %100 : vector<16x1xf32>
    %102 = math.rsqrt %101 : vector<16x1xf32>
    %103 = vector.broadcast %102 : vector<16x1xf32> to vector<16x32xf32>
    %104 = arith.mulf %99, %103 : vector<16x32xf32>
    %105 = vector.broadcast %84 : vector<1x32xf32> to vector<16x32xf32>
    %106 = arith.mulf %104, %105 : vector<16x32xf32>
    %107 = vector.broadcast %86 : vector<1x32xf32> to vector<16x32xf32>
    %108 = arith.addf %106, %107 : vector<16x32xf32>
    %109 = vector.extract_strided_slice %22 {offsets = [0, 0, 0], sizes = [1, 32, 32], strides = [1, 1, 1]} : vector<2x32x32xf32> to vector<1x32x32xf32>
    %110 = vector.shape_cast %109 : vector<1x32x32xf32> to vector<32x32xf32>
    %cst_86 = arith.constant dense<0.000000e+00> : vector<16x32xf32>
    %111 = tpu.matmul %108, %110, %cst_86 {dimension_numbers = #tpu.dot_dimension_numbers<[1], [0], [0], [1], [0, 0, 1, 1], [], []>, precision = #tpu.contract_precision<fp32>} : vector<16x32xf32>, vector<32x32xf32>, vector<16x32xf32> -> vector<16x32xf32>
    %112 = vector.extract_strided_slice %25 {offsets = [0, 0, 0], sizes = [1, 16, 32], strides = [1, 1, 1]} : vector<2x16x32xf32> to vector<1x16x32xf32>
    %113 = vector.shape_cast %112 : vector<1x16x32xf32> to vector<16x32xf32>
    %cst_87 = arith.constant dense<0.000000e+00> : vector<16x16xf32>
    %114 = tpu.matmul %111, %113, %cst_87 {dimension_numbers = #tpu.dot_dimension_numbers<[1], [1], [0], [0], [0, 0, 1, 0], [], []>, precision = #tpu.contract_precision<fp32>} : vector<16x32xf32>, vector<16x32xf32>, vector<16x16xf32> -> vector<16x16xf32>
    %115 = arith.addf %114, %2 : vector<16x16xf32>
    %cst_88 = arith.constant dense<0xFF800000> : vector<16xf32>
    %116 = vector.multi_reduction <maximumf>, %115, %cst_88 [1] : vector<16x16xf32> to vector<16xf32>
    %117 = vector.shape_cast %116 : vector<16xf32> to vector<16x1xf32>
    %118 = vector.broadcast %117 : vector<16x1xf32> to vector<16x16xf32>
    %119 = arith.subf %115, %118 : vector<16x16xf32>
    %120 = math.exp %119 : vector<16x16xf32>
    %cst_89 = arith.constant dense<0.000000e+00> : vector<16xf32>
    %121 = vector.multi_reduction <add>, %120, %cst_89 [1] : vector<16x16xf32> to vector<16xf32>
    %122 = vector.shape_cast %121 : vector<16xf32> to vector<16x1xf32>
    %123 = vector.broadcast %122 : vector<16x1xf32> to vector<16x16xf32>
    %124 = arith.divf %120, %123 : vector<16x16xf32>
    %125 = vector.extract_strided_slice %26 {offsets = [0, 0, 0], sizes = [1, 16, 32], strides = [1, 1, 1]} : vector<2x16x32xf32> to vector<1x16x32xf32>
    %126 = vector.shape_cast %125 : vector<1x16x32xf32> to vector<16x32xf32>
    %cst_90 = arith.constant dense<0.000000e+00> : vector<16x32xf32>
    %127 = tpu.matmul %124, %126, %cst_90 {dimension_numbers = #tpu.dot_dimension_numbers<[1], [0], [0], [1], [0, 0, 1, 1], [], []>, precision = #tpu.contract_precision<fp32>} : vector<16x16xf32>, vector<16x32xf32>, vector<16x32xf32> -> vector<16x32xf32>
    %128 = vector.extract_strided_slice %25 {offsets = [1, 0, 0], sizes = [1, 16, 32], strides = [1, 1, 1]} : vector<2x16x32xf32> to vector<1x16x32xf32>
    %129 = vector.shape_cast %128 : vector<1x16x32xf32> to vector<16x32xf32>
    %cst_91 = arith.constant dense<0.000000e+00> : vector<16x16xf32>
    %130 = tpu.matmul %111, %129, %cst_91 {dimension_numbers = #tpu.dot_dimension_numbers<[1], [1], [0], [0], [0, 0, 1, 0], [], []>, precision = #tpu.contract_precision<fp32>} : vector<16x32xf32>, vector<16x32xf32>, vector<16x16xf32> -> vector<16x16xf32>
    %131 = arith.addf %130, %2 : vector<16x16xf32>
    %cst_92 = arith.constant dense<0xFF800000> : vector<16xf32>
    %132 = vector.multi_reduction <maximumf>, %131, %cst_92 [1] : vector<16x16xf32> to vector<16xf32>
    %133 = vector.shape_cast %132 : vector<16xf32> to vector<16x1xf32>
    %134 = vector.broadcast %133 : vector<16x1xf32> to vector<16x16xf32>
    %135 = arith.subf %131, %134 : vector<16x16xf32>
    %136 = math.exp %135 : vector<16x16xf32>
    %cst_93 = arith.constant dense<0.000000e+00> : vector<16xf32>
    %137 = vector.multi_reduction <add>, %136, %cst_93 [1] : vector<16x16xf32> to vector<16xf32>
    %138 = vector.shape_cast %137 : vector<16xf32> to vector<16x1xf32>
    %139 = vector.broadcast %138 : vector<16x1xf32> to vector<16x16xf32>
    %140 = arith.divf %136, %139 : vector<16x16xf32>
    %141 = vector.extract_strided_slice %26 {offsets = [1, 0, 0], sizes = [1, 16, 32], strides = [1, 1, 1]} : vector<2x16x32xf32> to vector<1x16x32xf32>
    %142 = vector.shape_cast %141 : vector<1x16x32xf32> to vector<16x32xf32>
    %cst_94 = arith.constant dense<0.000000e+00> : vector<16x32xf32>
    %143 = tpu.matmul %140, %142, %cst_94 {dimension_numbers = #tpu.dot_dimension_numbers<[1], [0], [0], [1], [0, 0, 1, 1], [], []>, precision = #tpu.contract_precision<fp32>} : vector<16x16xf32>, vector<16x32xf32>, vector<16x32xf32> -> vector<16x32xf32>
    %144 = arith.addf %127, %143 : vector<16x32xf32>
    %145 = arith.addf %108, %144 : vector<16x32xf32>
    %146 = vector.extract_strided_slice %16 {offsets = [0, 0, 0], sizes = [1, 1, 32], strides = [1, 1, 1]} : vector<2x1x32xf32> to vector<1x1x32xf32>
    %147 = vector.shape_cast %146 : vector<1x1x32xf32> to vector<1x32xf32>
    %148 = vector.extract_strided_slice %15 {offsets = [0, 0, 0], sizes = [1, 1, 32], strides = [1, 1, 1]} : vector<2x1x32xf32> to vector<1x1x32xf32>
    %149 = vector.shape_cast %148 : vector<1x1x32xf32> to vector<1x32xf32>
    %cst_95 = arith.constant dense<0.000000e+00> : vector<16xf32>
    %150 = vector.multi_reduction <add>, %145, %cst_95 [1] : vector<16x32xf32> to vector<16xf32>
    %151 = vector.shape_cast %150 : vector<16xf32> to vector<16x1xf32>
    %cst_96 = arith.constant 3.200000e+01 : f32
    %152 = vector.broadcast %cst_96 : f32 to vector<16x1xf32>
    %153 = arith.divf %151, %152 : vector<16x1xf32>
    %154 = vector.broadcast %153 : vector<16x1xf32> to vector<16x32xf32>
    %155 = arith.subf %145, %154 : vector<16x32xf32>
    %156 = arith.mulf %155, %155 : vector<16x32xf32>
    %cst_97 = arith.constant dense<0.000000e+00> : vector<16xf32>
    %157 = vector.multi_reduction <add>, %156, %cst_97 [1] : vector<16x32xf32> to vector<16xf32>
    %158 = vector.shape_cast %157 : vector<16xf32> to vector<16x1xf32>
    %cst_98 = arith.constant 3.200000e+01 : f32
    %159 = vector.broadcast %cst_98 : f32 to vector<16x1xf32>
    %160 = arith.divf %158, %159 : vector<16x1xf32>
    %161 = vector.broadcast %153 : vector<16x1xf32> to vector<16x32xf32>
    %162 = arith.subf %145, %161 : vector<16x32xf32>
    %cst_99 = arith.constant 9.99999974E-6 : f32
    %163 = vector.broadcast %cst_99 : f32 to vector<16x1xf32>
    %164 = arith.addf %160, %163 : vector<16x1xf32>
    %165 = math.rsqrt %164 : vector<16x1xf32>
    %166 = vector.broadcast %165 : vector<16x1xf32> to vector<16x32xf32>
    %167 = arith.mulf %162, %166 : vector<16x32xf32>
    %168 = vector.broadcast %147 : vector<1x32xf32> to vector<16x32xf32>
    %169 = arith.mulf %167, %168 : vector<16x32xf32>
    %170 = vector.broadcast %149 : vector<1x32xf32> to vector<16x32xf32>
    %171 = arith.addf %169, %170 : vector<16x32xf32>
    %172 = vector.extract_strided_slice %9 {offsets = [0, 0, 0], sizes = [1, 32, 32], strides = [1, 1, 1]} : vector<2x32x32xf32> to vector<1x32x32xf32>
    %173 = vector.shape_cast %172 : vector<1x32x32xf32> to vector<32x32xf32>
    %cst_100 = arith.constant dense<0.000000e+00> : vector<16x32xf32>
    %174 = tpu.matmul %171, %173, %cst_100 {dimension_numbers = #tpu.dot_dimension_numbers<[1], [0], [0], [1], [0, 0, 1, 1], [], []>, precision = #tpu.contract_precision<fp32>} : vector<16x32xf32>, vector<32x32xf32>, vector<16x32xf32> -> vector<16x32xf32>
    %175 = vector.extract_strided_slice %8 {offsets = [0, 0, 0], sizes = [1, 1, 32], strides = [1, 1, 1]} : vector<2x1x32xf32> to vector<1x1x32xf32>
    %176 = vector.shape_cast %175 : vector<1x1x32xf32> to vector<1x32xf32>
    %177 = vector.broadcast %176 : vector<1x32xf32> to vector<16x32xf32>
    %178 = arith.addf %174, %177 : vector<16x32xf32>
    %cst_101 = arith.constant 0.000000e+00 : f32
    %179 = vector.broadcast %cst_101 : f32 to vector<16x32xf32>
    %180 = arith.maximumf %178, %179 : vector<16x32xf32>
    %181 = arith.addf %180, %171 : vector<16x32xf32>
    %182 = vector.shape_cast %12 : vector<1x1x32xf32> to vector<1x32xf32>
    %183 = vector.shape_cast %11 : vector<1x1x32xf32> to vector<1x32xf32>
    %cst_102 = arith.constant dense<0.000000e+00> : vector<16xf32>
    %184 = vector.multi_reduction <add>, %181, %cst_102 [1] : vector<16x32xf32> to vector<16xf32>
    %185 = vector.shape_cast %184 : vector<16xf32> to vector<16x1xf32>
    %cst_103 = arith.constant 3.200000e+01 : f32
    %186 = vector.broadcast %cst_103 : f32 to vector<16x1xf32>
    %187 = arith.divf %185, %186 : vector<16x1xf32>
    %188 = vector.broadcast %187 : vector<16x1xf32> to vector<16x32xf32>
    %189 = arith.subf %181, %188 : vector<16x32xf32>
    %190 = arith.mulf %189, %189 : vector<16x32xf32>
    %cst_104 = arith.constant dense<0.000000e+00> : vector<16xf32>
    %191 = vector.multi_reduction <add>, %190, %cst_104 [1] : vector<16x32xf32> to vector<16xf32>
    %192 = vector.shape_cast %191 : vector<16xf32> to vector<16x1xf32>
    %cst_105 = arith.constant 3.200000e+01 : f32
    %193 = vector.broadcast %cst_105 : f32 to vector<16x1xf32>
    %194 = arith.divf %192, %193 : vector<16x1xf32>
    %195 = vector.broadcast %187 : vector<16x1xf32> to vector<16x32xf32>
    %196 = arith.subf %181, %195 : vector<16x32xf32>
    %cst_106 = arith.constant 9.99999974E-6 : f32
    %197 = vector.broadcast %cst_106 : f32 to vector<16x1xf32>
    %198 = arith.addf %194, %197 : vector<16x1xf32>
    %199 = math.rsqrt %198 : vector<16x1xf32>
    %200 = vector.broadcast %199 : vector<16x1xf32> to vector<16x32xf32>
    %201 = arith.mulf %196, %200 : vector<16x32xf32>
    %202 = vector.broadcast %182 : vector<1x32xf32> to vector<16x32xf32>
    %203 = arith.mulf %201, %202 : vector<16x32xf32>
    %204 = vector.broadcast %183 : vector<1x32xf32> to vector<16x32xf32>
    %205 = arith.addf %203, %204 : vector<16x32xf32>
    %206 = vector.extract_strided_slice %21 {offsets = [1, 0, 0], sizes = [1, 32, 32], strides = [1, 1, 1]} : vector<2x32x32xf32> to vector<1x32x32xf32>
    %207 = vector.shape_cast %206 : vector<1x32x32xf32> to vector<32x32xf32>
    %cst_107 = arith.constant dense<0.000000e+00> : vector<16x32xf32>
    %208 = tpu.matmul %205, %207, %cst_107 {dimension_numbers = #tpu.dot_dimension_numbers<[1], [0], [0], [1], [0, 0, 1, 1], [], []>, precision = #tpu.contract_precision<fp32>} : vector<16x32xf32>, vector<32x32xf32>, vector<16x32xf32> -> vector<16x32xf32>
    %209 = vector.extract_strided_slice %20 {offsets = [1, 0, 0], sizes = [1, 32, 32], strides = [1, 1, 1]} : vector<2x32x32xf32> to vector<1x32x32xf32>
    %210 = vector.shape_cast %209 : vector<1x32x32xf32> to vector<32x32xf32>
    %cst_108 = arith.constant dense<0.000000e+00> : vector<16x32xf32>
    %211 = tpu.matmul %205, %210, %cst_108 {dimension_numbers = #tpu.dot_dimension_numbers<[1], [0], [0], [1], [0, 0, 1, 1], [], []>, precision = #tpu.contract_precision<fp32>} : vector<16x32xf32>, vector<32x32xf32>, vector<16x32xf32> -> vector<16x32xf32>
    %212 = vector.extract_strided_slice %23 {offsets = [1, 0, 0], sizes = [1, 32, 32], strides = [1, 1, 1]} : vector<2x32x32xf32> to vector<1x32x32xf32>
    %213 = vector.shape_cast %212 : vector<1x32x32xf32> to vector<32x32xf32>
    %cst_109 = arith.constant dense<0.000000e+00> : vector<16x32xf32>
    %214 = tpu.matmul %205, %213, %cst_109 {dimension_numbers = #tpu.dot_dimension_numbers<[1], [0], [0], [1], [0, 0, 1, 1], [], []>, precision = #tpu.contract_precision<fp32>} : vector<16x32xf32>, vector<32x32xf32>, vector<16x32xf32> -> vector<16x32xf32>
    %215 = vector.extract_strided_slice %10 {offsets = [0, 0, 0], sizes = [1, 1, 32], strides = [1, 1, 1]} : vector<2x1x32xf32> to vector<1x1x32xf32>
    %216 = vector.shape_cast %215 : vector<1x1x32xf32> to vector<1x32xf32>
    %217 = vector.broadcast %216 : vector<1x32xf32> to vector<16x32xf32>
    %218 = arith.mulf %208, %217 : vector<16x32xf32>
    %cst_110 = arith.constant dense<0.000000e+00> : vector<16x16xf32>
    %219 = tpu.matmul %218, %211, %cst_110 {dimension_numbers = #tpu.dot_dimension_numbers<[1], [1], [0], [0], [0, 0, 1, 0], [], []>, precision = #tpu.contract_precision<fp32>} : vector<16x32xf32>, vector<16x32xf32>, vector<16x16xf32> -> vector<16x16xf32>
    %220 = arith.addf %219, %3 : vector<16x16xf32>
    %cst_111 = arith.constant dense<0xFF800000> : vector<16xf32>
    %221 = vector.multi_reduction <maximumf>, %220, %cst_111 [1] : vector<16x16xf32> to vector<16xf32>
    %222 = vector.shape_cast %221 : vector<16xf32> to vector<16x1xf32>
    %223 = vector.broadcast %222 : vector<16x1xf32> to vector<16x16xf32>
    %224 = arith.subf %220, %223 : vector<16x16xf32>
    %225 = math.exp %224 : vector<16x16xf32>
    %cst_112 = arith.constant dense<0.000000e+00> : vector<16xf32>
    %226 = vector.multi_reduction <add>, %225, %cst_112 [1] : vector<16x16xf32> to vector<16xf32>
    %227 = vector.shape_cast %226 : vector<16xf32> to vector<16x1xf32>
    %228 = vector.broadcast %227 : vector<16x1xf32> to vector<16x16xf32>
    %229 = arith.divf %225, %228 : vector<16x16xf32>
    %230 = vector.broadcast %216 : vector<1x32xf32> to vector<16x32xf32>
    %231 = arith.mulf %214, %230 : vector<16x32xf32>
    %cst_113 = arith.constant dense<0.000000e+00> : vector<16x32xf32>
    %232 = tpu.matmul %229, %231, %cst_113 {dimension_numbers = #tpu.dot_dimension_numbers<[1], [0], [0], [1], [0, 0, 1, 1], [], []>, precision = #tpu.contract_precision<fp32>} : vector<16x16xf32>, vector<16x32xf32>, vector<16x32xf32> -> vector<16x32xf32>
    %233 = vector.extract_strided_slice %10 {offsets = [1, 0, 0], sizes = [1, 1, 32], strides = [1, 1, 1]} : vector<2x1x32xf32> to vector<1x1x32xf32>
    %234 = vector.shape_cast %233 : vector<1x1x32xf32> to vector<1x32xf32>
    %235 = vector.broadcast %234 : vector<1x32xf32> to vector<16x32xf32>
    %236 = arith.mulf %208, %235 : vector<16x32xf32>
    %cst_114 = arith.constant dense<0.000000e+00> : vector<16x16xf32>
    %237 = tpu.matmul %236, %211, %cst_114 {dimension_numbers = #tpu.dot_dimension_numbers<[1], [1], [0], [0], [0, 0, 1, 0], [], []>, precision = #tpu.contract_precision<fp32>} : vector<16x32xf32>, vector<16x32xf32>, vector<16x16xf32> -> vector<16x16xf32>
    %238 = arith.addf %237, %3 : vector<16x16xf32>
    %cst_115 = arith.constant dense<0xFF800000> : vector<16xf32>
    %239 = vector.multi_reduction <maximumf>, %238, %cst_115 [1] : vector<16x16xf32> to vector<16xf32>
    %240 = vector.shape_cast %239 : vector<16xf32> to vector<16x1xf32>
    %241 = vector.broadcast %240 : vector<16x1xf32> to vector<16x16xf32>
    %242 = arith.subf %238, %241 : vector<16x16xf32>
    %243 = math.exp %242 : vector<16x16xf32>
    %cst_116 = arith.constant dense<0.000000e+00> : vector<16xf32>
    %244 = vector.multi_reduction <add>, %243, %cst_116 [1] : vector<16x16xf32> to vector<16xf32>
    %245 = vector.shape_cast %244 : vector<16xf32> to vector<16x1xf32>
    %246 = vector.broadcast %245 : vector<16x1xf32> to vector<16x16xf32>
    %247 = arith.divf %243, %246 : vector<16x16xf32>
    %248 = vector.broadcast %234 : vector<1x32xf32> to vector<16x32xf32>
    %249 = arith.mulf %214, %248 : vector<16x32xf32>
    %cst_117 = arith.constant dense<0.000000e+00> : vector<16x32xf32>
    %250 = tpu.matmul %247, %249, %cst_117 {dimension_numbers = #tpu.dot_dimension_numbers<[1], [0], [0], [1], [0, 0, 1, 1], [], []>, precision = #tpu.contract_precision<fp32>} : vector<16x16xf32>, vector<16x32xf32>, vector<16x32xf32> -> vector<16x32xf32>
    %251 = arith.addf %232, %250 : vector<16x32xf32>
    %252 = arith.addf %205, %251 : vector<16x32xf32>
    %253 = vector.extract_strided_slice %14 {offsets = [1, 0, 0], sizes = [1, 1, 32], strides = [1, 1, 1]} : vector<2x1x32xf32> to vector<1x1x32xf32>
    %254 = vector.shape_cast %253 : vector<1x1x32xf32> to vector<1x32xf32>
    %255 = vector.extract_strided_slice %13 {offsets = [1, 0, 0], sizes = [1, 1, 32], strides = [1, 1, 1]} : vector<2x1x32xf32> to vector<1x1x32xf32>
    %256 = vector.shape_cast %255 : vector<1x1x32xf32> to vector<1x32xf32>
    %cst_118 = arith.constant dense<0.000000e+00> : vector<16xf32>
    %257 = vector.multi_reduction <add>, %252, %cst_118 [1] : vector<16x32xf32> to vector<16xf32>
    %258 = vector.shape_cast %257 : vector<16xf32> to vector<16x1xf32>
    %cst_119 = arith.constant 3.200000e+01 : f32
    %259 = vector.broadcast %cst_119 : f32 to vector<16x1xf32>
    %260 = arith.divf %258, %259 : vector<16x1xf32>
    %261 = vector.broadcast %260 : vector<16x1xf32> to vector<16x32xf32>
    %262 = arith.subf %252, %261 : vector<16x32xf32>
    %263 = arith.mulf %262, %262 : vector<16x32xf32>
    %cst_120 = arith.constant dense<0.000000e+00> : vector<16xf32>
    %264 = vector.multi_reduction <add>, %263, %cst_120 [1] : vector<16x32xf32> to vector<16xf32>
    %265 = vector.shape_cast %264 : vector<16xf32> to vector<16x1xf32>
    %cst_121 = arith.constant 3.200000e+01 : f32
    %266 = vector.broadcast %cst_121 : f32 to vector<16x1xf32>
    %267 = arith.divf %265, %266 : vector<16x1xf32>
    %268 = vector.broadcast %260 : vector<16x1xf32> to vector<16x32xf32>
    %269 = arith.subf %252, %268 : vector<16x32xf32>
    %cst_122 = arith.constant 9.99999974E-6 : f32
    %270 = vector.broadcast %cst_122 : f32 to vector<16x1xf32>
    %271 = arith.addf %267, %270 : vector<16x1xf32>
    %272 = math.rsqrt %271 : vector<16x1xf32>
    %273 = vector.broadcast %272 : vector<16x1xf32> to vector<16x32xf32>
    %274 = arith.mulf %269, %273 : vector<16x32xf32>
    %275 = vector.broadcast %254 : vector<1x32xf32> to vector<16x32xf32>
    %276 = arith.mulf %274, %275 : vector<16x32xf32>
    %277 = vector.broadcast %256 : vector<1x32xf32> to vector<16x32xf32>
    %278 = arith.addf %276, %277 : vector<16x32xf32>
    %279 = vector.extract_strided_slice %22 {offsets = [1, 0, 0], sizes = [1, 32, 32], strides = [1, 1, 1]} : vector<2x32x32xf32> to vector<1x32x32xf32>
    %280 = vector.shape_cast %279 : vector<1x32x32xf32> to vector<32x32xf32>
    %cst_123 = arith.constant dense<0.000000e+00> : vector<16x32xf32>
    %281 = tpu.matmul %278, %280, %cst_123 {dimension_numbers = #tpu.dot_dimension_numbers<[1], [0], [0], [1], [0, 0, 1, 1], [], []>, precision = #tpu.contract_precision<fp32>} : vector<16x32xf32>, vector<32x32xf32>, vector<16x32xf32> -> vector<16x32xf32>
    %282 = vector.extract_strided_slice %25 {offsets = [0, 0, 0], sizes = [1, 16, 32], strides = [1, 1, 1]} : vector<2x16x32xf32> to vector<1x16x32xf32>
    %283 = vector.shape_cast %282 : vector<1x16x32xf32> to vector<16x32xf32>
    %cst_124 = arith.constant dense<0.000000e+00> : vector<16x16xf32>
    %284 = tpu.matmul %281, %283, %cst_124 {dimension_numbers = #tpu.dot_dimension_numbers<[1], [1], [0], [0], [0, 0, 1, 0], [], []>, precision = #tpu.contract_precision<fp32>} : vector<16x32xf32>, vector<16x32xf32>, vector<16x16xf32> -> vector<16x16xf32>
    %285 = arith.addf %284, %2 : vector<16x16xf32>
    %cst_125 = arith.constant dense<0xFF800000> : vector<16xf32>
    %286 = vector.multi_reduction <maximumf>, %285, %cst_125 [1] : vector<16x16xf32> to vector<16xf32>
    %287 = vector.shape_cast %286 : vector<16xf32> to vector<16x1xf32>
    %288 = vector.broadcast %287 : vector<16x1xf32> to vector<16x16xf32>
    %289 = arith.subf %285, %288 : vector<16x16xf32>
    %290 = math.exp %289 : vector<16x16xf32>
    %cst_126 = arith.constant dense<0.000000e+00> : vector<16xf32>
    %291 = vector.multi_reduction <add>, %290, %cst_126 [1] : vector<16x16xf32> to vector<16xf32>
    %292 = vector.shape_cast %291 : vector<16xf32> to vector<16x1xf32>
    %293 = vector.broadcast %292 : vector<16x1xf32> to vector<16x16xf32>
    %294 = arith.divf %290, %293 : vector<16x16xf32>
    %295 = vector.extract_strided_slice %26 {offsets = [0, 0, 0], sizes = [1, 16, 32], strides = [1, 1, 1]} : vector<2x16x32xf32> to vector<1x16x32xf32>
    %296 = vector.shape_cast %295 : vector<1x16x32xf32> to vector<16x32xf32>
    %cst_127 = arith.constant dense<0.000000e+00> : vector<16x32xf32>
    %297 = tpu.matmul %294, %296, %cst_127 {dimension_numbers = #tpu.dot_dimension_numbers<[1], [0], [0], [1], [0, 0, 1, 1], [], []>, precision = #tpu.contract_precision<fp32>} : vector<16x16xf32>, vector<16x32xf32>, vector<16x32xf32> -> vector<16x32xf32>
    %298 = vector.extract_strided_slice %25 {offsets = [1, 0, 0], sizes = [1, 16, 32], strides = [1, 1, 1]} : vector<2x16x32xf32> to vector<1x16x32xf32>
    %299 = vector.shape_cast %298 : vector<1x16x32xf32> to vector<16x32xf32>
    %cst_128 = arith.constant dense<0.000000e+00> : vector<16x16xf32>
    %300 = tpu.matmul %281, %299, %cst_128 {dimension_numbers = #tpu.dot_dimension_numbers<[1], [1], [0], [0], [0, 0, 1, 0], [], []>, precision = #tpu.contract_precision<fp32>} : vector<16x32xf32>, vector<16x32xf32>, vector<16x16xf32> -> vector<16x16xf32>
    %301 = arith.addf %300, %2 : vector<16x16xf32>
    %cst_129 = arith.constant dense<0xFF800000> : vector<16xf32>
    %302 = vector.multi_reduction <maximumf>, %301, %cst_129 [1] : vector<16x16xf32> to vector<16xf32>
    %303 = vector.shape_cast %302 : vector<16xf32> to vector<16x1xf32>
    %304 = vector.broadcast %303 : vector<16x1xf32> to vector<16x16xf32>
    %305 = arith.subf %301, %304 : vector<16x16xf32>
    %306 = math.exp %305 : vector<16x16xf32>
    %cst_130 = arith.constant dense<0.000000e+00> : vector<16xf32>
    %307 = vector.multi_reduction <add>, %306, %cst_130 [1] : vector<16x16xf32> to vector<16xf32>
    %308 = vector.shape_cast %307 : vector<16xf32> to vector<16x1xf32>
    %309 = vector.broadcast %308 : vector<16x1xf32> to vector<16x16xf32>
    %310 = arith.divf %306, %309 : vector<16x16xf32>
    %311 = vector.extract_strided_slice %26 {offsets = [1, 0, 0], sizes = [1, 16, 32], strides = [1, 1, 1]} : vector<2x16x32xf32> to vector<1x16x32xf32>
    %312 = vector.shape_cast %311 : vector<1x16x32xf32> to vector<16x32xf32>
    %cst_131 = arith.constant dense<0.000000e+00> : vector<16x32xf32>
    %313 = tpu.matmul %310, %312, %cst_131 {dimension_numbers = #tpu.dot_dimension_numbers<[1], [0], [0], [1], [0, 0, 1, 1], [], []>, precision = #tpu.contract_precision<fp32>} : vector<16x16xf32>, vector<16x32xf32>, vector<16x32xf32> -> vector<16x32xf32>
    %314 = arith.addf %297, %313 : vector<16x32xf32>
    %315 = arith.addf %278, %314 : vector<16x32xf32>
    %316 = vector.extract_strided_slice %16 {offsets = [1, 0, 0], sizes = [1, 1, 32], strides = [1, 1, 1]} : vector<2x1x32xf32> to vector<1x1x32xf32>
    %317 = vector.shape_cast %316 : vector<1x1x32xf32> to vector<1x32xf32>
    %318 = vector.extract_strided_slice %15 {offsets = [1, 0, 0], sizes = [1, 1, 32], strides = [1, 1, 1]} : vector<2x1x32xf32> to vector<1x1x32xf32>
    %319 = vector.shape_cast %318 : vector<1x1x32xf32> to vector<1x32xf32>
    %cst_132 = arith.constant dense<0.000000e+00> : vector<16xf32>
    %320 = vector.multi_reduction <add>, %315, %cst_132 [1] : vector<16x32xf32> to vector<16xf32>
    %321 = vector.shape_cast %320 : vector<16xf32> to vector<16x1xf32>
    %cst_133 = arith.constant 3.200000e+01 : f32
    %322 = vector.broadcast %cst_133 : f32 to vector<16x1xf32>
    %323 = arith.divf %321, %322 : vector<16x1xf32>
    %324 = vector.broadcast %323 : vector<16x1xf32> to vector<16x32xf32>
    %325 = arith.subf %315, %324 : vector<16x32xf32>
    %326 = arith.mulf %325, %325 : vector<16x32xf32>
    %cst_134 = arith.constant dense<0.000000e+00> : vector<16xf32>
    %327 = vector.multi_reduction <add>, %326, %cst_134 [1] : vector<16x32xf32> to vector<16xf32>
    %328 = vector.shape_cast %327 : vector<16xf32> to vector<16x1xf32>
    %cst_135 = arith.constant 3.200000e+01 : f32
    %329 = vector.broadcast %cst_135 : f32 to vector<16x1xf32>
    %330 = arith.divf %328, %329 : vector<16x1xf32>
    %331 = vector.broadcast %323 : vector<16x1xf32> to vector<16x32xf32>
    %332 = arith.subf %315, %331 : vector<16x32xf32>
    %cst_136 = arith.constant 9.99999974E-6 : f32
    %333 = vector.broadcast %cst_136 : f32 to vector<16x1xf32>
    %334 = arith.addf %330, %333 : vector<16x1xf32>
    %335 = math.rsqrt %334 : vector<16x1xf32>
    %336 = vector.broadcast %335 : vector<16x1xf32> to vector<16x32xf32>
    %337 = arith.mulf %332, %336 : vector<16x32xf32>
    %338 = vector.broadcast %317 : vector<1x32xf32> to vector<16x32xf32>
    %339 = arith.mulf %337, %338 : vector<16x32xf32>
    %340 = vector.broadcast %319 : vector<1x32xf32> to vector<16x32xf32>
    %341 = arith.addf %339, %340 : vector<16x32xf32>
    %342 = vector.extract_strided_slice %9 {offsets = [1, 0, 0], sizes = [1, 32, 32], strides = [1, 1, 1]} : vector<2x32x32xf32> to vector<1x32x32xf32>
    %343 = vector.shape_cast %342 : vector<1x32x32xf32> to vector<32x32xf32>
    %cst_137 = arith.constant dense<0.000000e+00> : vector<16x32xf32>
    %344 = tpu.matmul %341, %343, %cst_137 {dimension_numbers = #tpu.dot_dimension_numbers<[1], [0], [0], [1], [0, 0, 1, 1], [], []>, precision = #tpu.contract_precision<fp32>} : vector<16x32xf32>, vector<32x32xf32>, vector<16x32xf32> -> vector<16x32xf32>
    %345 = vector.extract_strided_slice %8 {offsets = [1, 0, 0], sizes = [1, 1, 32], strides = [1, 1, 1]} : vector<2x1x32xf32> to vector<1x1x32xf32>
    %346 = vector.shape_cast %345 : vector<1x1x32xf32> to vector<1x32xf32>
    %347 = vector.broadcast %346 : vector<1x32xf32> to vector<16x32xf32>
    %348 = arith.addf %344, %347 : vector<16x32xf32>
    %cst_138 = arith.constant 0.000000e+00 : f32
    %349 = vector.broadcast %cst_138 : f32 to vector<16x32xf32>
    %350 = arith.maximumf %348, %349 : vector<16x32xf32>
    %351 = arith.addf %350, %341 : vector<16x32xf32>
    %cst_139 = arith.constant dense<0.000000e+00> : vector<16x12xf32>
    %352 = tpu.matmul %351, %18, %cst_139 {dimension_numbers = #tpu.dot_dimension_numbers<[1], [0], [0], [1], [0, 0, 1, 1], [], []>, precision = #tpu.contract_precision<fp32>} : vector<16x32xf32>, vector<32x12xf32>, vector<16x12xf32> -> vector<16x12xf32>
    %353 = vector.broadcast %17 : vector<1x12xf32> to vector<16x12xf32>
    %354 = arith.addf %352, %353 : vector<16x12xf32>
    %355 = vector.broadcast %0 : vector<1x12xf32> to vector<16x12xf32>
    %356 = arith.subf %355, %354 : vector<16x12xf32>
    %cst_140 = arith.constant 5.000000e-01 : f32
    %357 = vector.broadcast %cst_140 : f32 to vector<16x12xf32>
    %358 = arith.mulf %357, %356 : vector<16x12xf32>
    %359 = math.tanh %358 : vector<16x12xf32>
    %cst_141 = arith.constant 1.000000e+00 : f32
    %360 = vector.broadcast %cst_141 : f32 to vector<16x12xf32>
    %361 = arith.addf %359, %360 : vector<16x12xf32>
    %cst_142 = arith.constant 5.000000e-01 : f32
    %362 = vector.broadcast %cst_142 : f32 to vector<16x12xf32>
    %363 = arith.mulf %362, %361 : vector<16x12xf32>
    %364 = vector.broadcast %1 : vector<1x12xf32> to vector<16x12xf32>
    %365 = arith.subf %364, %354 : vector<16x12xf32>
    %cst_143 = arith.constant 5.000000e-01 : f32
    %366 = vector.broadcast %cst_143 : f32 to vector<16x12xf32>
    %367 = arith.mulf %366, %365 : vector<16x12xf32>
    %368 = math.tanh %367 : vector<16x12xf32>
    %cst_144 = arith.constant 1.000000e+00 : f32
    %369 = vector.broadcast %cst_144 : f32 to vector<16x12xf32>
    %370 = arith.addf %368, %369 : vector<16x12xf32>
    %cst_145 = arith.constant 5.000000e-01 : f32
    %371 = vector.broadcast %cst_145 : f32 to vector<16x12xf32>
    %372 = arith.mulf %371, %370 : vector<16x12xf32>
    %373 = arith.subf %363, %372 : vector<16x12xf32>
    %c0_146 = arith.constant 0 : index
    %c0_147 = arith.constant 0 : index
    %374 = vector.load %arg27[%c0_146, %c0_147] : memref<16x12xf32, #tpu.memory_space<vmem>>, vector<16x12xf32>
    tpu.vector_store %arg27[%c0_146, %c0_147], %373 {strides = array<i32>} : memref<16x12xf32, #tpu.memory_space<vmem>>, vector<16x12xf32>,
    return
  }
}

</mosaic_0001>

<bundles_post_ra>
// kernel: tpu_custom_call.1
= control target key start
LH: loop header
LB: loop body
LE: loop exit
PB: predicated region body
PF: predicated region fallthrough
CT: control target
= control target key end

     0   :  { %s21144_s0 = inlined_call_operand.vmem [shape: f32[16,4], index: 0, kind: input, shape index: {}]   ;;  %s21145_s1 = inlined_call_operand.hbm [shape: f32[2,16,32], index: 1, kind: input, shape index: {}]   ;;  %s21146_s2 = inlined_call_operand.hbm [shape: f32[2,16,32], index: 2, kind: input, shape index: {}]   ;;  %s21147_s3 = inlined_call_operand.hbm [shape: f32[1,12], index: 3, kind: input, shape index: {}]   ;;  %s21148_s4 = inlined_call_operand.hbm [shape: f32[1,12], index: 4, kind: input, shape index: {}]   ;;  %s21149_s5 = inlined_call_operand.hbm [shape: f32[16,16], index: 5, kind: input, shape index: {}]   ;;  %s21150_s6 = inlined_call_operand.hbm [shape: f32[16,16], index: 6, kind: input, shape index: {}]   ;;  %s21151_s7 = inlined_call_operand.hbm [shape: f32[1,16], index: 7, kind: input, shape index: {}]   ;;  %s21152_s8 = inlined_call_operand.hbm [shape: f32[1,32], index: 8, kind: input, shape index: {}]   ;;  %s21153_s9 = inlined_call_operand.hbm [shape: f32[4,16], index: 9, kind: input, shape index: {}]   ;;  %s21154_s10 = inlined_call_operand.hbm [shape: f32[16,32], index: 10, kind: input, shape index: {}]   ;;  %s21155_s11 = inlined_call_operand.hbm [shape: f32[2,1,32], index: 11, kind: input, shape index: {}]   ;;  %s21156_s12 = inlined_call_operand.vmem [shape: f32[2,32,32], index: 12, kind: input, shape index: {}]   ;;  %s21157_s13 = inlined_call_operand.hbm [shape: f32[2,1,32], index: 13, kind: input, shape index: {}]   ;;  %s21158_s14 = inlined_call_operand.hbm [shape: f32[1,1,32], index: 14, kind: input, shape index: {}]   ;;  %s21159_s15 = inlined_call_operand.hbm [shape: f32[1,1,32], index: 15, kind: input, shape index: {}]   ;;  %s21160_s16 = inlined_call_operand.hbm [shape: f32[2,1,32], index: 16, kind: input, shape index: {}]   ;;  %s21161_s17 = inlined_call_operand.vmem [shape: f32[2,1,32], index: 17, kind: input, shape index: {}]   ;;  %s21162_s18 = inlined_call_operand.vmem [shape: f32[2,1,32], index: 18, kind: input, shape index: {}]   ;;  %s21163_s19 = inlined_call_operand.vmem [shape: f32[2,1,32], index: 19, kind: input, shape index: {}]   ;;  %s21164_s20 = inlined_call_operand.vmem [shape: f32[1,12], index: 20, kind: input, shape index: {}]   ;;  %s21165_s21 = inlined_call_operand.vmem [shape: f32[32,12], index: 21, kind: input, shape index: {}]   ;;  %s21166_s22 = inlined_call_operand.vmem [shape: f32[16,32], index: 22, kind: input, shape index: {}]   ;;  %s21167_s23 = inlined_call_operand.hbm [shape: f32[2,32,32], index: 23, kind: input, shape index: {}]   ;;  %s21168_s24 = inlined_call_operand.hbm [shape: f32[2,32,32], index: 24, kind: input, shape index: {}]   ;;  %s21169_s25 = inlined_call_operand.hbm [shape: f32[2,32,32], index: 25, kind: input, shape index: {}]   ;;  %s21170_s26 = inlined_call_operand.hbm [shape: f32[2,32,32], index: 26, kind: input, shape index: {}]   ;;  %s21171_s27 = inlined_call_operand.hbm [shape: f32[16,12], index: 27, kind: output, shape index: {}]  }
   0x1   :  { %21205 = sst [smem:[#allocation60_spill]] %s21144_s0 }
   0x2   :  { %21206 = sst [smem:[#allocation61_spill]] %s21145_s1 }
   0x3   :  { %21207 = sst [smem:[#allocation62_spill]] %s21146_s2 }
   0x4   :  { %21208 = sst [smem:[#allocation63_spill]] %s21147_s3 }
   0x5   :  { %21209 = sst [smem:[#allocation64_spill]] %s21148_s4 }
   0x6   :  { %21210 = sst [smem:[#allocation65_spill]] %s21149_s5 }
   0x7   :  { %21211 = sst [smem:[#allocation66_spill]] %s21150_s6 }
   0x8   :  { %21212 = sst [smem:[#allocation67_spill]] %s21151_s7 }
   0x9   :  { %21213 = sst [smem:[#allocation68_spill]] %s21152_s8 }
   0xa   :  { %21214 = sst [smem:[#allocation69_spill]] %s21153_s9 }
   0xb   :  { %21215 = sst [smem:[#allocation70_spill]] %s21154_s10 }
   0xc   :  { %21216 = sst [smem:[#allocation71_spill]] %s21155_s11 }
   0xd   :  { %21217 = sst [smem:[#allocation72_spill]] %s21171_s27 }
   0xe   :  { %32 = vsyncpa [#allocation3], 0 }
   0xf   :  { %33 = vsyncpa [#allocation6], 0 }
  0x10   :  { %34 = vsyncpa [#allocation9], 0 }
  0x11   :  { %35 = vsyncpa [#allocation12], 0 }
  0x12   :  { %36 = vsyncpa [#allocation15], 0 }
  0x13   :  { %37 = vsyncpa [#allocation18], 0 }
  0x14   :  { %38 = vsyncpa [#allocation21], 0 }
  0x15   :  { %39 = vsyncpa [#allocation24], 0 }
  0x16   :  { %40 = vsyncpa [#allocation27], 0 }
  0x17   :  { %41 = vsyncpa [#allocation30], 0 }
  0x18   :  { %42 = vsyncpa [#allocation4], 0  ;;  %s18795_s7 = smov [#allocation5]   ;;  %s18796_s8 = smov [#allocation8]  }
  0x19   :  { %s62_s4 = sshll.u32 %s18795_s7, 4  ;;  %s85_s30 = sshll.u32 %s18796_s8, 4  ;;  %s63_s4 = int_to_ptr.vmem [resolvable:$true] %s62_s4  ;;  %s86_s30 = int_to_ptr.vmem [resolvable:$true] %s85_s30 }
  0x1a   :  { %s18381_s9 = scalar_lea.vmem %s63_s4, 512  ;;  %p18386_p1 = scmp.lt.s32.totalorder %s63_s4, %s63_s4 }
  0x1b   :  { %p18382_p0 = scmp.ne.s32.totalorder %s63_s4, %s18381_s9  ;;  %p18387_p2 = scmp.lt.s32.totalorder %s18381_s9, %s18381_s9 }
  0x1d   :  { %p18388_p3 = por %p18387_p2, %p18386_p1 }
  0x1f   :  { %p18389_p4 = pnand %p18388_p3, %p18382_p0 }
  0x21   :  { %18392 = shalt.err (!%p18389_p4)
}
  0x22   :  { %s18797_s5 = smov 128   ;;  %s18798_s28 = smov 8  }
  0x23   :  { %s21218_s29 = sld [smem:[#allocation62_spill]]  ;;  %s18401_s1 = scalar_lea.vmem %s86_s30, 16 }
  0x24   :  { %p18402_p5 = scmp.ne.s32.totalorder %s86_s30, %s18401_s1  ;;  %s18405_s6 = scalar_lea.vmem %s86_s30, 32 }
  0x25   :  { %p18406_p6 = scmp.lt.s32.totalorder %s86_s30, %s86_s30  ;;  %p18407_p7 = scmp.lt.s32.totalorder %s18405_s6, %s18401_s1 }
  0x27   :  { %p18408_p8 = por %p18407_p7, %p18406_p6 }
  0x29   :  { %68 = dma.hbm_to_vmem [thread:$0]  %s21218_s29, 512, %s63_s4, [#allocation6], %s18797_s5, %s18797_s5, %s18798_s28  }
  0x2a   :  { %p18409_p9 = pnand %p18408_p8, %p18402_p5 }
  0x2c   :  { %18412 = shalt.err (!%p18409_p9)
}
  0x2d   :  { %s21219_s3 = sld [smem:[#allocation64_spill]]  ;;  %s18799_s7 = smov [#allocation11]  }
  0x2e   :  { %s106_s8 = sshll.u32 %s18799_s7, 4  ;;  %s18800_s9 = smov [#allocation14]   ;;  %s107_s8 = int_to_ptr.vmem [resolvable:$true] %s106_s8 }
  0x2f   :  { %s129_s27 = sshll.u32 %s18800_s9, 4  ;;  %s18421_s0 = scalar_lea.vmem %s107_s8, 256  ;;  %s130_s27 = int_to_ptr.vmem [resolvable:$true] %s129_s27 }
  0x30   :  { %p18422_p10 = scmp.ne.s32.totalorder %s107_s8, %s18421_s0  ;;  %p18426_p11 = scmp.lt.s32.totalorder %s107_s8, %s107_s8 }
  0x31   :  { %p18427_p12 = scmp.lt.s32.totalorder %s18421_s0, %s18421_s0 }
  0x33   :  { %88 = dma.hbm_to_vmem [thread:$0]  %s21219_s3, 16, %s86_s30, [#allocation9]  }
  0x34   :  { %p18428_p13 = por %p18427_p12, %p18426_p11 }
  0x36   :  { %p18429_p0 = pnand %p18428_p13, %p18422_p10 }
  0x38   :  { %18432 = shalt.err (!%p18429_p0)
}
  0x39   :  { %s21220_s29 = sld [smem:[#allocation66_spill]]  ;;  %s18441_s30 = scalar_lea.vmem %s130_s27, 16 }
  0x3a   :  { %p18442_p1 = scmp.ne.s32.totalorder %s130_s27, %s18441_s30  ;;  %s18445_s1 = scalar_lea.vmem %s130_s27, 32 }
  0x3b   :  { %p18446_p2 = scmp.lt.s32.totalorder %s130_s27, %s130_s27  ;;  %p18447_p3 = scmp.lt.s32.totalorder %s18445_s1, %s18441_s30 }
  0x3d   :  { %p18448_p4 = por %p18447_p3, %p18446_p2 }
  0x3f   :  { %112 = dma.hbm_to_vmem [thread:$0]  %s21220_s29, 256, %s107_s8, [#allocation12], %s18797_s5, %s18797_s5, %s18798_s28  }
  0x40   :  { %p18449_p5 = pnand %p18448_p4, %p18442_p1 }
  0x42   :  { %18452 = shalt.err (!%p18449_p5)
}
  0x43   :  { %s21221_s2 = sld [smem:[#allocation68_spill]]  ;;  %s18801_s3 = smov [#allocation17]  }
  0x44   :  { %s148_s7 = sshll.u32 %s18801_s3, 4  ;;  %s149_s7 = int_to_ptr.vmem [resolvable:$true] %s148_s7 }
  0x45   :  { %s18461_s9 = scalar_lea.vmem %s149_s7, 256  ;;  %p18466_p7 = scmp.lt.s32.totalorder %s149_s7, %s149_s7 }
  0x46   :  { %p18462_p6 = scmp.ne.s32.totalorder %s149_s7, %s18461_s9  ;;  %p18467_p8 = scmp.lt.s32.totalorder %s18461_s9, %s18461_s9 }
  0x48   :  { %p18468_p9 = por %p18467_p8, %p18466_p7 }
  0x49   :  { %132 = dma.hbm_to_vmem [thread:$0]  %s21221_s2, 16, %s130_s27, [#allocation15]  }
  0x4a   :  { %p18469_p10 = pnand %p18468_p9, %p18462_p6 }
  0x4c   :  { %18472 = shalt.err (!%p18469_p10)
}
  0x4d   :  { %s21222_s4 = sld [smem:[#allocation70_spill]]  ;;  %s18802_s10 = smov [#allocation20]  }
  0x4e   :  { %s174_s29 = sshll.u32 %s18802_s10, 4  ;;  %s18803_s27 = smov [#allocation23]   ;;  %s175_s29 = int_to_ptr.vmem [resolvable:$true] %s174_s29 }
  0x4f   :  { %s197_s30 = sshll.u32 %s18803_s27, 4  ;;  %s18481_s1 = scalar_lea.vmem %s175_s29, 32  ;;  %s198_s30 = int_to_ptr.vmem [resolvable:$true] %s197_s30 }
  0x50   :  { %p18482_p11 = scmp.ne.s32.totalorder %s175_s29, %s18481_s1  ;;  %p18486_p12 = scmp.lt.s32.totalorder %s175_s29, %s175_s29 }
  0x51   :  { %p18487_p13 = scmp.lt.s32.totalorder %s18481_s1, %s18481_s1 }
  0x53   :  { %154 = dma.hbm_to_vmem [thread:$0]  %s21222_s4, 256, %s149_s7, [#allocation18], %s18797_s5, %s18797_s5, %s18798_s28  }
  0x54   :  { %p18488_p0 = por %p18487_p13, %p18486_p12 }
  0x56   :  { %p18489_p1 = pnand %p18488_p0, %p18482_p11 }
  0x58   :  { %18492 = shalt.err (!%p18489_p1)
}
  0x59   :  { %s18804_s6 = smov 16   ;;  %s18805_s11 = smov 1  }
  0x5a   :  { %180 = dma.hbm_to_vmem [thread:$0]  %s21157_s13, 32, %s175_s29, [#allocation21], %s18804_s6, %s18804_s6, %s18805_s11  }
  0x5b   :  { %s18501_s7 = scalar_lea.vmem %s198_s30, 16  ;;  %s18505_s9 = scalar_lea.vmem %s198_s30, 32 }
  0x5c   :  { %p18502_p2 = scmp.ne.s32.totalorder %s198_s30, %s18501_s7  ;;  %p18506_p3 = scmp.lt.s32.totalorder %s198_s30, %s198_s30 }
  0x5d   :  { %p18507_p4 = scmp.lt.s32.totalorder %s18505_s9, %s18501_s7 }
  0x5f   :  { %p18508_p5 = por %p18507_p4, %p18506_p3 }
  0x61   :  { %p18509_p6 = pnand %p18508_p5, %p18502_p2 }
  0x63   :  { %18512 = shalt.err (!%p18509_p6)
}
  0x64   :  { %200 = dma.hbm_to_vmem [thread:$0]  %s21159_s15, 16, %s198_s30, [#allocation24]  }
  0x65   :  { %s18806_s4 = smov [#allocation26]   ;;  %s18807_s27 = smov [#allocation29]  }
  0x66   :  { %s230_s10 = sshll.u32 %s18806_s4, 4  ;;  %s254_s1 = sshll.u32 %s18807_s27, 4  ;;  %s231_s10 = int_to_ptr.vmem [resolvable:$true] %s230_s10  ;;  %s255_s1 = int_to_ptr.vmem [resolvable:$true] %s254_s1 }
  0x67   :  { %s18521_s2 = scalar_lea.vmem %s231_s10, 1024  ;;  %p18526_p8 = scmp.lt.s32.totalorder %s231_s10, %s231_s10 }
  0x68   :  { %p18522_p7 = scmp.ne.s32.totalorder %s231_s10, %s18521_s2  ;;  %p18527_p9 = scmp.lt.s32.totalorder %s18521_s2, %s18521_s2 }
  0x6a   :  { %p18528_p10 = por %p18527_p9, %p18526_p8 }
  0x6c   :  { %p18529_p11 = pnand %p18528_p10, %p18522_p7 }
  0x6e   :  { %18532 = shalt.err (!%p18529_p11)
}
  0x6f   :  { %236 = dma.hbm_to_vmem [thread:$0]  %s21167_s23, 1024, %s231_s10, [#allocation27], %s18797_s5, %s18797_s5, %s18798_s28  }
  0x70   :  { %s18541_s15 = scalar_lea.vmem %s255_s1, 1024  ;;  %p18546_p13 = scmp.lt.s32.totalorder %s255_s1, %s255_s1 }
  0x71   :  { %p18542_p12 = scmp.ne.s32.totalorder %s255_s1, %s18541_s15  ;;  %p18547_p0 = scmp.lt.s32.totalorder %s18541_s15, %s18541_s15 }
  0x73   :  { %p18548_p1 = por %p18547_p0, %p18546_p13 }
  0x75   :  { %p18549_p2 = pnand %p18548_p1, %p18542_p12 }
  0x77   :  { %18552 = shalt.err (!%p18549_p2)
}
  0x78   :  { %260 = dma.hbm_to_vmem [thread:$0]  %s21169_s25, 1024, %s255_s1, [#allocation30], %s18797_s5, %s18797_s5, %s18798_s28  }
  0x79   :  { %s18808_s7 = smov [#allocation2]   ;;  %s18809_s8 = smov [#allocation7]  }
  0x7a   :  { %s50_s9 = sshll.u32 %s18808_s7, 4  ;;  %s75_s23 = sshll.u32 %s18809_s8, 4  ;;  %s51_s9 = int_to_ptr.vmem [resolvable:$true] %s50_s9  ;;  %s76_s23 = int_to_ptr.vmem [resolvable:$true] %s75_s23 }
  0x7b   :  { %s18561_s0 = scalar_lea.vmem %s51_s9, 512  ;;  %p18566_p4 = scmp.lt.s32.totalorder %s51_s9, %s51_s9 }
  0x7c   :  { %p18562_p3 = scmp.ne.s32.totalorder %s51_s9, %s18561_s0  ;;  %p18567_p5 = scmp.lt.s32.totalorder %s18561_s0, %s18561_s0 }
  0x7e   :  { %p18568_p6 = por %p18567_p5, %p18566_p4 }
  0x80   :  { %p18569_p7 = pnand %p18568_p6, %p18562_p3 }
  0x82   :  { %18572 = shalt.err (!%p18569_p7)
}
  0x83   :  { %s21223_s27 = sld [smem:[#allocation61_spill]]  ;;  %s18581_s25 = scalar_lea.vmem %s76_s23, 16 }
  0x84   :  { %p18582_p8 = scmp.ne.s32.totalorder %s76_s23, %s18581_s25  ;;  %s18585_s1 = scalar_lea.vmem %s76_s23, 32 }
  0x85   :  { %p18586_p9 = scmp.lt.s32.totalorder %s76_s23, %s76_s23  ;;  %p18587_p10 = scmp.lt.s32.totalorder %s18585_s1, %s18581_s25 }
  0x87   :  { %p18588_p11 = por %p18587_p10, %p18586_p9 }
  0x89   :  { %56 = dma.hbm_to_vmem [thread:$0]  %s21223_s27, 512, %s51_s9, [#allocation3], %s18797_s5, %s18797_s5, %s18798_s28  }
  0x8a   :  { %p18589_p12 = pnand %p18588_p11, %p18582_p8 }
  0x8c   :  { %18592 = shalt.err (!%p18589_p12)
}
  0x8d   :  { %s21224_s29 = sld [smem:[#allocation63_spill]]  ;;  %s18810_s15 = smov [#allocation10]  }
  0x8e   :  { %s94_s30 = sshll.u32 %s18810_s15, 4  ;;  %s18811_s3 = smov [#allocation13]   ;;  %s95_s30 = int_to_ptr.vmem [resolvable:$true] %s94_s30 }
  0x8f   :  { %s119_s7 = sshll.u32 %s18811_s3, 4  ;;  %s18601_s8 = scalar_lea.vmem %s95_s30, 256  ;;  %s120_s7 = int_to_ptr.vmem [resolvable:$true] %s119_s7 }
  0x90   :  { %p18602_p13 = scmp.ne.s32.totalorder %s95_s30, %s18601_s8  ;;  %p18606_p0 = scmp.lt.s32.totalorder %s95_s30, %s95_s30 }
  0x91   :  { %p18607_p1 = scmp.lt.s32.totalorder %s18601_s8, %s18601_s8 }
  0x93   :  { %78 = dma.hbm_to_vmem [thread:$0]  %s21224_s29, 16, %s76_s23, [#allocation6]  }
  0x94   :  { %p18608_p2 = por %p18607_p1, %p18606_p0 }
  0x96   :  { %p18609_p3 = pnand %p18608_p2, %p18602_p13 }
  0x98   :  { %18612 = shalt.err (!%p18609_p3)
}
  0x99   :  { %s21225_s4 = sld [smem:[#allocation65_spill]]  ;;  %s18621_s23 = scalar_lea.vmem %s120_s7, 16 }
  0x9a   :  { %p18622_p4 = scmp.ne.s32.totalorder %s120_s7, %s18621_s23  ;;  %s18625_s10 = scalar_lea.vmem %s120_s7, 32 }
  0x9b   :  { %p18626_p5 = scmp.lt.s32.totalorder %s120_s7, %s120_s7  ;;  %p18627_p6 = scmp.lt.s32.totalorder %s18625_s10, %s18621_s23 }
  0x9d   :  { %p18628_p7 = por %p18627_p6, %p18626_p5 }
  0x9f   :  { %100 = dma.hbm_to_vmem [thread:$0]  %s21225_s4, 256, %s95_s30, [#allocation9], %s18797_s5, %s18797_s5, %s18798_s28  }
  0xa0   :  { %p18629_p8 = pnand %p18628_p7, %p18622_p4 }
  0xa2   :  { %18632 = shalt.err (!%p18629_p8)
}
  0xa3   :  { %s21226_s1 = sld [smem:[#allocation67_spill]]  ;;  %s18812_s2 = smov [#allocation16]  }
  0xa4   :  { %s139_s13 = sshll.u32 %s18812_s2, 4  ;;  %s18813_s29 = smov [#allocation19]   ;;  %s140_s13 = int_to_ptr.vmem [resolvable:$true] %s139_s13 }
  0xa5   :  { %s160_s15 = sshll.u32 %s18813_s29, 4  ;;  %s18641_s3 = scalar_lea.vmem %s140_s13, 64  ;;  %s161_s15 = int_to_ptr.vmem [resolvable:$true] %s160_s15 }
  0xa6   :  { %p18642_p9 = scmp.ne.s32.totalorder %s140_s13, %s18641_s3  ;;  %p18646_p10 = scmp.lt.s32.totalorder %s140_s13, %s140_s13 }
  0xa7   :  { %p18647_p11 = scmp.lt.s32.totalorder %s18641_s3, %s18641_s3 }
  0xa9   :  { %122 = dma.hbm_to_vmem [thread:$0]  %s21226_s1, 16, %s120_s7, [#allocation12]  }
  0xaa   :  { %p18648_p12 = por %p18647_p11, %p18646_p10 }
  0xac   :  { %p18649_p13 = pnand %p18648_p12, %p18642_p9 }
  0xae   :  { %18652 = shalt.err (!%p18649_p13)
}
  0xaf   :  { %s21227_s9 = sld [smem:[#allocation69_spill]]  ;;  %s18661_s0 = scalar_lea.vmem %s161_s15, 32 }
  0xb0   :  { %p18662_p0 = scmp.ne.s32.totalorder %s161_s15, %s18661_s0  ;;  %p18666_p1 = scmp.lt.s32.totalorder %s161_s15, %s161_s15 }
  0xb1   :  { %p18667_p2 = scmp.lt.s32.totalorder %s18661_s0, %s18661_s0 }
  0xb3   :  { %p18668_p3 = por %p18667_p2, %p18666_p1 }
  0xb5   :  { %142 = dma.hbm_to_vmem [thread:$0]  %s21227_s9, 64, %s140_s13, [#allocation15]  }
  0xb6   :  { %p18669_p4 = pnand %p18668_p3, %p18662_p0 }
  0xb8   :  { %18672 = shalt.err (!%p18669_p4)
}
  0xb9   :  { %s21228_s23 = sld [smem:[#allocation71_spill]]  ;;  %s18814_s10 = smov [#allocation22]  }
  0xba   :  { %s187_s27 = sshll.u32 %s18814_s10, 4  ;;  %s18815_s25 = smov [#allocation25]   ;;  %s188_s27 = int_to_ptr.vmem [resolvable:$true] %s187_s27 }
  0xbb   :  { %s206_s1 = sshll.u32 %s18815_s25, 4  ;;  %s18681_s2 = scalar_lea.vmem %s188_s27, 16  ;;  %s207_s1 = int_to_ptr.vmem [resolvable:$true] %s206_s1 }
  0xbc   :  { %p18682_p5 = scmp.ne.s32.totalorder %s188_s27, %s18681_s2  ;;  %s18685_s13 = scalar_lea.vmem %s188_s27, 32 }
  0xbd   :  { %p18686_p6 = scmp.lt.s32.totalorder %s188_s27, %s188_s27  ;;  %p18687_p7 = scmp.lt.s32.totalorder %s18685_s13, %s18681_s2 }
  0xbf   :  { %166 = dma.hbm_to_vmem [thread:$0]  %s21228_s23, 32, %s161_s15, [#allocation18], %s18804_s6, %s18804_s6, %s18805_s11  }
  0xc0   :  { %p18688_p8 = por %p18687_p7, %p18686_p6 }
  0xc2   :  { %p18689_p9 = pnand %p18688_p8, %p18682_p5 }
  0xc4   :  { %18692 = shalt.err (!%p18689_p9)
}
  0xc5   :  { %190 = dma.hbm_to_vmem [thread:$0]  %s21158_s14, 16, %s188_s27, [#allocation21]  }
  0xc6   :  { %s18701_s30 = scalar_lea.vmem %s207_s1, 32  ;;  %p18706_p11 = scmp.lt.s32.totalorder %s207_s1, %s207_s1 }
  0xc7   :  { %p18702_p10 = scmp.ne.s32.totalorder %s207_s1, %s18701_s30  ;;  %p18707_p12 = scmp.lt.s32.totalorder %s18701_s30, %s18701_s30 }
  0xc9   :  { %p18708_p13 = por %p18707_p12, %p18706_p11 }
  0xcb   :  { %p18709_p0 = pnand %p18708_p13, %p18702_p10 }
  0xcd   :  { %18712 = shalt.err (!%p18709_p0)
}
  0xce   :  { %212 = dma.hbm_to_vmem [thread:$0]  %s21160_s16, 32, %s207_s1, [#allocation24], %s18804_s6, %s18804_s6, %s18805_s11  }
  0xcf   :  { %s18816_s9 = smov [#allocation28]   ;;  %s18817_s7 = smov [#allocation31]  }
  0xd0   :  { %s242_s0 = sshll.u32 %s18816_s9, 4  ;;  %s266_s14 = sshll.u32 %s18817_s7, 4  ;;  %s243_s0 = int_to_ptr.vmem [resolvable:$true] %s242_s0  ;;  %s267_s14 = int_to_ptr.vmem [resolvable:$true] %s266_s14 }
  0xd1   :  { %s18721_s4 = scalar_lea.vmem %s243_s0, 1024  ;;  %p18726_p2 = scmp.lt.s32.totalorder %s243_s0, %s243_s0 }
  0xd2   :  { %p18722_p1 = scmp.ne.s32.totalorder %s243_s0, %s18721_s4  ;;  %p18727_p3 = scmp.lt.s32.totalorder %s18721_s4, %s18721_s4 }
  0xd4   :  { %p18728_p4 = por %p18727_p3, %p18726_p2 }
  0xd6   :  { %p18729_p5 = pnand %p18728_p4, %p18722_p1 }
  0xd8   :  { %18732 = shalt.err (!%p18729_p5)
}
  0xd9   :  { %248 = dma.hbm_to_vmem [thread:$0]  %s21168_s24, 1024, %s243_s0, [#allocation27], %s18797_s5, %s18797_s5, %s18798_s28  }
  0xda   :  { %s18741_s16 = scalar_lea.vmem %s267_s14, 1024  ;;  %p18746_p7 = scmp.lt.s32.totalorder %s267_s14, %s267_s14 }
  0xdb   :  { %p18742_p6 = scmp.ne.s32.totalorder %s267_s14, %s18741_s16  ;;  %p18747_p8 = scmp.lt.s32.totalorder %s18741_s16, %s18741_s16 }
  0xdd   :  { %p18748_p9 = por %p18747_p8, %p18746_p7 }
  0xdf   :  { %p18749_p10 = pnand %p18748_p9, %p18742_p6 }
  0xe1   :  { %18752 = shalt.err (!%p18749_p10)
}
  0xe2   :  { %272 = dma.hbm_to_vmem [thread:$0]  %s21170_s26, 1024, %s267_s14, [#allocation30], %s18797_s5, %s18797_s5, %s18798_s28  }
  0xe3   :  { %18773 = dma.done.wait [#allocation3], 512  }
  0xe4   :  { %18774 = vsyncadd [#allocation3], 4294966784 }
  0xe5   :  { %18775 = dma.done.wait [#allocation6], 528  }
  0xe6   :  { %18776 = vsyncadd [#allocation6], 4294966768 }
  0xe7   :  { %18777 = dma.done.wait [#allocation9], 272  }
  0xe8   :  { %18778 = vsyncadd [#allocation9], 4294967024 }
  0xe9   :  { %18779 = dma.done.wait [#allocation12], 272  }
  0xea   :  { %18780 = vsyncadd [#allocation12], 4294967024 }
  0xeb   :  { %18781 = dma.done.wait [#allocation15], 80  }
  0xec   :  { %18782 = vsyncadd [#allocation15], 4294967216 }
  0xed   :  { %18783 = dma.done.wait [#allocation18], 288  }
  0xee   :  { %18784 = vsyncadd [#allocation18], 4294967008 }
  0xef   :  { %18785 = dma.done.wait [#allocation21], 48  }
  0xf0   :  { %18786 = vsyncadd [#allocation21], 4294967248 }
  0xf1   :  { %18787 = dma.done.wait [#allocation24], 48  }
  0xf2   :  { %18788 = vsyncadd [#allocation24], 4294967248 }
  0xf3   :  { %18789 = dma.done.wait [#allocation27], 2048  }
  0xf4   :  { %18790 = vsyncadd [#allocation27], 4294965248 }
  0xf5   :  { %18791 = dma.done.wait [#allocation30], 2048  }
  0xf6   :  { %18792 = vsyncadd [#allocation30], 4294965248  ;;  %vm425_vm0 = vcmask 1043456   ;;  %vm418_vm1 = vcmask 31744   ;;  %v338_v0 = vld [vmem:[#allocation16] sm:$0xf] }
  0xf7   :  { %s21229_s27 = sld [smem:[#allocation60_spill]]  ;;  %v427_v3 = vsel %vm425_vm0, %v338_v0, 0  ;;  %v340_v21 = vld [vmem:[#allocation17 + $0x8] sm:$0xff]  ;;  %v339_v23 = vld [vmem:[#allocation17] sm:$0xff]  ;;  %v15940_v33 = vld [vmem:[#allocation13] ss:$0 sm:$0xff] }
  0xf8   :  { %v460_v6 = vand.u32 4294901760, %v427_v3  ;;  %v19058_v22 = vand.u32 4294901760, %v340_v21  ;;  %v19063_v25 = vand.u32 4294901760, %v339_v23  ;;  %vm926_vm2 = vcmask 130048  }
  0xf9   :  { %vm1437_vm3 = vcmask 261120   ;;  %vm15911_vm4 = vcmask 97280  }
  0xfa   :  { %16781 = vmatprep.subr.mxu0 %v460_v6  ;;  %v547_v10 = vsub.f32 %v427_v3, %v460_v6  ;;  %v19061_v24 = vsub.f32 %v340_v21, %v19058_v22  ;;  %v19071_v27 = vsub.f32 %v339_v23, %v19063_v25 }
  0xfb   :  { %16782 = vmatpush3.msra.mxu0 %v460_v6 }
  0xfc   :  { %v548_v13 = vand.u32 4294901760, %v547_v10  ;;  %16791 = vmatprep.subr.mxu0 %v547_v10  ;;  %v19068_v26 = vand.u32 4294901760, %v19061_v24  ;;  %v19078_v29 = vand.u32 4294901760, %v19071_v27 }
  0xfd   :  { %v402_v1 = vld [vmem:[%s21229_s27] sm:$0xff]  ;;  %v403_v2 = vld [vmem:[%s21229_s27 + $0x8] sm:$0xff] }
  0xfe   :  { %v420_v4 = vsel %vm418_vm1, %v402_v1, 0  ;;  %v423_v5 = vsel %vm418_vm1, %v403_v2, 0  ;;  %v549_v16 = vsub.f32 %v547_v10, %v548_v13  ;;  %v1052_v28 = vsub.f32 %v19061_v24, %v19068_v26 }
  0xff   :  { %v495_v7 = vand.u32 4294901760, %v420_v4  ;;  %v505_v8 = vand.u32 4294901760, %v423_v5  ;;  %v1059_v31 = vsub.f32 %v19071_v27, %v19078_v29 }
 0x100   :  { %v550_v19 = vand.u32 4294901760, %v549_v16  ;;  %v1053_v30 = vand.u32 4294901760, %v1052_v28 }
 0x101   :  { %v496_v9 = vsub.f32 %v420_v4, %v495_v7  ;;  %v506_v11 = vsub.f32 %v423_v5, %v505_v8  ;;  %16788 = vmatprep.mubr.f32.mxu1 %v495_v7  ;;  %v1060_v32 = vand.u32 4294901760, %v1059_v31 }
 0x102   :  { %16786 = vmatprep.subr.mxu1 %v550_v19 }
 0x103   :  { %v497_v12 = vand.u32 4294901760, %v496_v9  ;;  %v507_v14 = vand.u32 4294901760, %v506_v11  ;;  %16787 = vmatpush3.msra.mxu1 %v550_v19 }
 0x104   :  { %16789 = vmatmul.mubr.f32.vlgmr.msra.gmra.mxu1 %v505_v8  ;;  %16796 = vmatprep.subr.mxu1 %v460_v6 }
 0x105   :  { %v498_v15 = vsub.f32 %v496_v9, %v497_v12  ;;  %v508_v17 = vsub.f32 %v506_v11, %v507_v14  ;;  %16797 = vmatpush3.msra.mxu1 %v460_v6  ;;  %16798 = vmatprep.mubr.f32.mxu1 %v497_v12 }
 0x106   :  { %16806 = vmatprep.subr.mxu1 %v460_v6 }
 0x107   :  { %v499_v18 = vand.u32 4294901760, %v498_v15  ;;  %v509_v20 = vand.u32 4294901760, %v508_v17  ;;  %v378_v17 = vld [vmem:[#allocation28] sm:$0xff] }
 0x108   :  { %16799 = vmatmul.mubr.f32.vlgmr.msra.gmra.mxu1 %v507_v14  ;;  %v19127_v21 = vand.u32 4294901760, %v378_v17 }
 0x109   :  { %16783 = vmatprep.mubr.f32.mxu0 %v499_v18  ;;  %16807 = vmatpush3.msra.mxu1 %v460_v6 }
 0x10a   :  { %16784 = vmatmul.mubr.f32.vlgmr.msra.gmra.mxu0 %v509_v20  ;;  %16808 = vmatprep.mubr.f32.mxu1 %v495_v7 }
 0x10b   :  { %16792 = vmatpush3.msra.mxu0 %v547_v10  ;;  %16793 = vmatprep.mubr.f32.mxu0 %v496_v9  ;;  %v380_v10 = vld [vmem:[#allocation28 + $0x10] sm:$0xff] }
 0x10c   :  { %16801 = vmatprep.subr.mxu0 %v548_v13  ;;  %16809 = vmatmul.mubr.f32.vlgmr.msra.gmra.mxu1 %v505_v8  ;;  %v19105_v12 = vand.u32 4294901760, %v380_v10 }
 0x10d   :  { %16818 = vmatprep.subr.mxu1 %v1053_v30 }
 0x10e   :  { %16794 = vmatmul.mubr.f32.vlgmr.msra.gmra.mxu0 %v506_v11  ;;  %16819 = vmatpush3.msra.mxu1 %v1053_v30  ;;  %v19113_v15 = vsub.f32 %v380_v10, %v19105_v12 }
 0x10f   :  { %16802 = vmatpush3.msra.mxu0 %v548_v13  ;;  %16803 = vmatprep.mubr.f32.mxu0 %v495_v7  ;;  %v379_v13 = vld [vmem:[#allocation28 + $0x8] sm:$0xff] }
 0x110   :  { %16811 = vmatprep.subr.mxu0 %v19058_v22  ;;  %16820 = vmatprep.subr.mxu1 %v1060_v32  ;;  %v19115_v16 = vand.u32 4294901760, %v379_v13  ;;  %v19122_v19 = vand.u32 4294901760, %v19113_v15 }
 0x111   :  { %16821 = vmatpush3.msra.mxu1 %v1060_v32 }
 0x112   :  { %16804 = vmatmul.mubr.f32.vlgmr.msra.gmra.mxu0 %v505_v8  ;;  %16832 = vmatprep.subr.mxu1 %v19058_v22  ;;  %v381_v8 = vld [vmem:[#allocation28 + $0x18] sm:$0xff]  ;;  %v19125_v20 = vsub.f32 %v379_v13, %v19115_v16  ;;  %v1568_v23 = vsub.f32 %v19113_v15, %v19122_v19 }
 0x113   :  { %16812 = vmatpush3.msra.mxu0 %v19058_v22  ;;  %v19100_v9 = vand.u32 4294901760, %v381_v8 }
 0x114   :  { %16813 = vmatprep.subr.mxu0 %v19063_v25 }
 0x115   :  { %16814 = vmatpush3.msra.mxu0 %v19063_v25  ;;  %v19103_v11 = vsub.f32 %v381_v8, %v19100_v9  ;;  %v371_v8 = vld [vmem:[#allocation26 + $0x8] sm:$0xff] }
 0x116   :  { %16825 = vmatprep.subr.mxu0 %v19061_v24 }
 0x117   :  { %v19110_v14 = vand.u32 4294901760, %v19103_v11 }
 0x119   :  { %v1561_v18 = vsub.f32 %v19103_v11, %v19110_v14 }
 0x1c4   :  { %v16790_v36 = vpop.f32.mrf.mxu1 }
 0x1c6   :  { %v587_v40 = vpop.f32.mrf.mxu1 }
 0x1c8   :  { %v16800_v44 = vpop.f32.mrf.mxu1 }
 0x1ca   :  { %v16785_v34 = vpop.f32.mrf.mxu0  ;;  %v748_v48 = vpop.f32.mrf.mxu1 }
 0x1cb   :  { %v512_v35 = vadd.f32 %v16785_v34, %v15940_v33  ;;  %v15941_v34 = vld [vmem:[#allocation14] ss:$0 sm:$0xff] }
 0x1cc   :  { %v501_v37 = vpop.f32.mrf.mxu0  ;;  %v16810_v52 = vpop.f32.mrf.mxu1 }
 0x1cd   :  { %v594_v38 = vadd.f32 %v16790_v36, %v512_v35  ;;  %v502_v39 = vadd.f32 %v15940_v33, %v501_v37 }
 0x1ce   :  { %v16795_v41 = vpop.f32.mrf.mxu0  ;;  %v908_v56 = vpop.f32.mrf.mxu1 }
 0x1cf   :  { %v588_v42 = vadd.f32 %v587_v40, %v502_v39  ;;  %v675_v43 = vadd.f32 %v16795_v41, %v594_v38 }
 0x1d0   :  { %v667_v45 = vpop.f32.mrf.mxu0 }
 0x1d1   :  { %v757_v46 = vadd.f32 %v16800_v44, %v675_v43  ;;  %v668_v47 = vadd.f32 %v667_v45, %v588_v42 }
 0x1d2   :  { %v16805_v49 = vpop.f32.mrf.mxu0 }
 0x1d3   :  { %v749_v50 = vadd.f32 %v748_v48, %v668_v47  ;;  %v837_v51 = vadd.f32 %v16805_v49, %v757_v46 }
 0x1d4   :  { %v830_v53 = vpop.f32.mrf.mxu0 }
 0x1d5   :  { %v915_v54 = vadd.f32 %v16810_v52, %v837_v51  ;;  %v831_v55 = vadd.f32 %v830_v53, %v749_v50  ;;  %v369_v52 = vld [vmem:[%s21166_s22 + $0x8] sm:$0xff] }
 0x1d7   :  { %v919_v57 = vmax.f32 %v915_v54, 0.0  ;;  %v909_v58 = vadd.f32 %v908_v56, %v831_v55 }
 0x1d9   :  { %v931_v59 = vsel %vm926_vm2, %v919_v57, 0  ;;  %v918_v60 = vmax.f32 %v909_v58, 0.0  ;;  %v368_v57 = vld [vmem:[%s21166_s22] sm:$0xff] }
 0x1da   :  { %v1010_v61 = vand.u32 4294901760, %v931_v59 }
 0x1db   :  { %v928_v62 = vsel %vm926_vm2, %v918_v60, 0 }
 0x1dc   :  { %v1011_v63 = vsub.f32 %v931_v59, %v1010_v61  ;;  %v1000_v0 = vand.u32 4294901760, %v928_v62 }
 0x1de   :  { %v1001_v1 = vsub.f32 %v928_v62, %v1000_v0  ;;  %16822 = vmatprep.mubr.f32.mxu1 %v1000_v0  ;;  %v1012_v2 = vand.u32 4294901760, %v1011_v63 }
 0x1df   :  { %16823 = vmatmul.mubr.f32.vlgmr.msra.gmra.mxu1 %v1010_v61 }
 0x1e0   :  { %16833 = vmatpush3.msra.mxu1 %v19058_v22  ;;  %v1002_v3 = vand.u32 4294901760, %v1001_v1  ;;  %v1013_v4 = vsub.f32 %v1011_v63, %v1012_v2 }
 0x1e1   :  { %16834 = vmatprep.subr.mxu1 %v19063_v25 }
 0x1e2   :  { %16835 = vmatpush3.msra.mxu1 %v19063_v25  ;;  %16836 = vmatprep.mubr.f32.mxu1 %v1002_v3  ;;  %v1003_v5 = vsub.f32 %v1001_v1, %v1002_v3  ;;  %v1014_v7 = vand.u32 4294901760, %v1013_v4 }
 0x1e3   :  { %16837 = vmatmul.mubr.f32.vlgmr.msra.gmra.mxu1 %v1012_v2  ;;  %16846 = vmatprep.subr.mxu1 %v19058_v22 }
 0x1e4   :  { %16847 = vmatpush3.msra.mxu1 %v19058_v22  ;;  %16850 = vmatprep.mubr.f32.mxu1 %v1000_v0  ;;  %v1004_v6 = vand.u32 4294901760, %v1003_v5  ;;  %v1562_v22 = vand.u32 4294901760, %v1561_v18 }
 0x1e5   :  { %16848 = vmatprep.subr.mxu1 %v19063_v25 }
 0x1e6   :  { %16815 = vmatprep.mubr.f32.mxu0 %v1004_v6  ;;  %16849 = vmatpush3.msra.mxu1 %v19063_v25  ;;  %v19137_v25 = vsub.f32 %v378_v17, %v19127_v21  ;;  %v372_v6 = vld [vmem:[#allocation26 + $0x10] sm:$0xff] }
 0x1e7   :  { %16816 = vmatmul.mubr.f32.vlgmr.msra.gmra.mxu0 %v1014_v7  ;;  %16851 = vmatmul.mubr.f32.vlgmr.msra.gmra.mxu1 %v1010_v61  ;;  %v19186_v10 = vand.u32 4294901760, %v372_v6 }
 0x1e8   :  { %16826 = vmatpush3.msra.mxu0 %v19061_v24  ;;  %16829 = vmatprep.mubr.f32.mxu0 %v1001_v1  ;;  %v19134_v24 = vand.u32 4294901760, %v19125_v20  ;;  %v19144_v28 = vand.u32 4294901760, %v19137_v25 }
 0x1e9   :  { %16827 = vmatprep.subr.mxu0 %v19071_v27  ;;  %16864 = vmatprep.subr.mxu1 %v1562_v22 }
 0x1ea   :  { %16828 = vmatpush3.msra.mxu0 %v19071_v27  ;;  %v1575_v27 = vsub.f32 %v19125_v20, %v19134_v24  ;;  %16865 = vmatpush3.msra.mxu1 %v1562_v22  ;;  %v1582_v30 = vsub.f32 %v19137_v25, %v19144_v28  ;;  %v370_v22 = vld [vmem:[#allocation26] sm:$0xff] }
 0x1eb   :  { %16839 = vmatprep.subr.mxu0 %v19068_v26  ;;  %16830 = vmatmul.mubr.f32.vlgmr.msra.gmra.mxu0 %v1011_v63 }
 0x1ec   :  { %16840 = vmatpush3.msra.mxu0 %v19068_v26  ;;  %16843 = vmatprep.mubr.f32.mxu0 %v1000_v0  ;;  %v1569_v26 = vand.u32 4294901760, %v1568_v23  ;;  %v1583_v31 = vand.u32 4294901760, %v1582_v30  ;;  %v373_v0 = vld [vmem:[#allocation26 + $0x18] sm:$0xff]  ;;  %v19198_v23 = vand.u32 4294901760, %v371_v8 }
 0x1ed   :  { %16841 = vmatprep.subr.mxu0 %v19078_v29  ;;  %v19178_v5 = vand.u32 4294901760, %v373_v0 }
 0x1ee   :  { %16842 = vmatpush3.msra.mxu0 %v19078_v29  ;;  %16866 = vmatprep.subr.mxu1 %v1569_v26  ;;  %v1576_v29 = vand.u32 4294901760, %v1575_v27  ;;  %v19205_v27 = vsub.f32 %v372_v6, %v19186_v10 }
 0x1ef   :  { %16844 = vmatmul.mubr.f32.vlgmr.msra.gmra.mxu0 %v1010_v61  ;;  %16853 = vmatprep.subr.mxu0 %v19100_v9  ;;  %v19195_v18 = vsub.f32 %v373_v0, %v19178_v5 }
 0x1f0   :  { %16854 = vmatpush3.msra.mxu0 %v19100_v9  ;;  %16867 = vmatpush3.msra.mxu1 %v1569_v26 }
 0x1f1   :  { %16855 = vmatprep.subr.mxu0 %v19105_v12  ;;  %16868 = vmatprep.subr.mxu1 %v1576_v29 }
 0x1f2   :  { %16856 = vmatpush3.msra.mxu0 %v19105_v12  ;;  %16869 = vmatpush3.msra.mxu1 %v1576_v29  ;;  %v19207_v29 = vand.u32 4294901760, %v370_v22 }
 0x1f3   :  { %16857 = vmatprep.subr.mxu0 %v19115_v16  ;;  %16870 = vmatprep.subr.mxu1 %v1583_v31 }
 0x1f4   :  { %16858 = vmatpush3.msra.mxu0 %v19115_v16  ;;  %16871 = vmatpush3.msra.mxu1 %v1583_v31  ;;  %v19214_v31 = vand.u32 4294901760, %v19195_v18 }
 0x1f5   :  { %16859 = vmatprep.subr.mxu0 %v19127_v21  ;;  %16886 = vmatprep.subr.mxu1 %v19100_v9 }
 0x1f6   :  { %16860 = vmatpush3.msra.mxu0 %v19127_v21 }
 0x1f7   :  { %16875 = vmatprep.subr.mxu0 %v19103_v11 }
 0x29f   :  { %v16824_v32 = vpop.f32.mrf.mxu1 }
 0x2a1   :  { %v1097_v33 = vpop.f32.mrf.mxu1 }
 0x2a3   :  { %v16838_v35 = vpop.f32.mrf.mxu1 }
 0x2a5   :  { %v1261_v41 = vpop.f32.mrf.mxu1 }
 0x2a7   :  { %v16817_v36 = vpop.f32.mrf.mxu0  ;;  %v16852_v48 = vpop.f32.mrf.mxu1 }
 0x2a8   :  { %v1017_v37 = vadd.f32 %v16817_v36, %v15941_v34 }
 0x2a9   :  { %v1006_v38 = vpop.f32.mrf.mxu0  ;;  %v1425_v56 = vpop.f32.mrf.mxu1 }
 0x2aa   :  { %v1007_v39 = vadd.f32 %v15941_v34, %v1006_v38  ;;  %v1104_v40 = vadd.f32 %v16824_v32, %v1017_v37  ;;  %v19219_v32 = vsub.f32 %v371_v8, %v19198_v23  ;;  %v19229_v34 = vsub.f32 %v370_v22, %v19207_v29 }
 0x2ab   :  { %v16831_v42 = vpop.f32.mrf.mxu0 }
 0x2ac   :  { %v1187_v43 = vadd.f32 %v16831_v42, %v1104_v40  ;;  %v1098_v44 = vadd.f32 %v1097_v33, %v1007_v39  ;;  %v19226_v33 = vand.u32 4294901760, %v19205_v27  ;;  %v19247_v36 = vand.u32 4294901760, %v19229_v34  ;;  %v394_v39 = vld [vmem:[#allocation31] sm:$0xff] }
 0x2ad   :  { %v1179_v45 = vpop.f32.mrf.mxu0  ;;  %v19301_v42 = vand.u32 4294901760, %v394_v39 }
 0x2ae   :  { %v1180_v46 = vadd.f32 %v1179_v45, %v1098_v44  ;;  %v1270_v47 = vadd.f32 %v16838_v35, %v1187_v43  ;;  %v2089_v35 = vsub.f32 %v19195_v18, %v19214_v31 }
 0x2af   :  { %v16845_v49 = vpop.f32.mrf.mxu0 }
 0x2b0   :  { %v1353_v50 = vadd.f32 %v16845_v49, %v1270_v47  ;;  %v1262_v51 = vadd.f32 %v1261_v41, %v1180_v46  ;;  %v19321_v46 = vsub.f32 %v394_v39, %v19301_v42 }
 0x2b1   :  { %v1346_v53 = vpop.f32.mrf.mxu0 }
 0x2b2   :  { %v1432_v54 = vadd.f32 %v16852_v48, %v1353_v50  ;;  %v1347_v55 = vadd.f32 %v1346_v53, %v1262_v51  ;;  %v19339_v50 = vand.u32 4294901760, %v19321_v46 }
 0x2b4   :  { %v19156_v58 = vadd.f32 %v1432_v54, %v369_v52  ;;  %v1426_v59 = vadd.f32 %v1425_v56, %v1347_v55  ;;  %v2638_v54 = vsub.f32 %v19321_v46, %v19339_v50 }
 0x2b6   :  { %v1442_v60 = vsel %vm1437_vm3, %v19156_v58, 0  ;;  %v19160_v61 = vadd.f32 %v1426_v59, %v368_v57  ;;  %v2639_v56 = vand.u32 4294901760, %v2638_v54 }
 0x2b7   :  { %v19162_v62 = vand.u32 4294901760, %v1442_v60 }
 0x2b8   :  { %v1439_v63 = vsel %vm1437_vm3, %v19160_v61, 0 }
 0x2b9   :  { %v19167_v1 = vsub.f32 %v1442_v60, %v19162_v62  ;;  %v19169_v2 = vand.u32 4294901760, %v1439_v63 }
 0x2bb   :  { %v19172_v3 = vsub.f32 %v1439_v63, %v19169_v2  ;;  %16872 = vmatprep.mubr.f32.mxu1 %v19169_v2  ;;  %v19176_v4 = vand.u32 4294901760, %v19167_v1 }
 0x2bc   :  { %16873 = vmatmul.mubr.f32.vlgmr.msra.gmra.mxu1 %v19162_v62 }
 0x2bd   :  { %16887 = vmatpush3.msra.mxu1 %v19100_v9  ;;  %v19183_v7 = vand.u32 4294901760, %v19172_v3  ;;  %v1526_v17 = vsub.f32 %v19167_v1, %v19176_v4 }
 0x2be   :  { %16888 = vmatprep.subr.mxu1 %v19105_v12 }
 0x2bf   :  { %16889 = vmatpush3.msra.mxu1 %v19105_v12  ;;  %16894 = vmatprep.mubr.f32.mxu1 %v19183_v7  ;;  %v1516_v13 = vsub.f32 %v19172_v3, %v19183_v7  ;;  %v19211_v30 = vand.u32 4294901760, %v1526_v17 }
 0x2c0   :  { %16890 = vmatprep.subr.mxu1 %v19115_v16 }
 0x2c1   :  { %16891 = vmatpush3.msra.mxu1 %v19115_v16  ;;  %v19201_v26 = vand.u32 4294901760, %v1516_v13 }
 0x2c2   :  { %16892 = vmatprep.subr.mxu1 %v19127_v21 }
 0x2c3   :  { %16893 = vmatpush3.msra.mxu1 %v19127_v21  ;;  %16861 = vmatprep.mubr.f32.mxu0 %v19201_v26 }
 0x2c4   :  { %16895 = vmatmul.mubr.f32.vlgmr.msra.gmra.mxu1 %v19176_v4  ;;  %16908 = vmatprep.subr.mxu1 %v19100_v9 }
 0x2c5   :  { %16862 = vmatmul.mubr.f32.vlgmr.msra.gmra.mxu0 %v19211_v30  ;;  %16909 = vmatpush3.msra.mxu1 %v19100_v9  ;;  %v19238_v9 = vand.u32 4294901760, %v19219_v32 }
 0x2c6   :  { %16876 = vmatpush3.msra.mxu0 %v19103_v11  ;;  %16916 = vmatprep.mubr.f32.mxu1 %v19169_v2  ;;  %v2096_v11 = vsub.f32 %v19205_v27, %v19226_v33 }
 0x2c7   :  { %16877 = vmatprep.subr.mxu0 %v19113_v15  ;;  %16883 = vmatprep.mubr.f32.mxu0 %v19172_v3 }
 0x2c8   :  { %16910 = vmatprep.subr.mxu1 %v19105_v12  ;;  %16878 = vmatpush3.msra.mxu0 %v19113_v15  ;;  %v2090_v15 = vand.u32 4294901760, %v2089_v35 }
 0x2c9   :  { %16911 = vmatpush3.msra.mxu1 %v19105_v12  ;;  %16879 = vmatprep.subr.mxu0 %v19125_v20  ;;  %v2103_v12 = vsub.f32 %v19219_v32, %v19238_v9 }
 0x2ca   :  { %16912 = vmatprep.subr.mxu1 %v19115_v16  ;;  %16880 = vmatpush3.msra.mxu0 %v19125_v20  ;;  %v2097_v20 = vand.u32 4294901760, %v2096_v11 }
 0x2cb   :  { %16913 = vmatpush3.msra.mxu1 %v19115_v16  ;;  %16881 = vmatprep.subr.mxu0 %v19137_v25  ;;  %v2110_v16 = vsub.f32 %v19229_v34, %v19247_v36 }
 0x2cc   :  { %16914 = vmatprep.subr.mxu1 %v19127_v21  ;;  %16882 = vmatpush3.msra.mxu0 %v19137_v25  ;;  %v2104_v25 = vand.u32 4294901760, %v2103_v12 }
 0x2cd   :  { %16915 = vmatpush3.msra.mxu1 %v19127_v21  ;;  %16884 = vmatmul.mubr.f32.vlgmr.msra.gmra.mxu0 %v19167_v1  ;;  %v2111_v21 = vand.u32 4294901760, %v2110_v16 }
 0x2ce   :  { %16897 = vmatprep.subr.mxu0 %v19110_v14  ;;  %16917 = vmatmul.mubr.f32.vlgmr.msra.gmra.mxu1 %v19162_v62 }
 0x2cf   :  { %16930 = vmatprep.subr.mxu1 %v2090_v15  ;;  %16898 = vmatpush3.msra.mxu0 %v19110_v14  ;;  %v397_v14 = vld [vmem:[#allocation31 + $0x18] sm:$0xff] }
 0x2d0   :  { %16905 = vmatprep.mubr.f32.mxu0 %v19169_v2  ;;  %16931 = vmatpush3.msra.mxu1 %v2090_v15 }
 0x2d1   :  { %16938 = vmatprep.mubr.f32.mxu1 %v19169_v2  ;;  %16899 = vmatprep.subr.mxu0 %v19122_v19 }
 0x2d2   :  { %16932 = vmatprep.subr.mxu1 %v2097_v20  ;;  %16900 = vmatpush3.msra.mxu0 %v19122_v19  ;;  %v19275_v19 = vand.u32 4294901760, %v397_v14 }
 0x2d3   :  { %16933 = vmatpush3.msra.mxu1 %v2097_v20  ;;  %16901 = vmatprep.subr.mxu0 %v19134_v24 }
 0x2d4   :  { %16934 = vmatprep.subr.mxu1 %v2104_v25  ;;  %16902 = vmatpush3.msra.mxu0 %v19134_v24  ;;  %v396_v24 = vld [vmem:[#allocation31 + $0x10] sm:$0xff]  ;;  %v19288_v38 = vsub.f32 %v397_v14, %v19275_v19 }
 0x2d5   :  { %16935 = vmatpush3.msra.mxu1 %v2104_v25  ;;  %16903 = vmatprep.subr.mxu0 %v19144_v28  ;;  %v19283_v37 = vand.u32 4294901760, %v396_v24 }
 0x2d6   :  { %16936 = vmatprep.subr.mxu1 %v2111_v21  ;;  %16904 = vmatpush3.msra.mxu0 %v19144_v28  ;;  %v395_v28 = vld [vmem:[#allocation31 + $0x8] sm:$0xff]  ;;  %v19306_v43 = vand.u32 4294901760, %v19288_v38 }
 0x2d7   :  { %16937 = vmatpush3.msra.mxu1 %v2111_v21  ;;  %16906 = vmatmul.mubr.f32.vlgmr.msra.gmra.mxu0 %v19162_v62  ;;  %v19292_v40 = vand.u32 4294901760, %v395_v28  ;;  %v19299_v41 = vsub.f32 %v396_v24, %v19283_v37 }
 0x2d8   :  { %16919 = vmatprep.subr.mxu0 %v19178_v5  ;;  %16939 = vmatmul.mubr.f32.vlgmr.msra.gmra.mxu1 %v19162_v62  ;;  %v2617_v47 = vsub.f32 %v19288_v38, %v19306_v43 }
 0x2d9   :  { %16952 = vmatprep.subr.mxu1 %v19178_v5  ;;  %16920 = vmatpush3.msra.mxu0 %v19178_v5  ;;  %v19311_v44 = vsub.f32 %v395_v28, %v19292_v40  ;;  %v19318_v45 = vand.u32 4294901760, %v19299_v41 }
 0x2da   :  { %16927 = vmatprep.mubr.f32.mxu0 %v19201_v26  ;;  %16953 = vmatpush3.msra.mxu1 %v19178_v5  ;;  %v2618_v51 = vand.u32 4294901760, %v2617_v47 }
 0x2db   :  { %16960 = vmatprep.mubr.f32.mxu1 %v19183_v7  ;;  %16921 = vmatprep.subr.mxu0 %v19186_v10  ;;  %v19330_v48 = vand.u32 4294901760, %v19311_v44  ;;  %v2624_v49 = vsub.f32 %v19299_v41, %v19318_v45 }
 0x2dc   :  { %16954 = vmatprep.subr.mxu1 %v19186_v10  ;;  %16922 = vmatpush3.msra.mxu0 %v19186_v10 }
 0x2dd   :  { %16955 = vmatpush3.msra.mxu1 %v19186_v10  ;;  %16923 = vmatprep.subr.mxu0 %v19198_v23  ;;  %v2631_v52 = vsub.f32 %v19311_v44, %v19330_v48  ;;  %v2625_v53 = vand.u32 4294901760, %v2624_v49 }
 0x2de   :  { %16956 = vmatprep.subr.mxu1 %v19198_v23  ;;  %16924 = vmatpush3.msra.mxu0 %v19198_v23 }
 0x2df   :  { %16957 = vmatpush3.msra.mxu1 %v19198_v23  ;;  %16925 = vmatprep.subr.mxu0 %v19207_v29  ;;  %v2632_v55 = vand.u32 4294901760, %v2631_v52 }
 0x2e0   :  { %16958 = vmatprep.subr.mxu1 %v19207_v29  ;;  %16926 = vmatpush3.msra.mxu0 %v19207_v29 }
 0x2e1   :  { %16959 = vmatpush3.msra.mxu1 %v19207_v29  ;;  %16928 = vmatmul.mubr.f32.vlgmr.msra.gmra.mxu0 %v19211_v30 }
 0x2e2   :  { %16941 = vmatprep.subr.mxu0 %v19195_v18  ;;  %16961 = vmatmul.mubr.f32.vlgmr.msra.gmra.mxu1 %v19176_v4 }
 0x2e3   :  { %16974 = vmatprep.subr.mxu1 %v19178_v5  ;;  %16942 = vmatpush3.msra.mxu0 %v19195_v18 }
 0x2e4   :  { %16949 = vmatprep.mubr.f32.mxu0 %v19172_v3  ;;  %16975 = vmatpush3.msra.mxu1 %v19178_v5 }
 0x2e5   :  { %16982 = vmatprep.mubr.f32.mxu1 %v19169_v2  ;;  %16943 = vmatprep.subr.mxu0 %v19205_v27 }
 0x2e6   :  { %16976 = vmatprep.subr.mxu1 %v19186_v10  ;;  %16944 = vmatpush3.msra.mxu0 %v19205_v27 }
 0x2e7   :  { %16977 = vmatpush3.msra.mxu1 %v19186_v10  ;;  %16945 = vmatprep.subr.mxu0 %v19219_v32 }
 0x2e8   :  { %16978 = vmatprep.subr.mxu1 %v19198_v23  ;;  %16946 = vmatpush3.msra.mxu0 %v19219_v32 }
 0x2e9   :  { %16979 = vmatpush3.msra.mxu1 %v19198_v23  ;;  %16947 = vmatprep.subr.mxu0 %v19229_v34  ;;  %v19414_v23 = vld [vmem:[#allocation20] ss:$0 sm:$0xff] }
 0x2ea   :  { %16980 = vmatprep.subr.mxu1 %v19207_v29  ;;  %16948 = vmatpush3.msra.mxu0 %v19229_v34 }
 0x2eb   :  { %16981 = vmatpush3.msra.mxu1 %v19207_v29  ;;  %16950 = vmatmul.mubr.f32.vlgmr.msra.gmra.mxu0 %v19167_v1 }
 0x2ec   :  { %16963 = vmatprep.subr.mxu0 %v19214_v31  ;;  %16983 = vmatmul.mubr.f32.vlgmr.msra.gmra.mxu1 %v19162_v62 }
 0x2ed   :  { %16996 = vmatprep.subr.mxu1 %v2618_v51  ;;  %16964 = vmatpush3.msra.mxu0 %v19214_v31 }
 0x2ee   :  { %16971 = vmatprep.mubr.f32.mxu0 %v19169_v2  ;;  %16997 = vmatpush3.msra.mxu1 %v2618_v51 }
 0x2ef   :  { %17004 = vmatprep.mubr.f32.mxu1 %v19169_v2  ;;  %16965 = vmatprep.subr.mxu0 %v19226_v33 }
 0x2f0   :  { %16998 = vmatprep.subr.mxu1 %v2625_v53  ;;  %16966 = vmatpush3.msra.mxu0 %v19226_v33 }
 0x2f1   :  { %16999 = vmatpush3.msra.mxu1 %v2625_v53  ;;  %16967 = vmatprep.subr.mxu0 %v19238_v9 }
 0x2f2   :  { %17000 = vmatprep.subr.mxu1 %v2632_v55  ;;  %16968 = vmatpush3.msra.mxu0 %v19238_v9 }
 0x2f3   :  { %17001 = vmatpush3.msra.mxu1 %v2632_v55  ;;  %16969 = vmatprep.subr.mxu0 %v19247_v36 }
 0x2f4   :  { %17002 = vmatprep.subr.mxu1 %v2639_v56  ;;  %16970 = vmatpush3.msra.mxu0 %v19247_v36 }
 0x2f5   :  { %17003 = vmatpush3.msra.mxu1 %v2639_v56  ;;  %16972 = vmatmul.mubr.f32.vlgmr.msra.gmra.mxu0 %v19162_v62 }
 0x2f6   :  { %16985 = vmatprep.subr.mxu0 %v19275_v19  ;;  %17005 = vmatmul.mubr.f32.vlgmr.msra.gmra.mxu1 %v19162_v62 }
 0x2f7   :  { %17018 = vmatprep.subr.mxu1 %v19275_v19  ;;  %16986 = vmatpush3.msra.mxu0 %v19275_v19 }
 0x2f8   :  { %16993 = vmatprep.mubr.f32.mxu0 %v19201_v26  ;;  %17019 = vmatpush3.msra.mxu1 %v19275_v19 }
 0x2f9   :  { %17026 = vmatprep.mubr.f32.mxu1 %v19183_v7  ;;  %16987 = vmatprep.subr.mxu0 %v19283_v37 }
 0x2fa   :  { %17020 = vmatprep.subr.mxu1 %v19283_v37  ;;  %16988 = vmatpush3.msra.mxu0 %v19283_v37 }
 0x2fb   :  { %17021 = vmatpush3.msra.mxu1 %v19283_v37  ;;  %16989 = vmatprep.subr.mxu0 %v19292_v40 }
 0x2fc   :  { %17022 = vmatprep.subr.mxu1 %v19292_v40  ;;  %16990 = vmatpush3.msra.mxu0 %v19292_v40 }
 0x2fd   :  { %17023 = vmatpush3.msra.mxu1 %v19292_v40  ;;  %16991 = vmatprep.subr.mxu0 %v19301_v42 }
 0x2fe   :  { %17024 = vmatprep.subr.mxu1 %v19301_v42  ;;  %16992 = vmatpush3.msra.mxu0 %v19301_v42 }
 0x2ff   :  { %17025 = vmatpush3.msra.mxu1 %v19301_v42  ;;  %16994 = vmatmul.mubr.f32.vlgmr.msra.gmra.mxu0 %v19211_v30 }
 0x300   :  { %17007 = vmatprep.subr.mxu0 %v19288_v38  ;;  %17027 = vmatmul.mubr.f32.vlgmr.msra.gmra.mxu1 %v19176_v4 }
 0x301   :  { %17040 = vmatprep.subr.mxu1 %v19275_v19  ;;  %17008 = vmatpush3.msra.mxu0 %v19288_v38 }
 0x302   :  { %17015 = vmatprep.mubr.f32.mxu0 %v19172_v3  ;;  %17041 = vmatpush3.msra.mxu1 %v19275_v19 }
 0x303   :  { %17048 = vmatprep.mubr.f32.mxu1 %v19169_v2  ;;  %17009 = vmatprep.subr.mxu0 %v19299_v41 }
 0x304   :  { %17042 = vmatprep.subr.mxu1 %v19283_v37  ;;  %17010 = vmatpush3.msra.mxu0 %v19299_v41 }
 0x305   :  { %17043 = vmatpush3.msra.mxu1 %v19283_v37  ;;  %17011 = vmatprep.subr.mxu0 %v19311_v44 }
 0x306   :  { %17044 = vmatprep.subr.mxu1 %v19292_v40  ;;  %17012 = vmatpush3.msra.mxu0 %v19311_v44 }
 0x307   :  { %17045 = vmatpush3.msra.mxu1 %v19292_v40  ;;  %17013 = vmatprep.subr.mxu0 %v19321_v46 }
 0x308   :  { %17046 = vmatprep.subr.mxu1 %v19301_v42  ;;  %17014 = vmatpush3.msra.mxu0 %v19321_v46 }
 0x309   :  { %17047 = vmatpush3.msra.mxu1 %v19301_v42  ;;  %17016 = vmatmul.mubr.f32.vlgmr.msra.gmra.mxu0 %v19167_v1 }
 0x30a   :  { %17029 = vmatprep.subr.mxu0 %v19306_v43  ;;  %17049 = vmatmul.mubr.f32.vlgmr.msra.gmra.mxu1 %v19162_v62 }
 0x30b   :  { %17030 = vmatpush3.msra.mxu0 %v19306_v43  ;;  %17037 = vmatprep.mubr.f32.mxu0 %v19169_v2 }
 0x30c   :  { %17031 = vmatprep.subr.mxu0 %v19318_v45 }
 0x30d   :  { %17032 = vmatpush3.msra.mxu0 %v19318_v45 }
 0x30e   :  { %17033 = vmatprep.subr.mxu0 %v19330_v48 }
 0x30f   :  { %17034 = vmatpush3.msra.mxu0 %v19330_v48 }
 0x310   :  { %17035 = vmatprep.subr.mxu0 %v19339_v50 }
 0x311   :  { %17036 = vmatpush3.msra.mxu0 %v19339_v50 }
 0x312   :  { %17038 = vmatmul.mubr.f32.vlgmr.msra.gmra.mxu0 %v19162_v62 }
 0x37c   :  { %v16874_v59 = vpop.f32.mrf.mxu1 }
 0x37e   :  { %v1620_v0 = vpop.f32.mrf.mxu1 }
 0x384   :  { %v16896_v1 = vpop.f32.mrf.mxu1 }
 0x385   :  { %v16863_v57 = vpop.f32.mrf.mxu0 }
 0x386   :  { %v1790_v5 = vpop.f32.mrf.mxu1  ;;  %v1627_v18 = vadd.f32 %v16874_v59, %v16863_v57  ;;  %v19446_v57 = vld [vmem:[#allocation20 + $0x1] ss:$0 sm:$0xff] }
 0x387   :  { %v1519_v60 = vpop.f32.mrf.mxu0 }
 0x388   :  { %v1621_v3 = vadd.f32 %v1620_v0, %v1519_v60 }
 0x38d   :  { %v16885_v63 = vpop.f32.mrf.mxu0 }
 0x38e   :  { %v16918_v6 = vpop.f32.mrf.mxu1  ;;  %v1714_v62 = vadd.f32 %v16885_v63, %v1627_v18 }
 0x38f   :  { %v1706_v2 = vpop.f32.mrf.mxu0 }
 0x390   :  { %v1707_v4 = vadd.f32 %v1706_v2, %v1621_v3  ;;  %v1962_v17 = vpop.f32.mrf.mxu1  ;;  %v1799_v30 = vadd.f32 %v16896_v1, %v1714_v62 }
 0x392   :  { %v1791_v8 = vadd.f32 %v1790_v5, %v1707_v4 }
 0x397   :  { %v16907_v7 = vpop.f32.mrf.mxu0 }
 0x398   :  { %v1888_v32 = vadd.f32 %v16907_v7, %v1799_v30  ;;  %v16940_v11 = vpop.f32.mrf.mxu1 }
 0x399   :  { %v1881_v10 = vpop.f32.mrf.mxu0 }
 0x39a   :  { %v1882_v13 = vadd.f32 %v1881_v10, %v1791_v8  ;;  %v1969_v9 = vadd.f32 %v16918_v6, %v1888_v32  ;;  %v2148_v16 = vpop.f32.mrf.mxu1 }
 0x39c   :  { %v1963_v22 = vadd.f32 %v1962_v17, %v1882_v13  ;;  %v3035_v20 = vmul.f32 %v19414_v23, %v1969_v9  ;;  %v3581_v7 = vmul.f32 %v19446_v57, %v1969_v9 }
 0x39e   :  { %v3034_v26 = vmul.f32 %v19414_v23, %v1963_v22  ;;  %v3040_v19 = vsel %vm1437_vm3, %v3035_v20, 0  ;;  %v3580_v59 = vmul.f32 %v19446_v57, %v1963_v22  ;;  %v3586_v17 = vsel %vm1437_vm3, %v3581_v7, 0 }
 0x39f   :  { %v19430_v38 = vand.u32 4294901760, %v3040_v19  ;;  %v19491_v62 = vand.u32 4294901760, %v3586_v17 }
 0x3a0   :  { %v3037_v27 = vsel %vm1437_vm3, %v3034_v26, 0  ;;  %v3583_v3 = vsel %vm1437_vm3, %v3580_v59, 0  ;;  %v334_v59 = vld [vmem:[#allocation11] sm:$0xff] }
 0x3a1   :  { %v19418_v29 = vand.u32 4294901760, %v3037_v27  ;;  %v16929_v33 = vpop.f32.mrf.mxu0  ;;  %v19433_v45 = vsub.f32 %v3040_v19, %v19430_v38  ;;  %v19476_v10 = vand.u32 4294901760, %v3583_v3 }
 0x3a2   :  { %v2155_v25 = vadd.f32 %v16940_v11, %v16929_v33  ;;  %v16962_v21 = vpop.f32.mrf.mxu1 }
 0x3a3   :  { %17062 = vmatprep.mubr.f32.mxu1 %v19418_v29  ;;  %v19422_v31 = vsub.f32 %v3037_v27, %v19418_v29  ;;  %v2047_v36 = vpop.f32.mrf.mxu0  ;;  %v3127_v53 = vand.u32 4294901760, %v19433_v45  ;;  %v19485_v18 = vsub.f32 %v3583_v3, %v19476_v10 }
 0x3a4   :  { %v2149_v24 = vadd.f32 %v2148_v16, %v2047_v36  ;;  %v2318_v39 = vpop.f32.mrf.mxu1 }
 0x3a5   :  { %v3117_v34 = vand.u32 4294901760, %v19422_v31  ;;  %v3128_v63 = vsub.f32 %v19433_v45, %v3127_v53  ;;  %v3657_v32 = vand.u32 4294901760, %v19485_v18 }
 0x3a7   :  { %v3118_v35 = vsub.f32 %v19422_v31, %v3117_v34  ;;  %v3129_v4 = vand.u32 4294901760, %v3128_v63 }
 0x3a9   :  { %v3119_v15 = vand.u32 4294901760, %v3118_v35  ;;  %v19502_v35 = vsub.f32 %v3586_v17, %v19491_v62 }
 0x3ab   :  { %v16951_v12 = vpop.f32.mrf.mxu0  ;;  %17055 = vmatprep.mubr.f32.mxu0 %v3119_v15  ;;  %v3667_v16 = vand.u32 4294901760, %v19502_v35 }
 0x3ac   :  { %v2242_v28 = vadd.f32 %v16951_v12, %v2155_v25  ;;  %v16984_v41 = vpop.f32.mrf.mxu1 }
 0x3ad   :  { %v2234_v14 = vpop.f32.mrf.mxu0 }
 0x3ae   :  { %v2235_v37 = vadd.f32 %v2234_v14, %v2149_v24  ;;  %v2327_v40 = vadd.f32 %v16962_v21, %v2242_v28  ;;  %v2490_v49 = vpop.f32.mrf.mxu1 }
 0x3b0   :  { %v2319_v44 = vadd.f32 %v2318_v39, %v2235_v37  ;;  %v3668_v37 = vsub.f32 %v19502_v35, %v3667_v16 }
 0x3b5   :  { %v16973_v42 = vpop.f32.mrf.mxu0 }
 0x3b6   :  { %v2416_v43 = vadd.f32 %v16973_v42, %v2327_v40  ;;  %v17006_v26 = vpop.f32.mrf.mxu1 }
 0x3b7   :  { %v2409_v46 = vpop.f32.mrf.mxu0 }
 0x3b8   :  { %v2497_v47 = vadd.f32 %v16984_v41, %v2416_v43  ;;  %v2410_v48 = vadd.f32 %v2409_v46, %v2319_v44  ;;  %v2676_v9 = vpop.f32.mrf.mxu1  ;;  %v3669_v41 = vand.u32 4294901760, %v3668_v37 }
 0x3ba   :  { %v3046_v50 = vsel %vm1437_vm3, %v2497_v47, 0  ;;  %v2491_v51 = vadd.f32 %v2490_v49, %v2410_v48 }
 0x3bb   :  { %v19436_v52 = vand.u32 4294901760, %v3046_v50 }
 0x3bc   :  { %v3043_v54 = vsel %vm1437_vm3, %v2491_v51, 0 }
 0x3bd   :  { %v19441_v55 = vsub.f32 %v3046_v50, %v19436_v52  ;;  %v19443_v56 = vand.u32 4294901760, %v3043_v54  ;;  %17051 = vmatprep.subr.mxu0 %v19436_v52 }
 0x3be   :  { %17052 = vmatpush3.xpose.msra.mxu0 %v19436_v52 }
 0x3bf   :  { %v19451_v60 = vsub.f32 %v3043_v54, %v19443_v56  ;;  %17053 = vmatprep.subr.mxu0 %v19443_v56  ;;  %v19458_v0 = vand.u32 4294901760, %v19441_v55  ;;  %v16995_v13 = vpop.f32.mrf.mxu0 }
 0x3c0   :  { %v2683_v30 = vadd.f32 %v17006_v26, %v16995_v13  ;;  %v17028_v15 = vpop.f32.mrf.mxu1 }
 0x3c1   :  { %v3167_v1 = vsub.f32 %v19441_v55, %v19458_v0  ;;  %v19463_v2 = vand.u32 4294901760, %v19451_v60  ;;  %v2575_v22 = vpop.f32.mrf.mxu0 }
 0x3c2   :  { %17054 = vmatpush3.xpose.msra.mxu0 %v19443_v56  ;;  %v2677_v36 = vadd.f32 %v2676_v9, %v2575_v22  ;;  %v2846_v21 = vpop.f32.mrf.mxu1 }
 0x3c3   :  { %17065 = vmatprep.subr.mxu0 %v19441_v55  ;;  %v19468_v5 = vand.u32 4294901760, %v3167_v1  ;;  %v3174_v6 = vsub.f32 %v19451_v60, %v19463_v2 }
 0x3c5   :  { %17056 = vmatmul.mubr.f32.vlgmr.msra.gmra.mxu0 %v3129_v4  ;;  %17058 = vmatprep.subr.mxu1 %v19468_v5  ;;  %v19474_v8 = vand.u32 4294901760, %v3174_v6 }
 0x3c6   :  { %17059 = vmatpush3.xpose.msra.mxu1 %v19468_v5  ;;  %17066 = vmatpush3.xpose.msra.mxu0 %v19441_v55 }
 0x3c7   :  { %17069 = vmatprep.mubr.f32.mxu0 %v19422_v31  ;;  %17060 = vmatprep.subr.mxu1 %v19474_v8 }
 0x3c8   :  { %17067 = vmatprep.subr.mxu0 %v19451_v60 }
 0x3c9   :  { %v17017_v27 = vpop.f32.mrf.mxu0 }
 0x3ca   :  { %17061 = vmatpush3.xpose.msra.mxu1 %v19474_v8  ;;  %17068 = vmatpush3.xpose.msra.mxu0 %v19451_v60  ;;  %v2770_v33 = vadd.f32 %v17017_v27, %v2683_v30  ;;  %v17050_v28 = vpop.f32.mrf.mxu1 }
 0x3cb   :  { %17072 = vmatprep.subr.mxu1 %v19436_v52  ;;  %17079 = vmatprep.subr.mxu0 %v19458_v0  ;;  %v2762_v11 = vpop.f32.mrf.mxu0 }
 0x3cc   :  { %v2763_v12 = vadd.f32 %v2762_v11, %v2677_v36  ;;  %v2855_v20 = vadd.f32 %v17028_v15, %v2770_v33 }
 0x3cd   :  { %17063 = vmatmul.mubr.f32.vlgmr.msra.gmra.mxu1 %v19430_v38  ;;  %17070 = vmatmul.mubr.f32.vlgmr.msra.gmra.mxu0 %v19433_v45 }
 0x3ce   :  { %17073 = vmatpush3.xpose.msra.mxu1 %v19436_v52  ;;  %17076 = vmatprep.mubr.f32.mxu1 %v3117_v34  ;;  %v3658_v34 = vsub.f32 %v19485_v18, %v3657_v32  ;;  %v2847_v24 = vadd.f32 %v2846_v21, %v2763_v12 }
 0x3cf   :  { %17080 = vmatpush3.xpose.msra.mxu0 %v19458_v0  ;;  %17083 = vmatprep.mubr.f32.mxu0 %v19418_v29 }
 0x3d0   :  { %17074 = vmatprep.subr.mxu1 %v19443_v56  ;;  %17081 = vmatprep.subr.mxu0 %v19463_v2  ;;  %v3659_v19 = vand.u32 4294901760, %v3658_v34 }
 0x3d2   :  { %v17039_v31 = vpop.f32.mrf.mxu0  ;;  %17075 = vmatpush3.xpose.msra.mxu1 %v19443_v56 }
 0x3d3   :  { %17082 = vmatpush3.xpose.msra.mxu0 %v19463_v2  ;;  %17086 = vmatprep.subr.mxu1 %v19436_v52  ;;  %v2944_v25 = vadd.f32 %v17039_v31, %v2855_v20 }
 0x3d4   :  { %17093 = vmatprep.subr.mxu0 %v19436_v52  ;;  %v2937_v14 = vpop.f32.mrf.mxu0 }
 0x3d5   :  { %17077 = vmatmul.mubr.f32.vlgmr.msra.gmra.mxu1 %v3127_v53  ;;  %v19522_v39 = vadd.f32 %v17050_v28, %v2944_v25  ;;  %v2938_v40 = vadd.f32 %v2937_v14, %v2847_v24 }
 0x3d6   :  { %17084 = vmatmul.mubr.f32.vlgmr.msra.gmra.mxu0 %v19430_v38  ;;  %17087 = vmatpush3.xpose.msra.mxu1 %v19436_v52 }
 0x3d7   :  { %17090 = vmatprep.mubr.f32.mxu1 %v19418_v29  ;;  %17094 = vmatpush3.xpose.msra.mxu0 %v19436_v52  ;;  %v3018_v29 = vpop.f32.mrf.mxu1  ;;  %v4113_v42 = vmul.f32 %v19446_v57, %v19522_v39 }
 0x3d8   :  { %17097 = vmatprep.mubr.f32.mxu0 %v3659_v19  ;;  %17088 = vmatprep.subr.mxu1 %v19443_v56  ;;  %v19531_v43 = vadd.f32 %v3018_v29, %v2938_v40 }
 0x3d9   :  { %17095 = vmatprep.subr.mxu0 %v19443_v56  ;;  %v19539_v44 = vand.u32 4294901760, %v4113_v42 }
 0x3da   :  { %17089 = vmatpush3.xpose.msra.mxu1 %v19443_v56  ;;  %v4112_v45 = vmul.f32 %v19446_v57, %v19531_v43 }
 0x3db   :  { %17096 = vmatpush3.xpose.msra.mxu0 %v19443_v56  ;;  %17100 = vmatprep.subr.mxu1 %v19468_v5 }
 0x3dc   :  { %17107 = vmatprep.subr.mxu0 %v19441_v55  ;;  %v19551_v46 = vand.u32 4294901760, %v4112_v45 }
 0x3dd   :  { %17091 = vmatmul.mubr.f32.vlgmr.msra.gmra.mxu1 %v19430_v38  ;;  %v19549_v38 = vsub.f32 %v4113_v42, %v19539_v44 }
 0x3de   :  { %17098 = vmatmul.mubr.f32.vlgmr.msra.gmra.mxu0 %v3669_v41  ;;  %17101 = vmatpush3.xpose.msra.mxu1 %v19468_v5  ;;  %v19562_v47 = vsub.f32 %v4112_v45, %v19551_v46 }
 0x3df   :  { %17104 = vmatprep.mubr.f32.mxu1 %v19476_v10  ;;  %17108 = vmatpush3.xpose.msra.mxu0 %v19441_v55  ;;  %v19566_v48 = vand.u32 4294901760, %v19549_v38 }
 0x3e0   :  { %17111 = vmatprep.mubr.f32.mxu0 %v19485_v18  ;;  %17102 = vmatprep.subr.mxu1 %v19474_v8  ;;  %v19575_v50 = vand.u32 4294901760, %v19562_v47 }
 0x3e1   :  { %17109 = vmatprep.subr.mxu0 %v19451_v60  ;;  %v4239_v49 = vsub.f32 %v19549_v38, %v19566_v48 }
 0x3e2   :  { %17103 = vmatpush3.xpose.msra.mxu1 %v19474_v8  ;;  %v4246_v53 = vsub.f32 %v19562_v47, %v19575_v50 }
 0x3e3   :  { %17110 = vmatpush3.xpose.msra.mxu0 %v19451_v60  ;;  %17114 = vmatprep.subr.mxu1 %v19436_v52  ;;  %v4240_v51 = vand.u32 4294901760, %v4239_v49  ;;  %v335_v60 = vld [vmem:[#allocation11 + $0x8] sm:$0xff] }
 0x3e4   :  { %17121 = vmatprep.subr.mxu0 %v19458_v0 }
 0x3e5   :  { %17105 = vmatmul.mubr.f32.vlgmr.msra.gmra.mxu1 %v19491_v62 }
 0x3e6   :  { %17112 = vmatmul.mubr.f32.vlgmr.msra.gmra.mxu0 %v19502_v35  ;;  %17115 = vmatpush3.xpose.msra.mxu1 %v19436_v52 }
 0x3e7   :  { %17118 = vmatprep.mubr.f32.mxu1 %v3657_v32  ;;  %17122 = vmatpush3.xpose.msra.mxu0 %v19458_v0 }
 0x3e8   :  { %17125 = vmatprep.mubr.f32.mxu0 %v19476_v10  ;;  %17116 = vmatprep.subr.mxu1 %v19443_v56 }
 0x3e9   :  { %17123 = vmatprep.subr.mxu0 %v19463_v2 }
 0x3ea   :  { %17117 = vmatpush3.xpose.msra.mxu1 %v19443_v56 }
 0x3eb   :  { %17124 = vmatpush3.xpose.msra.mxu0 %v19463_v2  ;;  %17128 = vmatprep.subr.mxu1 %v19436_v52 }
 0x3ec   :  { %17135 = vmatprep.subr.mxu0 %v19539_v44 }
 0x3ed   :  { %17119 = vmatmul.mubr.f32.vlgmr.msra.gmra.mxu1 %v3667_v16 }
 0x3ee   :  { %17126 = vmatmul.mubr.f32.vlgmr.msra.gmra.mxu0 %v19491_v62  ;;  %17129 = vmatpush3.xpose.msra.mxu1 %v19436_v52  ;;  %v4247_v52 = vand.u32 4294901760, %v4246_v53 }
 0x3ef   :  { %17132 = vmatprep.mubr.f32.mxu1 %v19476_v10  ;;  %17136 = vmatpush3.msra.mxu0 %v19539_v44 }
 0x3f0   :  { %17130 = vmatprep.subr.mxu1 %v19443_v56  ;;  %17137 = vmatprep.subr.mxu0 %v19551_v46 }
 0x3f1   :  { %17138 = vmatpush3.msra.mxu0 %v19551_v46 }
 0x3f2   :  { %17149 = vmatprep.subr.mxu0 %v19549_v38  ;;  %17131 = vmatpush3.xpose.msra.mxu1 %v19443_v56 }
 0x3f3   :  { %17142 = vmatprep.subr.mxu1 %v4240_v51 }
 0x3f5   :  { %17133 = vmatmul.mubr.f32.vlgmr.msra.gmra.mxu1 %v19491_v62 }
 0x3f6   :  { %17143 = vmatpush3.msra.mxu1 %v4240_v51 }
 0x3f7   :  { %17144 = vmatprep.subr.mxu1 %v4247_v52 }
 0x3f8   :  { %17145 = vmatpush3.msra.mxu1 %v4247_v52 }
 0x3f9   :  { %17156 = vmatprep.subr.mxu1 %v19539_v44 }
 0x485   :  { %v17057_v54 = vpop.f32.mrf.mxu0 }
 0x486   :  { %v3132_v2 = vadd.f32 %v17057_v54, %v335_v60 }
 0x487   :  { %v3121_v57 = vpop.f32.mrf.mxu0 }
 0x488   :  { %v3122_v0 = vadd.f32 %v3121_v57, %v334_v59 }
 0x48d   :  { %v17064_v55 = vpop.f32.mrf.mxu1  ;;  %v17071_v1 = vpop.f32.mrf.mxu0 }
 0x48e   :  { %v3219_v4 = vadd.f32 %v17064_v55, %v3132_v2 }
 0x48f   :  { %v3212_v63 = vpop.f32.mrf.mxu1  ;;  %v3294_v5 = vpop.f32.mrf.mxu0 }
 0x490   :  { %v3213_v3 = vadd.f32 %v3212_v63, %v3122_v0  ;;  %v3302_v10 = vadd.f32 %v17071_v1, %v3219_v4 }
 0x492   :  { %v3295_v7 = vadd.f32 %v3294_v5, %v3213_v3 }
 0x495   :  { %v17078_v56 = vpop.f32.mrf.mxu1 }
 0x496   :  { %v17085_v8 = vpop.f32.mrf.mxu0  ;;  %v3385_v17 = vadd.f32 %v17078_v56, %v3302_v10 }
 0x497   :  { %v3376_v6 = vpop.f32.mrf.mxu1 }
 0x498   :  { %v3377_v13 = vadd.f32 %v3376_v6, %v3295_v7  ;;  %v3461_v18 = vpop.f32.mrf.mxu0  ;;  %v3468_v27 = vadd.f32 %v17085_v8, %v3385_v17 }
 0x49a   :  { %v3462_v62 = vadd.f32 %v3461_v18, %v3377_v13 }
 0x49d   :  { %v17092_v22 = vpop.f32.mrf.mxu1 }
 0x49e   :  { %v3547_v32 = vadd.f32 %v17092_v22, %v3468_v27  ;;  %v17099_v35 = vpop.f32.mrf.mxu0 }
 0x49f   :  { %v3540_v26 = vpop.f32.mrf.mxu1  ;;  %v3672_v12 = vadd.f32 %v17099_v35, %v335_v60  ;;  %v3572_v35 = vmul.f32 %v19414_v23, %v19531_v43 }
 0x4a0   :  { %v3541_v30 = vadd.f32 %v3540_v26, %v3462_v62  ;;  %v3553_v11 = vsel %vm926_vm2, %v3547_v32, -inf  ;;  %v3661_v36 = vpop.f32.mrf.mxu0 }
 0x4a1   :  { %v3662_v31 = vadd.f32 %v3661_v36, %v334_v59 }
 0x4a2   :  { %v3550_v33 = vsel %vm926_vm2, %v3541_v30, -inf }
 0x4a3   :  { %3551 = vmax.xlane.f32.xlu1 %v3550_v33 }
 0x4a5   :  { %v17106_v9 = vpop.f32.mrf.mxu1 }
 0x4a6   :  { %v17113_v34 = vpop.f32.mrf.mxu0  ;;  %v3759_v25 = vadd.f32 %v17106_v9, %v3672_v12 }
 0x4a7   :  { %3554 = vmax.xlane.f32.xlu1 %v3553_v11  ;;  %v3752_v15 = vpop.f32.mrf.mxu1 }
 0x4a8   :  { %v3753_v20 = vadd.f32 %v3752_v15, %v3662_v31  ;;  %v3834_v21 = vpop.f32.mrf.mxu0  ;;  %v3842_v28 = vadd.f32 %v17113_v34, %v3759_v25  ;;  %v19605_v15 = vand.u32 4294901760, %v3572_v35 }
 0x4aa   :  { %v3835_v19 = vadd.f32 %v3834_v21, %v3753_v20 }
 0x4ad   :  { %v17120_v16 = vpop.f32.mrf.mxu1 }
 0x4ae   :  { %v17127_v24 = vpop.f32.mrf.mxu0  ;;  %v3925_v40 = vadd.f32 %v17120_v16, %v3842_v28 }
 0x4af   :  { %v3916_v14 = vpop.f32.mrf.mxu1 }
 0x4b0   :  { %v3917_v37 = vadd.f32 %v3916_v14, %v3835_v19  ;;  %v4001_v29 = vpop.f32.mrf.mxu0  ;;  %v4008_v49 = vadd.f32 %v17127_v24, %v3925_v40 }
 0x4b2   :  { %v4002_v42 = vadd.f32 %v4001_v29, %v3917_v37 }
 0x4b5   :  { %v17134_v41 = vpop.f32.mrf.mxu1 }
 0x4b6   :  { %v4087_v53 = vadd.f32 %v17134_v41, %v4008_v49 }
 0x4b7   :  { %v4080_v45 = vpop.f32.mrf.mxu1 }
 0x4b8   :  { %v4081_v51 = vadd.f32 %v4080_v45, %v4002_v42  ;;  %v4093_v54 = vsel %vm926_vm2, %v4087_v53, -inf }
 0x4ba   :  { %v4090_v52 = vsel %vm926_vm2, %v4081_v51, -inf }
 0x4bb   :  { %4091 = vmax.xlane.f32.xlu0 %v4090_v52 }
 0x4bf   :  { %4094 = vmax.xlane.f32.xlu0 %v4093_v54 }
 0x52c   :  { %v3552_v55 = vpop.xlane.xlu1 %3551 }
 0x52d   :  { %v3556_v57 = vsub.f32 %v3541_v30, %v3552_v55 }
 0x52f   :  { %v3558_v0 = vmul.f32 1.442695, %v3556_v57 }
 0x530   :  { %v3555_v59 = vpop.xlane.xlu1 %3554 }
 0x531   :  { %v3557_v1 = vsub.f32 %v3547_v32, %v3555_v59  ;;  %v3573_v32 = vmul.f32 %v19414_v23, %v19522_v39  ;;  %v19615_v23 = vsub.f32 %v3572_v35, %v19605_v15 }
 0x533   :  { %v3560_v4 = vmul.f32 1.442695, %v3557_v1  ;;  %v19602_v9 = vand.u32 4294901760, %v3573_v32  ;;  %v19623_v29 = vand.u32 4294901760, %v19615_v23 }
 0x535   :  { %v19610_v12 = vsub.f32 %v3573_v32, %v19602_v9 }
 0x537   :  { %v19619_v19 = vand.u32 4294901760, %v19610_v12 }
 0x539   :  { %v4747_v45 = vsub.f32 %v19610_v12, %v19619_v19 }
 0x53b   :  { %v4748_v55 = vand.u32 4294901760, %v4747_v45 }
 0x544   :  { %v4092_v60 = vpop.xlane.xlu0 %4091 }
 0x545   :  { %v4096_v63 = vsub.f32 %v4081_v51, %v4092_v60 }
 0x547   :  { %v4098_v2 = vmul.f32 1.442695, %v4096_v63 }
 0x548   :  { %v4095_v3 = vpop.xlane.xlu0 %4094 }
 0x549   :  { %18275 = vpow2.f32 %v4098_v2  ;;  %v4097_v56 = vsub.f32 %v4087_v53, %v4095_v3  ;;  %v4754_v53 = vsub.f32 %v19615_v23, %v19623_v29 }
 0x54a   :  { %18277 = vpow2.f32 %v3558_v0 }
 0x54b   :  { %v4100_v5 = vmul.f32 1.442695, %v4097_v56 }
 0x54d   :  { %18279 = vpow2.f32 %v4100_v5 }
 0x54e   :  { %18281 = vpow2.f32 %v3560_v4 }
 0x556   :  { %v18276_v6 = vpop.eup %18275 }
 0x557   :  { %v4102_v7 = vsel %vm926_vm2, %v18276_v6, 0.0  ;;  %v18278_v8 = vpop.eup %18277 }
 0x558   :  { %4103 = vadd.xlane.f32.xlu0 %v4102_v7  ;;  %v3562_v13 = vsel %vm926_vm2, %v18278_v8, 0.0 }
 0x55a   :  { %v18280_v10 = vpop.eup %18279 }
 0x55b   :  { %v4105_v17 = vsel %vm926_vm2, %v18280_v10, 0.0  ;;  %v18282_v18 = vpop.eup %18281 }
 0x55c   :  { %3563 = vadd.xlane.f32.xlu0 %v3562_v13  ;;  %4106 = vadd.xlane.f32.xlu1 %v4105_v17  ;;  %v3565_v22 = vsel %vm926_vm2, %v18282_v18, 0.0 }
 0x560   :  { %3566 = vadd.xlane.f32.xlu1 %v3565_v22 }
 0x5e1   :  { %v4104_v62 = vpop.xlane.xlu0 %4103 }
 0x5e2   :  { %18283 = vrcp.f32 %v4104_v62 }
 0x5e5   :  { %v3564_v26 = vpop.xlane.xlu0 %3563  ;;  %v4107_v27 = vpop.xlane.xlu1 %4106 }
 0x5e6   :  { %18285 = vrcp.f32 %v4107_v27 }
 0x5e7   :  { %18287 = vrcp.f32 %v3564_v26 }
 0x5e9   :  { %v3567_v30 = vpop.xlane.xlu1 %3566 }
 0x5ea   :  { %18289 = vrcp.f32 %v3567_v30 }
 0x5ef   :  { %v18284_v33 = vpop.eup %18283 }
 0x5f0   :  { %v4109_v11 = vmul.f32 %v18284_v33, %v18276_v6 }
 0x5f2   :  { %v4115_v36 = vsel %vm926_vm2, %v4109_v11, 0 }
 0x5f3   :  { %v19607_v31 = vand.u32 4294901760, %v4115_v36  ;;  %v18286_v34 = vpop.eup %18285 }
 0x5f4   :  { %v18288_v20 = vpop.eup %18287  ;;  %v4111_v39 = vmul.f32 %v18286_v34, %v18280_v10 }
 0x5f5   :  { %17146 = vmatprep.mubr.f32.mxu1 %v19607_v31  ;;  %v4188_v16 = vsub.f32 %v4115_v36, %v19607_v31  ;;  %v3569_v24 = vmul.f32 %v18288_v20, %v18278_v8 }
 0x5f6   :  { %v4118_v43 = vsel %vm926_vm2, %v4111_v39, 0 }
 0x5f7   :  { %v4189_v25 = vand.u32 4294901760, %v4188_v16  ;;  %v18290_v21 = vpop.eup %18289  ;;  %v4197_v14 = vand.u32 4294901760, %v4118_v43  ;;  %v4623_v49 = vsel %vm926_vm2, %v3569_v24, 0 }
 0x5f8   :  { %v3571_v41 = vmul.f32 %v18290_v21, %v18282_v18  ;;  %v4695_v52 = vand.u32 4294901760, %v4623_v49 }
 0x5f9   :  { %v4190_v28 = vsub.f32 %v4188_v16, %v4189_v25  ;;  %v4198_v37 = vsub.f32 %v4118_v43, %v4197_v14  ;;  %17147 = vmatmul.mubr.f32.vlgmr.msra.gmra.mxu1 %v4197_v14 }
 0x5fa   :  { %17157 = vmatpush3.msra.mxu1 %v19539_v44  ;;  %17160 = vmatprep.mubr.f32.mxu1 %v4189_v25  ;;  %v4626_v54 = vsel %vm926_vm2, %v3571_v41, 0  ;;  %v4696_v60 = vsub.f32 %v4623_v49, %v4695_v52 }
 0x5fb   :  { %v4191_v40 = vand.u32 4294901760, %v4190_v28  ;;  %17158 = vmatprep.subr.mxu1 %v19551_v46  ;;  %v4199_v42 = vand.u32 4294901760, %v4198_v37  ;;  %v4705_v59 = vand.u32 4294901760, %v4626_v54 }
 0x5fc   :  { %17159 = vmatpush3.msra.mxu1 %v19551_v46 }
 0x5fd   :  { %17139 = vmatprep.mubr.f32.mxu0 %v4191_v40  ;;  %17170 = vmatprep.subr.mxu1 %v19539_v44  ;;  %v4200_v51 = vsub.f32 %v4198_v37, %v4199_v42  ;;  %v4706_v63 = vsub.f32 %v4626_v54, %v4705_v59 }
 0x5fe   :  { %17161 = vmatmul.mubr.f32.vlgmr.msra.gmra.mxu1 %v4199_v42 }
 0x5ff   :  { %17171 = vmatpush3.msra.mxu1 %v19539_v44  ;;  %17174 = vmatprep.mubr.f32.mxu1 %v19607_v31  ;;  %v4201_v57 = vand.u32 4294901760, %v4200_v51  ;;  %v4755_v44 = vand.u32 4294901760, %v4754_v53 }
 0x600   :  { %17172 = vmatprep.subr.mxu1 %v19551_v46 }
 0x601   :  { %17173 = vmatpush3.msra.mxu1 %v19551_v46  ;;  %17140 = vmatmul.mubr.f32.vlgmr.msra.gmra.mxu0 %v4201_v57  ;;  %v4697_v46 = vand.u32 4294901760, %v4696_v60 }
 0x602   :  { %17184 = vmatprep.subr.mxu1 %v4748_v55  ;;  %17150 = vmatpush3.msra.mxu0 %v19549_v38  ;;  %v4707_v38 = vand.u32 4294901760, %v4706_v63 }
 0x603   :  { %17175 = vmatmul.mubr.f32.vlgmr.msra.gmra.mxu1 %v4197_v14  ;;  %17151 = vmatprep.subr.mxu0 %v19562_v47 }
 0x604   :  { %17185 = vmatpush3.msra.mxu1 %v4748_v55  ;;  %17153 = vmatprep.mubr.f32.mxu0 %v4188_v16 }
 0x605   :  { %17186 = vmatprep.subr.mxu1 %v4755_v44  ;;  %17188 = vmatprep.mubr.f32.mxu1 %v4695_v52 }
 0x606   :  { %17152 = vmatpush3.msra.mxu0 %v19562_v47  ;;  %17187 = vmatpush3.msra.mxu1 %v4755_v44  ;;  %v4698_v47 = vsub.f32 %v4696_v60, %v4697_v46 }
 0x607   :  { %17163 = vmatprep.subr.mxu0 %v19566_v48  ;;  %17198 = vmatprep.subr.mxu1 %v19602_v9 }
 0x608   :  { %17154 = vmatmul.mubr.f32.vlgmr.msra.gmra.mxu0 %v4198_v37  ;;  %17189 = vmatmul.mubr.f32.vlgmr.msra.gmra.mxu1 %v4705_v59  ;;  %v4699_v0 = vand.u32 4294901760, %v4698_v47 }
 0x609   :  { %17164 = vmatpush3.msra.mxu0 %v19566_v48  ;;  %17199 = vmatpush3.msra.mxu1 %v19602_v9  ;;  %v4708_v48 = vsub.f32 %v4706_v63, %v4707_v38 }
 0x60a   :  { %17165 = vmatprep.subr.mxu0 %v19575_v50  ;;  %17167 = vmatprep.mubr.f32.mxu0 %v19607_v31 }
 0x60b   :  { %17200 = vmatprep.subr.mxu1 %v19605_v15  ;;  %17202 = vmatprep.mubr.f32.mxu1 %v4697_v46 }
 0x60c   :  { %17166 = vmatpush3.msra.mxu0 %v19575_v50  ;;  %17201 = vmatpush3.msra.mxu1 %v19605_v15  ;;  %v4709_v50 = vand.u32 4294901760, %v4708_v48  ;;  %v389_v48 = vld [vmem:[#allocation29 + $0x18] sm:$0xff] }
 0x60d   :  { %17177 = vmatprep.subr.mxu0 %v19602_v9  ;;  %17212 = vmatprep.subr.mxu1 %v19602_v9 }
 0x60e   :  { %17168 = vmatmul.mubr.f32.vlgmr.msra.gmra.mxu0 %v4197_v14  ;;  %17203 = vmatmul.mubr.f32.vlgmr.msra.gmra.mxu1 %v4707_v38 }
 0x60f   :  { %17178 = vmatpush3.msra.mxu0 %v19602_v9  ;;  %17213 = vmatpush3.msra.mxu1 %v19602_v9 }
 0x610   :  { %17179 = vmatprep.subr.mxu0 %v19605_v15  ;;  %17181 = vmatprep.mubr.f32.mxu0 %v4699_v0  ;;  %v387_v0 = vld [vmem:[#allocation29 + $0x8] sm:$0xff] }
 0x611   :  { %17214 = vmatprep.subr.mxu1 %v19605_v15  ;;  %17216 = vmatprep.mubr.f32.mxu1 %v4695_v52 }
 0x612   :  { %17180 = vmatpush3.msra.mxu0 %v19605_v15  ;;  %17215 = vmatpush3.msra.mxu1 %v19605_v15 }
 0x613   :  { %17191 = vmatprep.subr.mxu0 %v19610_v12  ;;  %17182 = vmatmul.mubr.f32.vlgmr.msra.gmra.mxu0 %v4709_v50  ;;  %v19672_v50 = vand.u32 4294901760, %v389_v48 }
 0x614   :  { %17217 = vmatmul.mubr.f32.vlgmr.msra.gmra.mxu1 %v4705_v59  ;;  %17192 = vmatpush3.msra.mxu0 %v19610_v12 }
 0x615   :  { %17195 = vmatprep.mubr.f32.mxu0 %v4696_v60  ;;  %17193 = vmatprep.subr.mxu0 %v19615_v23 }
 0x616   :  { %17194 = vmatpush3.msra.mxu0 %v19615_v23 }
 0x617   :  { %17205 = vmatprep.subr.mxu0 %v19619_v19  ;;  %17196 = vmatmul.mubr.f32.vlgmr.msra.gmra.mxu0 %v4706_v63 }
 0x618   :  { %17206 = vmatpush3.msra.mxu0 %v19619_v19  ;;  %17209 = vmatprep.mubr.f32.mxu0 %v4695_v52 }
 0x619   :  { %17207 = vmatprep.subr.mxu0 %v19623_v29 }
 0x61a   :  { %17208 = vmatpush3.msra.mxu0 %v19623_v29 }
 0x61b   :  { %17210 = vmatmul.mubr.f32.vlgmr.msra.gmra.mxu0 %v4705_v59  ;;  %17219 = vmatprep.subr.mxu0 %v19672_v50 }
 0x61c   :  { %17220 = vmatpush3.msra.mxu0 %v19672_v50 }
 0x6b9   :  { %v17148_v1 = vpop.f32.mrf.mxu1 }
 0x6bb   :  { %v4284_v2 = vpop.f32.mrf.mxu1 }
 0x6be   :  { %v17162_v3 = vpop.f32.mrf.mxu1 }
 0x6c0   :  { %v4448_v56 = vpop.f32.mrf.mxu1 }
 0x6c1   :  { %v17141_v4 = vpop.f32.mrf.mxu0 }
 0x6c2   :  { %v4291_v7 = vadd.f32 %v17148_v1, %v17141_v4  ;;  %v19681_v4 = vsub.f32 %v389_v48, %v19672_v50 }
 0x6c3   :  { %v17176_v5 = vpop.f32.mrf.mxu1  ;;  %v4193_v6 = vpop.f32.mrf.mxu0 }
 0x6c4   :  { %v4285_v13 = vadd.f32 %v4284_v2, %v4193_v6  ;;  %v19676_v2 = vand.u32 4294901760, %v387_v0 }
 0x6c5   :  { %v4612_v8 = vpop.f32.mrf.mxu1 }
 0x6c6   :  { %v19687_v6 = vsub.f32 %v387_v0, %v19676_v2 }
 0x6c8   :  { %v17155_v10 = vpop.f32.mrf.mxu0  ;;  %v17190_v26 = vpop.f32.mrf.mxu1 }
 0x6c9   :  { %v4374_v17 = vadd.f32 %v17155_v10, %v4291_v7 }
 0x6ca   :  { %v4366_v18 = vpop.f32.mrf.mxu0  ;;  %v4792_v33 = vpop.f32.mrf.mxu1 }
 0x6cb   :  { %v4367_v22 = vadd.f32 %v4366_v18, %v4285_v13  ;;  %v4457_v62 = vadd.f32 %v17162_v3, %v4374_v17  ;;  %v386_v3 = vld [vmem:[#allocation29] sm:$0xff]  ;;  %v19701_v13 = vand.u32 4294901760, %v19687_v6 }
 0x6cd   :  { %v4449_v27 = vadd.f32 %v4448_v56, %v4367_v22  ;;  %v19678_v56 = vand.u32 4294901760, %v386_v3 }
 0x6ce   :  { %v17169_v30 = vpop.f32.mrf.mxu0  ;;  %v17204_v15 = vpop.f32.mrf.mxu1 }
 0x6cf   :  { %v4540_v32 = vadd.f32 %v17169_v30, %v4457_v62  ;;  %v19691_v7 = vsub.f32 %v386_v3, %v19678_v56  ;;  %v5312_v62 = vsub.f32 %v19687_v6, %v19701_v13 }
 0x6d0   :  { %v4533_v35 = vpop.f32.mrf.mxu0  ;;  %v4956_v16 = vpop.f32.mrf.mxu1 }
 0x6d1   :  { %v4534_v9 = vadd.f32 %v4533_v35, %v4449_v27  ;;  %v4619_v11 = vadd.f32 %v17176_v5, %v4540_v32  ;;  %v19705_v17 = vand.u32 4294901760, %v19691_v7  ;;  %v5313_v32 = vand.u32 4294901760, %v5312_v62 }
 0x6d3   :  { %v4613_v36 = vadd.f32 %v4612_v8, %v4534_v9  ;;  %v17183_v31 = vpop.f32.mrf.mxu0  ;;  %v19695_v8 = vand.u32 4294901760, %v19681_v4  ;;  %v5319_v30 = vsub.f32 %v19691_v7, %v19705_v17 }
 0x6d4   :  { %v4712_v34 = vadd.f32 %v17183_v31, %v4619_v11  ;;  %v17218_v24 = vpop.f32.mrf.mxu1 }
 0x6d5   :  { %v4701_v12 = vpop.f32.mrf.mxu0  ;;  %v5298_v18 = vsub.f32 %v19681_v4, %v19695_v8 }
 0x6d6   :  { %v4702_v20 = vadd.f32 %v4701_v12, %v4613_v36  ;;  %v4799_v39 = vadd.f32 %v17190_v26, %v4712_v34  ;;  %v5120_v45 = vpop.f32.mrf.mxu1  ;;  %v15944_v12 = vld [vmem:[%s21161_s17] ss:$0 sm:$0xff] }
 0x6d7   :  { %v17197_v23 = vpop.f32.mrf.mxu0  ;;  %v5299_v26 = vand.u32 4294901760, %v5298_v18 }
 0x6d8   :  { %v4882_v43 = vadd.f32 %v17197_v23, %v4799_v39  ;;  %v4793_v25 = vadd.f32 %v4792_v33, %v4702_v20  ;;  %v5320_v33 = vand.u32 4294901760, %v5319_v30 }
 0x6d9   :  { %v4874_v21 = vpop.f32.mrf.mxu0  ;;  %17230 = vmatprep.subr.mxu1 %v5299_v26 }
 0x6da   :  { %v4875_v14 = vadd.f32 %v4874_v21, %v4793_v25  ;;  %v4965_v19 = vadd.f32 %v17204_v15, %v4882_v43  ;;  %17231 = vmatpush3.msra.mxu1 %v5299_v26 }
 0x6db   :  { %v17211_v28 = vpop.f32.mrf.mxu0 }
 0x6dc   :  { %v5048_v37 = vadd.f32 %v17211_v28, %v4965_v19  ;;  %v4957_v40 = vadd.f32 %v4956_v16, %v4875_v14  ;;  %v15945_v16 = vld [vmem:[#allocation25] ss:$0 sm:$0xff] }
 0x6dd   :  { %v5041_v29 = vpop.f32.mrf.mxu0 }
 0x6de   :  { %v5127_v41 = vadd.f32 %v17218_v24, %v5048_v37  ;;  %v5042_v42 = vadd.f32 %v5041_v29, %v4957_v40 }
 0x6e0   :  { %v5121_v49 = vadd.f32 %v5120_v45, %v5042_v42  ;;  %v5131_v51 = vadd.f32 %v5127_v41, %v19156_v58 }
 0x6e2   :  { %v5135_v53 = vsel %vm1437_vm3, %v5131_v51, 0.0  ;;  %v5130_v52 = vadd.f32 %v5121_v49, %v19160_v61  ;;  %v388_v61 = vld [vmem:[#allocation29 + $0x10] sm:$0xff] }
 0x6e3   :  { %5136 = vadd.xlane.f32.xlu1 %v5135_v53  ;;  %v19674_v1 = vand.u32 4294901760, %v388_v61 }
 0x6e4   :  { %v5132_v54 = vsel %vm1437_vm3, %v5130_v52, 0.0 }
 0x6e5   :  { %5133 = vadd.xlane.f32.xlu0 %v5132_v54  ;;  %v19684_v5 = vsub.f32 %v388_v61, %v19674_v1  ;;  %17221 = vmatprep.subr.mxu0 %v19674_v1 }
 0x6e6   :  { %17222 = vmatpush3.msra.mxu0 %v19674_v1 }
 0x6e7   :  { %v19698_v10 = vand.u32 4294901760, %v19684_v5  ;;  %17223 = vmatprep.subr.mxu0 %v19676_v2 }
 0x6e8   :  { %17224 = vmatpush3.msra.mxu0 %v19676_v2 }
 0x6e9   :  { %v5305_v22 = vsub.f32 %v19684_v5, %v19698_v10  ;;  %17225 = vmatprep.subr.mxu0 %v19678_v56 }
 0x6ea   :  { %17226 = vmatpush3.msra.mxu0 %v19678_v56 }
 0x6eb   :  { %v5306_v27 = vand.u32 4294901760, %v5305_v22  ;;  %17241 = vmatprep.subr.mxu0 %v19681_v4 }
 0x6ed   :  { %17232 = vmatprep.subr.mxu1 %v5306_v27 }
 0x6ee   :  { %17233 = vmatpush3.msra.mxu1 %v5306_v27 }
 0x6ef   :  { %17234 = vmatprep.subr.mxu1 %v5313_v32 }
 0x6f0   :  { %17235 = vmatpush3.msra.mxu1 %v5313_v32 }
 0x6f1   :  { %17236 = vmatprep.subr.mxu1 %v5320_v33 }
 0x6f2   :  { %17237 = vmatpush3.msra.mxu1 %v5320_v33 }
 0x6f3   :  { %17252 = vmatprep.subr.mxu1 %v19672_v50 }
 0x76c   :  { %v5137_v55 = vpop.xlane.xlu1 %5136 }
 0x76d   :  { %v5140_v57 = vmul.f32 0.03125, %v5137_v55 }
 0x76e   :  { %v5134_v59 = vpop.xlane.xlu0 %5133 }
 0x76f   :  { %v5142_v44 = vsub.f32 %v5131_v51, %v5140_v57  ;;  %v5139_v60 = vmul.f32 0.03125, %v5134_v59  ;;  %v404_v59 = vld [vmem:[#allocation2] sm:$0xff] }
 0x771   :  { %v5141_v63 = vsub.f32 %v5130_v52, %v5139_v60  ;;  %v5144_v46 = vmul.f32 %v5142_v44, %v5142_v44  ;;  %v405_v52 = vld [vmem:[#allocation2 + $0x8] sm:$0xff] }
 0x772   :  { %v5719_v54 = vsel %vm1437_vm3, %v405_v52, 0 }
 0x773   :  { %v5148_v38 = vsel %vm1437_vm3, %v5144_v46, 0.0  ;;  %v5143_v47 = vmul.f32 %v5141_v63, %v5141_v63  ;;  %v19764_v55 = vand.u32 4294901760, %v5719_v54 }
 0x774   :  { %5149 = vadd.xlane.f32.xlu1 %v5148_v38 }
 0x775   :  { %v5145_v58 = vsel %vm1437_vm3, %v5143_v47, 0.0  ;;  %v19767_v57 = vsub.f32 %v5719_v54, %v19764_v55 }
 0x776   :  { %5146 = vadd.xlane.f32.xlu0 %v5145_v58 }
 0x777   :  { %v19773_v60 = vand.u32 4294901760, %v19767_v57 }
 0x779   :  { %v5840_v46 = vsub.f32 %v19767_v57, %v19773_v60 }
 0x77b   :  { %v19784_v47 = vand.u32 4294901760, %v5840_v46 }
 0x7fd   :  { %v5150_v35 = vpop.xlane.xlu1 %5149 }
 0x7fe   :  { %v5152_v9 = vmul.f32 0.03125, %v5150_v35 }
 0x7ff   :  { %v5147_v11 = vpop.xlane.xlu0 %5146 }
 0x800   :  { %v5154_v36 = vadd.f32 1e-05, %v5152_v9  ;;  %v5151_v15 = vmul.f32 0.03125, %v5147_v11  ;;  %v406_v9 = vld [vmem:[#allocation2 + $0x10] sm:$0xff] }
 0x802   :  { %18291 = vrsqrt.f32 %v5154_v36  ;;  %v5153_v31 = vadd.f32 1e-05, %v5151_v15 }
 0x804   :  { %18293 = vrsqrt.f32 %v5153_v31 }
 0x80f   :  { %v18292_v34 = vpop.eup %18291 }
 0x810   :  { %v5158_v20 = vmul.f32 %v18292_v34, %v5142_v44  ;;  %v5716_v44 = vsel %vm1437_vm3, %v404_v59, 0 }
 0x811   :  { %v18294_v39 = vpop.eup %18293 }
 0x812   :  { %v5157_v23 = vmul.f32 %v18294_v39, %v5141_v63  ;;  %v5166_v43 = vmul.f32 %v15944_v12, %v5158_v20  ;;  %v19775_v63 = vand.u32 4294901760, %v5716_v44 }
 0x814   :  { %v5165_v25 = vmul.f32 %v15944_v12, %v5157_v23  ;;  %v19725_v21 = vadd.f32 %v15945_v16, %v5166_v43  ;;  %v19780_v38 = vsub.f32 %v5716_v44, %v19775_v63  ;;  %v6246_v12 = vsel %vm1437_vm3, %v406_v9, 0 }
 0x816   :  { %v19727_v14 = vadd.f32 %v15945_v16, %v5165_v25  ;;  %v5179_v19 = vsel %vm1437_vm3, %v19725_v21, 0  ;;  %v19787_v58 = vand.u32 4294901760, %v19780_v38  ;;  %v19818_v25 = vand.u32 4294901760, %v6246_v12 }
 0x817   :  { %v5260_v24 = vand.u32 4294901760, %v5179_v19 }
 0x818   :  { %v5176_v28 = vsel %vm1437_vm3, %v19727_v14, 0  ;;  %v5847_v48 = vsub.f32 %v19780_v38, %v19787_v58 }
 0x819   :  { %v5250_v37 = vand.u32 4294901760, %v5176_v28  ;;  %v5261_v40 = vsub.f32 %v5179_v19, %v5260_v24 }
 0x81a   :  { %v19794_v61 = vand.u32 4294901760, %v5847_v48 }
 0x81b   :  { %17238 = vmatprep.mubr.f32.mxu1 %v5250_v37  ;;  %v5251_v29 = vsub.f32 %v5176_v28, %v5250_v37  ;;  %v5262_v41 = vand.u32 4294901760, %v5261_v40 }
 0x81c   :  { %17239 = vmatmul.mubr.f32.vlgmr.msra.gmra.mxu1 %v5260_v24 }
 0x81d   :  { %17253 = vmatpush3.msra.mxu1 %v19672_v50  ;;  %v5252_v42 = vand.u32 4294901760, %v5251_v29  ;;  %v5263_v49 = vsub.f32 %v5261_v40, %v5262_v41 }
 0x81e   :  { %17254 = vmatprep.subr.mxu1 %v19674_v1 }
 0x81f   :  { %17255 = vmatpush3.msra.mxu1 %v19674_v1  ;;  %17260 = vmatprep.mubr.f32.mxu1 %v5252_v42  ;;  %v5253_v45 = vsub.f32 %v5251_v29, %v5252_v42  ;;  %v5264_v53 = vand.u32 4294901760, %v5263_v49 }
 0x820   :  { %17256 = vmatprep.subr.mxu1 %v19676_v2 }
 0x821   :  { %17257 = vmatpush3.msra.mxu1 %v19676_v2  ;;  %v5254_v51 = vand.u32 4294901760, %v5253_v45 }
 0x822   :  { %17258 = vmatprep.subr.mxu1 %v19678_v56 }
 0x823   :  { %17259 = vmatpush3.msra.mxu1 %v19678_v56  ;;  %17227 = vmatprep.mubr.f32.mxu0 %v5254_v51 }
 0x824   :  { %17261 = vmatmul.mubr.f32.vlgmr.msra.gmra.mxu1 %v5262_v41  ;;  %17274 = vmatprep.subr.mxu1 %v19672_v50 }
 0x825   :  { %17228 = vmatmul.mubr.f32.vlgmr.msra.gmra.mxu0 %v5264_v53  ;;  %17275 = vmatpush3.msra.mxu1 %v19672_v50 }
 0x826   :  { %17242 = vmatpush3.msra.mxu0 %v19681_v4  ;;  %17282 = vmatprep.mubr.f32.mxu1 %v5250_v37 }
 0x827   :  { %17243 = vmatprep.subr.mxu0 %v19684_v5  ;;  %17249 = vmatprep.mubr.f32.mxu0 %v5251_v29 }
 0x828   :  { %17276 = vmatprep.subr.mxu1 %v19674_v1  ;;  %17244 = vmatpush3.msra.mxu0 %v19684_v5 }
 0x829   :  { %17277 = vmatpush3.msra.mxu1 %v19674_v1  ;;  %17245 = vmatprep.subr.mxu0 %v19687_v6 }
 0x82a   :  { %17278 = vmatprep.subr.mxu1 %v19676_v2  ;;  %17246 = vmatpush3.msra.mxu0 %v19687_v6 }
 0x82b   :  { %17279 = vmatpush3.msra.mxu1 %v19676_v2  ;;  %17247 = vmatprep.subr.mxu0 %v19691_v7 }
 0x82c   :  { %17280 = vmatprep.subr.mxu1 %v19678_v56  ;;  %17248 = vmatpush3.msra.mxu0 %v19691_v7 }
 0x82d   :  { %17281 = vmatpush3.msra.mxu1 %v19678_v56  ;;  %17250 = vmatmul.mubr.f32.vlgmr.msra.gmra.mxu0 %v5261_v40  ;;  %v19828_v40 = vsub.f32 %v6246_v12, %v19818_v25 }
 0x82e   :  { %17263 = vmatprep.subr.mxu0 %v19695_v8  ;;  %17283 = vmatmul.mubr.f32.vlgmr.msra.gmra.mxu1 %v5260_v24 }
 0x82f   :  { %17264 = vmatpush3.msra.mxu0 %v19695_v8  ;;  %17271 = vmatprep.mubr.f32.mxu0 %v5250_v37  ;;  %v19835_v45 = vand.u32 4294901760, %v19828_v40 }
 0x830   :  { %17265 = vmatprep.subr.mxu0 %v19698_v10  ;;  %17292 = vmatprep.subr.mxu1 %v19784_v47 }
 0x831   :  { %17266 = vmatpush3.msra.mxu0 %v19698_v10  ;;  %17293 = vmatpush3.xpose.msra.mxu1 %v19784_v47  ;;  %21230 = vst [vmem:[#allocation44_spill] sm:$0xff] %v19835_v45  ;;  %v6377_v51 = vsub.f32 %v19828_v40, %v19835_v45 }
 0x832   :  { %17267 = vmatprep.subr.mxu0 %v19701_v13  ;;  %17294 = vmatprep.subr.mxu1 %v19794_v61 }
 0x833   :  { %17268 = vmatpush3.msra.mxu0 %v19701_v13  ;;  %v19850_v53 = vand.u32 4294901760, %v6377_v51 }
 0x834   :  { %17269 = vmatprep.subr.mxu0 %v19705_v17 }
 0x835   :  { %17270 = vmatpush3.msra.mxu0 %v19705_v17  ;;  %17295 = vmatpush3.xpose.msra.mxu1 %v19794_v61  ;;  %v407_v17 = vld [vmem:[#allocation2 + $0x18] sm:$0xff] }
 0x836   :  { %17272 = vmatmul.mubr.f32.vlgmr.msra.gmra.mxu0 %v5260_v24  ;;  %17285 = vmatprep.subr.mxu0 %v19764_v55  ;;  %v6249_v30 = vsel %vm1437_vm3, %v407_v17, 0 }
 0x837   :  { %17286 = vmatpush3.xpose.msra.mxu0 %v19764_v55  ;;  %17306 = vmatprep.subr.mxu1 %v19764_v55  ;;  %v19801_v15 = vand.u32 4294901760, %v6249_v30 }
 0x838   :  { %17287 = vmatprep.subr.mxu0 %v19775_v63 }
 0x839   :  { %v19813_v16 = vsub.f32 %v6249_v30, %v19801_v15 }
 0x83b   :  { %17288 = vmatpush3.xpose.msra.mxu0 %v19775_v63  ;;  %v19825_v28 = vand.u32 4294901760, %v19813_v16 }
 0x83c   :  { %17299 = vmatprep.subr.mxu0 %v19767_v57 }
 0x83d   :  { %v6370_v42 = vsub.f32 %v19813_v16, %v19825_v28 }
 0x83f   :  { %v19840_v49 = vand.u32 4294901760, %v6370_v42 }
 0x8dc   :  { %v17240_v50 = vpop.f32.mrf.mxu1 }
 0x8de   :  { %v5357_v3 = vpop.f32.mrf.mxu1 }
 0x8e4   :  { %v17262_v4 = vpop.f32.mrf.mxu1 }
 0x8e5   :  { %v17229_v0 = vpop.f32.mrf.mxu0 }
 0x8e6   :  { %v5364_v56 = vadd.f32 %v17240_v50, %v17229_v0  ;;  %v5527_v10 = vpop.f32.mrf.mxu1 }
 0x8e7   :  { %v5256_v1 = vpop.f32.mrf.mxu0 }
 0x8e8   :  { %v5358_v6 = vadd.f32 %v5357_v3, %v5256_v1 }
 0x8ed   :  { %v17251_v2 = vpop.f32.mrf.mxu0 }
 0x8ee   :  { %v5451_v7 = vadd.f32 %v17251_v2, %v5364_v56  ;;  %v17284_v18 = vpop.f32.mrf.mxu1 }
 0x8ef   :  { %v5443_v5 = vpop.f32.mrf.mxu0 }
 0x8f0   :  { %v5444_v8 = vadd.f32 %v5443_v5, %v5358_v6  ;;  %v5536_v13 = vadd.f32 %v17262_v4, %v5451_v7  ;;  %v5699_v35 = vpop.f32.mrf.mxu1  ;;  %v333_v4 = vld [vmem:[#allocation10 + $0x8] sm:$0xff]  ;;  %v332_v6 = vld [vmem:[#allocation10] sm:$0xff] }
 0x8f2   :  { %v5528_v26 = vadd.f32 %v5527_v10, %v5444_v8 }
 0x8f6   :  { %v17273_v22 = vpop.f32.mrf.mxu0 }
 0x8f7   :  { %v5625_v62 = vadd.f32 %v17273_v22, %v5536_v13 }
 0x8f8   :  { %v5618_v27 = vpop.f32.mrf.mxu0 }
 0x8f9   :  { %v5706_v32 = vadd.f32 %v17284_v18, %v5625_v62  ;;  %v5619_v33 = vadd.f32 %v5618_v27, %v5528_v26 }
 0x8fb   :  { %v5713_v11 = vsel %vm1437_vm3, %v5706_v32, 0  ;;  %v5700_v36 = vadd.f32 %v5699_v35, %v5619_v33 }
 0x8fc   :  { %v19803_v31 = vand.u32 4294901760, %v5713_v11 }
 0x8fd   :  { %v5710_v34 = vsel %vm1437_vm3, %v5700_v36, 0 }
 0x8fe   :  { %v19808_v20 = vsub.f32 %v5713_v11, %v19803_v31  ;;  %v19810_v39 = vand.u32 4294901760, %v5710_v34 }
 0x900   :  { %v5789_v23 = vsub.f32 %v5710_v34, %v19810_v39  ;;  %17296 = vmatprep.mubr.f32.mxu1 %v19810_v39  ;;  %v5800_v43 = vand.u32 4294901760, %v19808_v20 }
 0x901   :  { %17297 = vmatmul.mubr.f32.vlgmr.msra.gmra.mxu1 %v19803_v31 }
 0x902   :  { %17307 = vmatpush3.xpose.msra.mxu1 %v19764_v55  ;;  %v5790_v19 = vand.u32 4294901760, %v5789_v23  ;;  %v5801_v24 = vsub.f32 %v19808_v20, %v5800_v43 }
 0x903   :  { %17308 = vmatprep.subr.mxu1 %v19775_v63 }
 0x904   :  { %17310 = vmatprep.mubr.f32.mxu1 %v5790_v19  ;;  %v5791_v37 = vsub.f32 %v5789_v23, %v5790_v19  ;;  %v5802_v41 = vand.u32 4294901760, %v5801_v24 }
 0x906   :  { %17309 = vmatpush3.xpose.msra.mxu1 %v19775_v63  ;;  %v5792_v29 = vand.u32 4294901760, %v5791_v37 }
 0x907   :  { %17320 = vmatprep.subr.mxu1 %v19764_v55 }
 0x908   :  { %17289 = vmatprep.mubr.f32.mxu0 %v5792_v29 }
 0x909   :  { %17311 = vmatmul.mubr.f32.vlgmr.msra.gmra.mxu1 %v5800_v43  ;;  %17290 = vmatmul.mubr.f32.vlgmr.msra.gmra.mxu0 %v5802_v41 }
 0x90a   :  { %17300 = vmatpush3.xpose.msra.mxu0 %v19767_v57  ;;  %17321 = vmatpush3.xpose.msra.mxu1 %v19764_v55 }
 0x90b   :  { %17324 = vmatprep.mubr.f32.mxu1 %v19810_v39  ;;  %17303 = vmatprep.mubr.f32.mxu0 %v5789_v23 }
 0x90c   :  { %17301 = vmatprep.subr.mxu0 %v19780_v38  ;;  %17322 = vmatprep.subr.mxu1 %v19775_v63 }
 0x90e   :  { %17302 = vmatpush3.xpose.msra.mxu0 %v19780_v38  ;;  %17323 = vmatpush3.xpose.msra.mxu1 %v19775_v63 }
 0x90f   :  { %17313 = vmatprep.subr.mxu0 %v19773_v60  ;;  %17334 = vmatprep.subr.mxu1 %v19840_v49 }
 0x911   :  { %17304 = vmatmul.mubr.f32.vlgmr.msra.gmra.mxu0 %v19808_v20  ;;  %17325 = vmatmul.mubr.f32.vlgmr.msra.gmra.mxu1 %v19803_v31 }
 0x912   :  { %17314 = vmatpush3.xpose.msra.mxu0 %v19773_v60  ;;  %17317 = vmatprep.mubr.f32.mxu0 %v19810_v39 }
 0x913   :  { %17335 = vmatpush3.xpose.msra.mxu1 %v19840_v49  ;;  %17338 = vmatprep.mubr.f32.mxu1 %v19810_v39 }
 0x914   :  { %17315 = vmatprep.subr.mxu0 %v19787_v58  ;;  %17336 = vmatprep.subr.mxu1 %v19850_v53 }
 0x916   :  { %17316 = vmatpush3.xpose.msra.mxu0 %v19787_v58 }
 0x917   :  { %17337 = vmatpush3.xpose.msra.mxu1 %v19850_v53  ;;  %17327 = vmatprep.subr.mxu0 %v19801_v15 }
 0x918   :  { %17348 = vmatprep.subr.mxu1 %v19801_v15 }
 0x919   :  { %17318 = vmatmul.mubr.f32.vlgmr.msra.gmra.mxu0 %v19803_v31 }
 0x91a   :  { %17339 = vmatmul.mubr.f32.vlgmr.msra.gmra.mxu1 %v19803_v31  ;;  %17328 = vmatpush3.xpose.msra.mxu0 %v19801_v15 }
 0x91b   :  { %17331 = vmatprep.mubr.f32.mxu0 %v5792_v29  ;;  %17349 = vmatpush3.xpose.msra.mxu1 %v19801_v15 }
 0x91c   :  { %17352 = vmatprep.mubr.f32.mxu1 %v5790_v19  ;;  %17329 = vmatprep.subr.mxu0 %v19818_v25 }
 0x91d   :  { %17350 = vmatprep.subr.mxu1 %v19818_v25 }
 0x91e   :  { %17330 = vmatpush3.xpose.msra.mxu0 %v19818_v25 }
 0x91f   :  { %17351 = vmatpush3.xpose.msra.mxu1 %v19818_v25  ;;  %17341 = vmatprep.subr.mxu0 %v19813_v16 }
 0x920   :  { %17362 = vmatprep.subr.mxu1 %v19801_v15 }
 0x921   :  { %17332 = vmatmul.mubr.f32.vlgmr.msra.gmra.mxu0 %v5802_v41 }
 0x922   :  { %17353 = vmatmul.mubr.f32.vlgmr.msra.gmra.mxu1 %v5800_v43  ;;  %17342 = vmatpush3.xpose.msra.mxu0 %v19813_v16 }
 0x923   :  { %17345 = vmatprep.mubr.f32.mxu0 %v5789_v23  ;;  %17363 = vmatpush3.xpose.msra.mxu1 %v19801_v15 }
 0x924   :  { %17366 = vmatprep.mubr.f32.mxu1 %v19810_v39  ;;  %17343 = vmatprep.subr.mxu0 %v19828_v40 }
 0x925   :  { %17364 = vmatprep.subr.mxu1 %v19818_v25 }
 0x926   :  { %17344 = vmatpush3.xpose.msra.mxu0 %v19828_v40 }
 0x927   :  { %17365 = vmatpush3.xpose.msra.mxu1 %v19818_v25  ;;  %17355 = vmatprep.subr.mxu0 %v19825_v28 }
 0x929   :  { %17346 = vmatmul.mubr.f32.vlgmr.msra.gmra.mxu0 %v19808_v20 }
 0x92a   :  { %17367 = vmatmul.mubr.f32.vlgmr.msra.gmra.mxu1 %v19803_v31  ;;  %17356 = vmatpush3.xpose.msra.mxu0 %v19825_v28 }
 0x92b   :  { %17359 = vmatprep.mubr.f32.mxu0 %v19810_v39  ;;  %17357 = vmatprep.subr.mxu0 %v19835_v45 }
 0x92e   :  { %17358 = vmatpush3.xpose.msra.mxu0 %v19835_v45 }
 0x931   :  { %17360 = vmatmul.mubr.f32.vlgmr.msra.gmra.mxu0 %v19803_v31 }
 0x9c1   :  { %v17298_v54 = vpop.f32.mrf.mxu1 }
 0x9c3   :  { %v5885_v46 = vpop.f32.mrf.mxu1 }
 0x9c9   :  { %v17291_v52 = vpop.f32.mrf.mxu0  ;;  %v17312_v48 = vpop.f32.mrf.mxu1 }
 0x9ca   :  { %v5805_v10 = vadd.f32 %v17291_v52, %v333_v4 }
 0x9cb   :  { %v5794_v59 = vpop.f32.mrf.mxu0  ;;  %v6049_v1 = vpop.f32.mrf.mxu1 }
 0x9cc   :  { %v5795_v17 = vadd.f32 %v5794_v59, %v332_v6  ;;  %v5892_v26 = vadd.f32 %v17298_v54, %v5805_v10 }
 0x9ce   :  { %v5886_v35 = vadd.f32 %v5885_v46, %v5795_v17 }
 0x9d1   :  { %v17305_v44 = vpop.f32.mrf.mxu0  ;;  %v17326_v2 = vpop.f32.mrf.mxu1 }
 0x9d2   :  { %v5975_v33 = vadd.f32 %v17305_v44, %v5892_v26 }
 0x9d3   :  { %v5967_v0 = vpop.f32.mrf.mxu0  ;;  %v6213_v5 = vpop.f32.mrf.mxu1 }
 0x9d4   :  { %v5968_v36 = vadd.f32 %v5967_v0, %v5886_v35  ;;  %v6058_v12 = vadd.f32 %v17312_v48, %v5975_v33  ;;  %v411_v35 = vld [vmem:[#allocation5 + $0x18] sm:$0xff] }
 0x9d6   :  { %v6050_v19 = vadd.f32 %v6049_v1, %v5968_v36 }
 0x9d9   :  { %v17319_v50 = vpop.f32.mrf.mxu0 }
 0x9da   :  { %v17340_v7 = vpop.f32.mrf.mxu1  ;;  %v6141_v43 = vadd.f32 %v17319_v50, %v6058_v12 }
 0x9db   :  { %v6134_v3 = vpop.f32.mrf.mxu0 }
 0x9dc   :  { %v6415_v22 = vpop.f32.mrf.mxu1  ;;  %v6135_v41 = vadd.f32 %v6134_v3, %v6050_v19  ;;  %v6220_v44 = vadd.f32 %v17326_v2, %v6141_v43 }
 0x9de   :  { %v6214_v48 = vadd.f32 %v6213_v5, %v6135_v41  ;;  %v6226_v0 = vsel %vm926_vm2, %v6220_v44, -inf }
 0x9e0   :  { %v6223_v50 = vsel %vm926_vm2, %v6214_v48, -inf }
 0x9e1   :  { %v17333_v56 = vpop.f32.mrf.mxu0 }
 0x9e2   :  { %v6335_v13 = vadd.f32 %v17333_v56, %v333_v4  ;;  %v17354_v30 = vpop.f32.mrf.mxu1 }
 0x9e3   :  { %v6324_v8 = vpop.f32.mrf.mxu0 }
 0x9e4   :  { %v6325_v18 = vadd.f32 %v6324_v8, %v332_v6  ;;  %v6422_v27 = vadd.f32 %v17340_v7, %v6335_v13  ;;  %v6579_v34 = vpop.f32.mrf.mxu1 }
 0x9e6   :  { %v6416_v11 = vadd.f32 %v6415_v22, %v6325_v18 }
 0x9e9   :  { %v17347_v62 = vpop.f32.mrf.mxu0 }
 0x9ea   :  { %v6505_v9 = vadd.f32 %v17347_v62, %v6422_v27  ;;  %v17368_v39 = vpop.f32.mrf.mxu1 }
 0x9eb   :  { %v6497_v32 = vpop.f32.mrf.mxu0 }
 0x9ec   :  { %v6498_v31 = vadd.f32 %v6497_v32, %v6416_v11  ;;  %v6588_v20 = vadd.f32 %v17354_v30, %v6505_v9  ;;  %v6743_v52 = vpop.f32.mrf.mxu1  ;;  %v410_v9 = vld [vmem:[#allocation5 + $0x10] sm:$0xff]  ;;  %v19900_v11 = vand.u32 4294901760, %v411_v35 }
 0x9ed   :  { %v19902_v36 = vand.u32 4294901760, %v410_v9 }
 0x9ee   :  { %v6580_v37 = vadd.f32 %v6579_v34, %v6498_v31  ;;  %21231 = vst [vmem:[#allocation45_spill] sm:$0xff] %v19900_v11  ;;  %v19905_v31 = vsub.f32 %v411_v35, %v19900_v11  ;;  %17369 = vmatprep.subr.mxu0 %v19900_v11 }
 0x9ef   :  { %21232 = vst [vmem:[#allocation46_spill] sm:$0xff] %v19902_v36  ;;  %v19908_v34 = vsub.f32 %v410_v9, %v19902_v36  ;;  %17370 = vmatpush3.msra.mxu0 %v19900_v11 }
 0x9f0   :  { %21233 = vst [vmem:[#allocation47_spill] sm:$0xff] %v19905_v31  ;;  %v19913_v12 = vand.u32 4294901760, %v19905_v31  ;;  %17371 = vmatprep.subr.mxu0 %v19902_v36 }
 0x9f1   :  { %v17361_v23 = vpop.f32.mrf.mxu0  ;;  %21234 = vst [vmem:[#allocation48_spill] sm:$0xff] %v19908_v34  ;;  %17372 = vmatpush3.msra.mxu0 %v19902_v36 }
 0x9f2   :  { %v6671_v24 = vadd.f32 %v17361_v23, %v6588_v20  ;;  %21235 = vst [vmem:[#allocation49_spill] sm:$0xff] %v19913_v12  ;;  %v19916_v20 = vand.u32 4294901760, %v19908_v34  ;;  %17383 = vmatprep.subr.mxu0 %v19905_v31 }
 0x9f3   :  { %v6664_v29 = vpop.f32.mrf.mxu0 }
 0x9f4   :  { %v6665_v42 = vadd.f32 %v6664_v29, %v6580_v37  ;;  %v6750_v51 = vadd.f32 %v17368_v39, %v6671_v24  ;;  %21236 = vst [vmem:[#allocation50_spill] sm:$0xff] %v19916_v20  ;;  %v6900_v39 = vsub.f32 %v19905_v31, %v19913_v12  ;;  %v6907_v23 = vsub.f32 %v19908_v34, %v19916_v20 }
 0x9f6   :  { %v6756_v54 = vsel %vm926_vm2, %v6750_v51, -inf  ;;  %v6744_v59 = vadd.f32 %v6743_v52, %v6665_v42  ;;  %v19925_v43 = vand.u32 4294901760, %v6900_v39  ;;  %v19927_v19 = vand.u32 4294901760, %v6907_v23  ;;  %v409_v42 = vld [vmem:[#allocation5 + $0x8] sm:$0xff]  ;;  %v408_v52 = vld [vmem:[#allocation5] sm:$0xff] }
 0x9f7   :  { %6757 = vmax.xlane.f32.xlu1 %v6756_v54 }
 0x9f8   :  { %v6753_v46 = vsel %vm926_vm2, %v6744_v59, -inf  ;;  %21237 = vst [vmem:[#allocation51_spill] sm:$0xff] %v19927_v19  ;;  %17376 = vmatprep.subr.mxu1 %v19925_v43 }
 0x9f9   :  { %6754 = vmax.xlane.f32.xlu0 %v6753_v46  ;;  %17377 = vmatpush3.msra.mxu1 %v19925_v43 }
 0x9fa   :  { %17378 = vmatprep.subr.mxu1 %v19927_v19 }
 0x9fb   :  { %6227 = vmax.xlane.f32.xlu1 %v6226_v0  ;;  %17379 = vmatpush3.msra.mxu1 %v19927_v19 }
 0x9fc   :  { %17390 = vmatprep.subr.mxu1 %v19900_v11 }
 0x9fd   :  { %6224 = vmax.xlane.f32.xlu0 %v6223_v50 }
 0xa80   :  { %v6758_v1 = vpop.xlane.xlu1 %6757 }
 0xa81   :  { %v6760_v3 = vsub.f32 %v6750_v51, %v6758_v1  ;;  %v19934_v51 = vand.u32 4294901760, %v409_v42 }
 0xa82   :  { %v6755_v56 = vpop.xlane.xlu0 %6754 }
 0xa83   :  { %v6763_v4 = vmul.f32 1.442695, %v6760_v3  ;;  %v6759_v6 = vsub.f32 %v6744_v59, %v6755_v56  ;;  %21238 = vst [vmem:[#allocation52_spill] sm:$0xff] %v19934_v51 }
 0xa84   :  { %v6228_v7 = vpop.xlane.xlu1 %6227 }
 0xa85   :  { %18295 = vpow2.f32 %v6763_v4  ;;  %v6761_v8 = vmul.f32 1.442695, %v6759_v6  ;;  %v6230_v2 = vsub.f32 %v6220_v44, %v6228_v7  ;;  %v19936_v44 = vand.u32 4294901760, %v408_v52 }
 0xa86   :  { %v6225_v10 = vpop.xlane.xlu0 %6224 }
 0xa87   :  { %18297 = vpow2.f32 %v6761_v8  ;;  %v6233_v13 = vmul.f32 1.442695, %v6230_v2  ;;  %v6229_v5 = vsub.f32 %v6214_v48, %v6225_v10  ;;  %21239 = vst [vmem:[#allocation53_spill] sm:$0xff] %v19936_v44  ;;  %v19939_v48 = vsub.f32 %v409_v42, %v19934_v51 }
 0xa88   :  { %v19946_v56 = vsub.f32 %v408_v52, %v19936_v44 }
 0xa89   :  { %18299 = vpow2.f32 %v6233_v13  ;;  %v6231_v17 = vmul.f32 1.442695, %v6229_v5  ;;  %21240 = vst [vmem:[#allocation54_spill] sm:$0xff] %v19939_v48  ;;  %v19950_v8 = vand.u32 4294901760, %v19939_v48 }
 0xa8a   :  { %21241 = vst [vmem:[#allocation55_spill] sm:$0xff] %v19946_v56 }
 0xa8b   :  { %18301 = vpow2.f32 %v6231_v17  ;;  %21242 = vst [vmem:[#allocation56_spill] sm:$0xff] %v19950_v8  ;;  %v19954_v17 = vand.u32 4294901760, %v19946_v56 }
 0xa8d   :  { %21243 = vst [vmem:[#allocation57_spill] sm:$0xff] %v19954_v17  ;;  %v7415_v35 = vsub.f32 %v19946_v56, %v19954_v17 }
 0xa92   :  { %v18296_v18 = vpop.eup %18295 }
 0xa93   :  { %v6768_v22 = vsel %vm926_vm2, %v18296_v18, 0.0 }
 0xa94   :  { %v18298_v62 = vpop.eup %18297  ;;  %6769 = vadd.xlane.f32.xlu1 %v6768_v22  ;;  %v7408_v22 = vsub.f32 %v19939_v48, %v19950_v8 }
 0xa95   :  { %v6765_v26 = vsel %vm926_vm2, %v18298_v62, 0.0 }
 0xa96   :  { %v19895_v27 = vpop.eup %18299  ;;  %6766 = vadd.xlane.f32.xlu0 %v6765_v26 }
 0xa97   :  { %v6238_v30 = vsel %vm926_vm2, %v19895_v27, 0.0 }
 0xa98   :  { %v18302_v32 = vpop.eup %18301  ;;  %6239 = vadd.xlane.f32.xlu1 %v6238_v30 }
 0xa99   :  { %v6235_v33 = vsel %vm926_vm2, %v18302_v32, 0.0 }
 0xa9a   :  { %6236 = vadd.xlane.f32.xlu0 %v6235_v33 }
 0xb1d   :  { %v6770_v24 = vpop.xlane.xlu1 %6769 }
 0xb1e   :  { %18303 = vrcp.f32 %v6770_v24  ;;  %v19975_v24 = vand.u32 4294901760, %v7415_v35 }
 0xb1f   :  { %v6767_v37 = vpop.xlane.xlu0 %6766 }
 0xb20   :  { %18305 = vrcp.f32 %v6767_v37  ;;  %21245 = vst [vmem:[#allocation59_spill] sm:$0xff] %v19975_v24 }
 0xb21   :  { %v6240_v29 = vpop.xlane.xlu1 %6239 }
 0xb23   :  { %v6237_v41 = vpop.xlane.xlu0 %6236 }
 0xb24   :  { %18307 = vrcp.f32 %v6237_v41 }
 0xb25   :  { %18309 = vrcp.f32 %v6240_v29 }
 0xb2b   :  { %v18304_v54 = vpop.eup %18303 }
 0xb2c   :  { %v6774_v59 = vmul.f32 %v18304_v54, %v18296_v18 }
 0xb2d   :  { %v18306_v46 = vpop.eup %18305 }
 0xb2e   :  { %v6772_v0 = vmul.f32 %v18306_v46, %v18298_v62  ;;  %v6779_v50 = vsel %vm926_vm2, %v6774_v59, 0 }
 0xb2f   :  { %v19942_v1 = vand.u32 4294901760, %v6779_v50 }
 0xb30   :  { %v6776_v3 = vsel %vm926_vm2, %v6772_v0, 0 }
 0xb31   :  { %v18308_v4 = vpop.eup %18307  ;;  %v6848_v6 = vand.u32 4294901760, %v6776_v3  ;;  %v6859_v7 = vsub.f32 %v6779_v50, %v19942_v1 }
 0xb32   :  { %v18310_v2 = vpop.eup %18309  ;;  %v6242_v10 = vmul.f32 %v18308_v4, %v18302_v32 }
 0xb33   :  { %17380 = vmatprep.mubr.f32.mxu1 %v6848_v6  ;;  %v6849_v13 = vsub.f32 %v6776_v3, %v6848_v6  ;;  %v6860_v5 = vand.u32 4294901760, %v6859_v7  ;;  %v6244_v26 = vmul.f32 %v18310_v2, %v19895_v27  ;;  %v19969_v27 = vand.u32 4294901760, %v7408_v22 }
 0xb34   :  { %17381 = vmatmul.mubr.f32.vlgmr.msra.gmra.mxu1 %v19942_v1  ;;  %v7284_v62 = vsel %vm926_vm2, %v6242_v10, 0 }
 0xb35   :  { %17391 = vmatpush3.msra.mxu1 %v19900_v11  ;;  %v6850_v18 = vand.u32 4294901760, %v6849_v13  ;;  %v6861_v30 = vsub.f32 %v6859_v7, %v6860_v5  ;;  %v19964_v33 = vand.u32 4294901760, %v7284_v62  ;;  %21244 = vst [vmem:[#allocation58_spill] sm:$0xff] %v19969_v27  ;;  %v7287_v39 = vsel %vm926_vm2, %v6244_v26, 0 }
 0xb36   :  { %17392 = vmatprep.subr.mxu1 %v19902_v36  ;;  %v7366_v37 = vand.u32 4294901760, %v7287_v39 }
 0xb37   :  { %17393 = vmatpush3.msra.mxu1 %v19902_v36  ;;  %17394 = vmatprep.mubr.f32.mxu1 %v6850_v18  ;;  %v6851_v32 = vsub.f32 %v6849_v13, %v6850_v18  ;;  %v6862_v23 = vand.u32 4294901760, %v6861_v30  ;;  %v7357_v29 = vsub.f32 %v7284_v62, %v19964_v33 }
 0xb38   :  { %17395 = vmatmul.mubr.f32.vlgmr.msra.gmra.mxu1 %v6860_v5  ;;  %17404 = vmatprep.subr.mxu1 %v19900_v11  ;;  %v7367_v41 = vsub.f32 %v7287_v39, %v7366_v37 }
 0xb39   :  { %17405 = vmatpush3.msra.mxu1 %v19900_v11  ;;  %17408 = vmatprep.mubr.f32.mxu1 %v6848_v6  ;;  %v6852_v9 = vand.u32 4294901760, %v6851_v32  ;;  %v7358_v42 = vand.u32 4294901760, %v7357_v29 }
 0xb3a   :  { %17406 = vmatprep.subr.mxu1 %v19902_v36  ;;  %v7368_v52 = vand.u32 4294901760, %v7367_v41 }
 0xb3b   :  { %17373 = vmatprep.mubr.f32.mxu0 %v6852_v9  ;;  %17407 = vmatpush3.msra.mxu1 %v19902_v36  ;;  %v7359_v54 = vsub.f32 %v7357_v29, %v7358_v42 }
 0xb3c   :  { %17374 = vmatmul.mubr.f32.vlgmr.msra.gmra.mxu0 %v6862_v23  ;;  %17409 = vmatmul.mubr.f32.vlgmr.msra.gmra.mxu1 %v19942_v1  ;;  %v7369_v46 = vsub.f32 %v7367_v41, %v7368_v52 }
 0xb3d   :  { %17384 = vmatpush3.msra.mxu0 %v19905_v31  ;;  %17418 = vmatprep.subr.mxu1 %v19969_v27  ;;  %v7360_v59 = vand.u32 4294901760, %v7359_v54 }
 0xb3e   :  { %17385 = vmatprep.subr.mxu0 %v19908_v34  ;;  %17387 = vmatprep.mubr.f32.mxu0 %v6849_v13  ;;  %v7370_v0 = vand.u32 4294901760, %v7369_v46 }
 0xb3f   :  { %17419 = vmatpush3.msra.mxu1 %v19969_v27  ;;  %17422 = vmatprep.mubr.f32.mxu1 %v19964_v33 }
 0xb40   :  { %17386 = vmatpush3.msra.mxu0 %v19908_v34  ;;  %17420 = vmatprep.subr.mxu1 %v19975_v24 }
 0xb41   :  { %17397 = vmatprep.subr.mxu0 %v19913_v12  ;;  %17421 = vmatpush3.msra.mxu1 %v19975_v24 }
 0xb42   :  { %17388 = vmatmul.mubr.f32.vlgmr.msra.gmra.mxu0 %v6859_v7  ;;  %17423 = vmatmul.mubr.f32.vlgmr.msra.gmra.mxu1 %v7366_v37 }
 0xb43   :  { %17398 = vmatpush3.msra.mxu0 %v19913_v12  ;;  %17432 = vmatprep.subr.mxu1 %v19934_v51 }
 0xb44   :  { %17399 = vmatprep.subr.mxu0 %v19916_v20  ;;  %17401 = vmatprep.mubr.f32.mxu0 %v6848_v6 }
 0xb45   :  { %17433 = vmatpush3.msra.mxu1 %v19934_v51  ;;  %17436 = vmatprep.mubr.f32.mxu1 %v7358_v42 }
 0xb46   :  { %17400 = vmatpush3.msra.mxu0 %v19916_v20  ;;  %17434 = vmatprep.subr.mxu1 %v19936_v44 }
 0xb47   :  { %17411 = vmatprep.subr.mxu0 %v19934_v51  ;;  %17435 = vmatpush3.msra.mxu1 %v19936_v44 }
 0xb48   :  { %17402 = vmatmul.mubr.f32.vlgmr.msra.gmra.mxu0 %v19942_v1  ;;  %17437 = vmatmul.mubr.f32.vlgmr.msra.gmra.mxu1 %v7368_v52 }
 0xb49   :  { %17412 = vmatpush3.msra.mxu0 %v19934_v51  ;;  %17446 = vmatprep.subr.mxu1 %v19934_v51 }
 0xb4a   :  { %17413 = vmatprep.subr.mxu0 %v19936_v44  ;;  %17415 = vmatprep.mubr.f32.mxu0 %v7360_v59 }
 0xb4b   :  { %17447 = vmatpush3.msra.mxu1 %v19934_v51  ;;  %17450 = vmatprep.mubr.f32.mxu1 %v19964_v33 }
 0xb4c   :  { %17414 = vmatpush3.msra.mxu0 %v19936_v44  ;;  %17448 = vmatprep.subr.mxu1 %v19936_v44 }
 0xb4d   :  { %17425 = vmatprep.subr.mxu0 %v19939_v48  ;;  %17449 = vmatpush3.msra.mxu1 %v19936_v44 }
 0xb4e   :  { %17416 = vmatmul.mubr.f32.vlgmr.msra.gmra.mxu0 %v7370_v0  ;;  %17451 = vmatmul.mubr.f32.vlgmr.msra.gmra.mxu1 %v7366_v37 }
 0xb4f   :  { %17426 = vmatpush3.msra.mxu0 %v19939_v48  ;;  %17429 = vmatprep.mubr.f32.mxu0 %v7357_v29 }
 0xb50   :  { %17427 = vmatprep.subr.mxu0 %v19946_v56 }
 0xb51   :  { %17428 = vmatpush3.msra.mxu0 %v19946_v56 }
 0xb52   :  { %17439 = vmatprep.subr.mxu0 %v19950_v8  ;;  %17430 = vmatmul.mubr.f32.vlgmr.msra.gmra.mxu0 %v7367_v41 }
 0xb53   :  { %17440 = vmatpush3.msra.mxu0 %v19950_v8  ;;  %17443 = vmatprep.mubr.f32.mxu0 %v19964_v33 }
 0xb54   :  { %17441 = vmatprep.subr.mxu0 %v19954_v17 }
 0xb55   :  { %17442 = vmatpush3.msra.mxu0 %v19954_v17 }
 0xb56   :  { %17444 = vmatmul.mubr.f32.vlgmr.msra.gmra.mxu0 %v7366_v37 }
 0xbf4   :  { %v17382_v50 = vpop.f32.mrf.mxu1 }
 0xbf6   :  { %v6945_v1 = vpop.f32.mrf.mxu1 }
 0xbf8   :  { %v17396_v3 = vpop.f32.mrf.mxu1 }
 0xbfa   :  { %v7109_v4 = vpop.f32.mrf.mxu1 }
 0xbfc   :  { %v17375_v6 = vpop.f32.mrf.mxu0  ;;  %v17410_v7 = vpop.f32.mrf.mxu1 }
 0xbfd   :  { %v6952_v10 = vadd.f32 %v17382_v50, %v17375_v6 }
 0xbfe   :  { %v6854_v2 = vpop.f32.mrf.mxu0  ;;  %v7273_v13 = vpop.f32.mrf.mxu1 }
 0xbff   :  { %v6946_v18 = vadd.f32 %v6945_v1, %v6854_v2 }
 0xc02   :  { %v17389_v5 = vpop.f32.mrf.mxu0  ;;  %v17424_v32 = vpop.f32.mrf.mxu1 }
 0xc03   :  { %v7035_v22 = vadd.f32 %v17389_v5, %v6952_v10 }
 0xc04   :  { %v7027_v62 = vpop.f32.mrf.mxu0  ;;  %v7453_v39 = vpop.f32.mrf.mxu1 }
 0xc05   :  { %v7028_v26 = vadd.f32 %v7027_v62, %v6946_v18  ;;  %v7118_v30 = vadd.f32 %v17396_v3, %v7035_v22 }
 0xc07   :  { %v7110_v33 = vadd.f32 %v7109_v4, %v7028_v26 }
 0xc08   :  { %v17403_v35 = vpop.f32.mrf.mxu0  ;;  %v17438_v42 = vpop.f32.mrf.mxu1 }
 0xc09   :  { %v7201_v9 = vadd.f32 %v17403_v35, %v7118_v30 }
 0xc0a   :  { %v7194_v23 = vpop.f32.mrf.mxu0  ;;  %v7617_v50 = vpop.f32.mrf.mxu1 }
 0xc0b   :  { %v7195_v37 = vadd.f32 %v7194_v23, %v7110_v33  ;;  %v7280_v29 = vadd.f32 %v17410_v7, %v7201_v9 }
 0xc0d   :  { %v7274_v41 = vadd.f32 %v7273_v13, %v7195_v37 }
 0xc0e   :  { %v17417_v52 = vpop.f32.mrf.mxu0  ;;  %v17452_v5 = vpop.f32.mrf.mxu1 }
 0xc0f   :  { %v7373_v54 = vadd.f32 %v17417_v52, %v7280_v29 }
 0xc10   :  { %v7362_v59 = vpop.f32.mrf.mxu0  ;;  %v7781_v30 = vpop.f32.mrf.mxu1 }
 0xc11   :  { %v7363_v46 = vadd.f32 %v7362_v59, %v7274_v41  ;;  %v7460_v0 = vadd.f32 %v17424_v32, %v7373_v54 }
 0xc12   :  { %v17431_v1 = vpop.f32.mrf.mxu0 }
 0xc13   :  { %v7543_v6 = vadd.f32 %v17431_v1, %v7460_v0  ;;  %v7454_v2 = vadd.f32 %v7453_v39, %v7363_v46  ;;  %v345_v0 = vld [vmem:[%s21156_s12 + $0x10] sm:$0xff] }
 0xc14   :  { %v7535_v3 = vpop.f32.mrf.mxu0 }
 0xc15   :  { %v7536_v10 = vadd.f32 %v7535_v3, %v7454_v2  ;;  %v7626_v4 = vadd.f32 %v17438_v42, %v7543_v6  ;;  %v20030_v6 = vand.u32 4294901760, %v345_v0  ;;  %v343_v3 = vld [vmem:[%s21156_s12] sm:$0xff] }
 0xc16   :  { %v17445_v18 = vpop.f32.mrf.mxu0 }
 0xc17   :  { %v7709_v22 = vadd.f32 %v17445_v18, %v7626_v4  ;;  %v7618_v62 = vadd.f32 %v7617_v50, %v7536_v10  ;;  %v344_v50 = vld [vmem:[%s21156_s12 + $0x8] sm:$0xff]  ;;  %v20037_v10 = vand.u32 4294901760, %v343_v3 }
 0xc18   :  { %v7702_v26 = vpop.f32.mrf.mxu0  ;;  %v20032_v2 = vand.u32 4294901760, %v344_v50 }
 0xc19   :  { %v7788_v7 = vadd.f32 %v17452_v5, %v7709_v22  ;;  %v7703_v13 = vadd.f32 %v7702_v26, %v7618_v62  ;;  %v20043_v5 = vsub.f32 %v345_v0, %v20030_v6  ;;  %v20050_v22 = vsub.f32 %v343_v3, %v20037_v10  ;;  %v15946_v0 = vld [vmem:[%s21163_s19] ss:$0 sm:$0xff] }
 0xc1a   :  { %v20046_v18 = vsub.f32 %v344_v50, %v20032_v2 }
 0xc1b   :  { %v7782_v33 = vadd.f32 %v7781_v30, %v7703_v13  ;;  %v7792_v35 = vadd.f32 %v7788_v7, %v19725_v21  ;;  %v20057_v26 = vand.u32 4294901760, %v20043_v5  ;;  %v20064_v13 = vand.u32 4294901760, %v20050_v22 }
 0xc1c   :  { %v20060_v7 = vand.u32 4294901760, %v20046_v18 }
 0xc1d   :  { %v7796_v32 = vsel %vm1437_vm3, %v7792_v35, 0.0  ;;  %v7791_v9 = vadd.f32 %v7782_v33, %v19727_v14  ;;  %v346_v14 = vld [vmem:[%s21156_s12 + $0x18] sm:$0xff]  ;;  %v7971_v33 = vsub.f32 %v20043_v5, %v20057_v26 }
 0xc1e   :  { %7797 = vadd.xlane.f32.xlu1 %v7796_v32  ;;  %v20028_v1 = vand.u32 4294901760, %v346_v14 }
 0xc1f   :  { %v7793_v39 = vsel %vm1437_vm3, %v7791_v9, 0.0 }
 0xc20   :  { %7794 = vadd.xlane.f32.xlu0 %v7793_v39  ;;  %v20040_v4 = vsub.f32 %v346_v14, %v20028_v1  ;;  %17453 = vmatprep.subr.mxu0 %v20028_v1  ;;  %v7985_v39 = vsub.f32 %v20050_v22, %v20064_v13 }
 0xc21   :  { %17454 = vmatpush3.msra.mxu0 %v20028_v1 }
 0xc22   :  { %v20054_v62 = vand.u32 4294901760, %v20040_v4  ;;  %17455 = vmatprep.subr.mxu0 %v20030_v6 }
 0xc23   :  { %17456 = vmatpush3.msra.mxu0 %v20030_v6 }
 0xc24   :  { %v7964_v30 = vsub.f32 %v20040_v4, %v20054_v62  ;;  %17457 = vmatprep.subr.mxu0 %v20032_v2 }
 0xc25   :  { %17458 = vmatpush3.msra.mxu0 %v20032_v2 }
 0xc26   :  { %v7965_v32 = vand.u32 4294901760, %v7964_v30  ;;  %17459 = vmatprep.subr.mxu0 %v20037_v10  ;;  %v15947_v30 = vld [vmem:[%s21162_s18] ss:$0 sm:$0xff] }
 0xc27   :  { %17460 = vmatpush3.msra.mxu0 %v20037_v10 }
 0xc28   :  { %17464 = vmatprep.subr.mxu1 %v7965_v32  ;;  %17475 = vmatprep.subr.mxu0 %v20040_v4 }
 0xc29   :  { %17465 = vmatpush3.msra.mxu1 %v7965_v32 }
 0xca7   :  { %v7798_v23 = vpop.xlane.xlu1 %7797 }
 0xca8   :  { %v7800_v37 = vmul.f32 0.03125, %v7798_v23 }
 0xca9   :  { %v7795_v29 = vpop.xlane.xlu0 %7794 }
 0xcaa   :  { %v7802_v41 = vsub.f32 %v7792_v35, %v7800_v37  ;;  %v7799_v42 = vmul.f32 0.03125, %v7795_v29  ;;  %v7978_v35 = vsub.f32 %v20046_v18, %v20060_v7  ;;  %v7986_v37 = vand.u32 4294901760, %v7985_v39 }
 0xcac   :  { %v7801_v52 = vsub.f32 %v7791_v9, %v7799_v42  ;;  %v7804_v54 = vmul.f32 %v7802_v41, %v7802_v41  ;;  %v7972_v9 = vand.u32 4294901760, %v7971_v33  ;;  %v7979_v23 = vand.u32 4294901760, %v7978_v35 }
 0xcae   :  { %v7808_v59 = vsel %vm1437_vm3, %v7804_v54, 0.0  ;;  %v7803_v46 = vmul.f32 %v7801_v52, %v7801_v52  ;;  %17466 = vmatprep.subr.mxu1 %v7972_v9 }
 0xcaf   :  { %7809 = vadd.xlane.f32.xlu1 %v7808_v59  ;;  %17467 = vmatpush3.msra.mxu1 %v7972_v9 }
 0xcb0   :  { %v7805_v21 = vsel %vm1437_vm3, %v7803_v46, 0.0  ;;  %17468 = vmatprep.subr.mxu1 %v7979_v23 }
 0xcb1   :  { %7806 = vadd.xlane.f32.xlu0 %v7805_v21  ;;  %17469 = vmatpush3.msra.mxu1 %v7979_v23 }
 0xcb2   :  { %17470 = vmatprep.subr.mxu1 %v7986_v37 }
 0xcb3   :  { %17471 = vmatpush3.msra.mxu1 %v7986_v37 }
 0xcb4   :  { %17486 = vmatprep.subr.mxu1 %v20028_v1 }
 0xd38   :  { %v7810_v29 = vpop.xlane.xlu1 %7809 }
 0xd39   :  { %v7812_v42 = vmul.f32 0.03125, %v7810_v29 }
 0xd3a   :  { %v7807_v54 = vpop.xlane.xlu0 %7806 }
 0xd3b   :  { %v7814_v59 = vadd.f32 1e-05, %v7812_v42  ;;  %v7811_v46 = vmul.f32 0.03125, %v7807_v54 }
 0xd3d   :  { %18311 = vrsqrt.f32 %v7814_v59  ;;  %v7813_v21 = vadd.f32 1e-05, %v7811_v46 }
 0xd3f   :  { %18313 = vrsqrt.f32 %v7813_v21 }
 0xd4a   :  { %v18312_v14 = vpop.eup %18311 }
 0xd4b   :  { %v7818_v50 = vmul.f32 %v18312_v14, %v7802_v41 }
 0xd4c   :  { %v18314_v3 = vpop.eup %18313 }
 0xd4d   :  { %v7817_v33 = vmul.f32 %v18314_v3, %v7801_v52  ;;  %v7826_v35 = vmul.f32 %v15946_v0, %v7818_v50 }
 0xd4f   :  { %v7825_v32 = vmul.f32 %v15946_v0, %v7817_v33  ;;  %v20087_v9 = vadd.f32 %v15947_v30, %v7826_v35 }
 0xd51   :  { %v20089_v39 = vadd.f32 %v15947_v30, %v7825_v32  ;;  %v7845_v23 = vsel %vm1437_vm3, %v20087_v9, 0 }
 0xd52   :  { %v7926_v37 = vand.u32 4294901760, %v7845_v23 }
 0xd53   :  { %v7842_v29 = vsel %vm1437_vm3, %v20089_v39, 0 }
 0xd54   :  { %v7916_v41 = vand.u32 4294901760, %v7842_v29  ;;  %v7927_v42 = vsub.f32 %v7845_v23, %v7926_v37 }
 0xd56   :  { %17472 = vmatprep.mubr.f32.mxu1 %v7916_v41  ;;  %v7917_v54 = vsub.f32 %v7842_v29, %v7916_v41  ;;  %v7928_v59 = vand.u32 4294901760, %v7927_v42 }
 0xd57   :  { %17473 = vmatmul.mubr.f32.vlgmr.msra.gmra.mxu1 %v7926_v37 }
 0xd58   :  { %17487 = vmatpush3.msra.mxu1 %v20028_v1  ;;  %v7918_v52 = vand.u32 4294901760, %v7917_v54  ;;  %v7929_v21 = vsub.f32 %v7927_v42, %v7928_v59 }
 0xd59   :  { %17488 = vmatprep.subr.mxu1 %v20030_v6 }
 0xd5a   :  { %17489 = vmatpush3.msra.mxu1 %v20030_v6  ;;  %17494 = vmatprep.mubr.f32.mxu1 %v7918_v52  ;;  %v7919_v46 = vsub.f32 %v7917_v54, %v7918_v52  ;;  %v7930_v0 = vand.u32 4294901760, %v7929_v21 }
 0xd5b   :  { %17490 = vmatprep.subr.mxu1 %v20032_v2 }
 0xd5c   :  { %17491 = vmatpush3.msra.mxu1 %v20032_v2  ;;  %v7920_v14 = vand.u32 4294901760, %v7919_v46 }
 0xd5d   :  { %17492 = vmatprep.subr.mxu1 %v20037_v10 }
 0xd5e   :  { %17493 = vmatpush3.msra.mxu1 %v20037_v10  ;;  %17461 = vmatprep.mubr.f32.mxu0 %v7920_v14 }
 0xd5f   :  { %17495 = vmatmul.mubr.f32.vlgmr.msra.gmra.mxu1 %v7928_v59  ;;  %17508 = vmatprep.subr.mxu1 %v20028_v1 }
 0xd60   :  { %17462 = vmatmul.mubr.f32.vlgmr.msra.gmra.mxu0 %v7930_v0  ;;  %17509 = vmatpush3.msra.mxu1 %v20028_v1 }
 0xd61   :  { %17476 = vmatpush3.msra.mxu0 %v20040_v4  ;;  %17516 = vmatprep.mubr.f32.mxu1 %v7916_v41 }
 0xd62   :  { %17477 = vmatprep.subr.mxu0 %v20043_v5  ;;  %17483 = vmatprep.mubr.f32.mxu0 %v7917_v54 }
 0xd63   :  { %17510 = vmatprep.subr.mxu1 %v20030_v6  ;;  %17478 = vmatpush3.msra.mxu0 %v20043_v5 }
 0xd64   :  { %17511 = vmatpush3.msra.mxu1 %v20030_v6  ;;  %17479 = vmatprep.subr.mxu0 %v20046_v18  ;;  %v15948_v6 = vld [vmem:[#allocation19] ss:$0 sm:$0xff] }
 0xd65   :  { %17512 = vmatprep.subr.mxu1 %v20032_v2  ;;  %17480 = vmatpush3.msra.mxu0 %v20046_v18 }
 0xd66   :  { %17513 = vmatpush3.msra.mxu1 %v20032_v2  ;;  %17481 = vmatprep.subr.mxu0 %v20050_v22 }
 0xd67   :  { %17514 = vmatprep.subr.mxu1 %v20037_v10  ;;  %17482 = vmatpush3.msra.mxu0 %v20050_v22 }
 0xd68   :  { %17515 = vmatpush3.msra.mxu1 %v20037_v10  ;;  %17484 = vmatmul.mubr.f32.vlgmr.msra.gmra.mxu0 %v7927_v42 }
 0xd69   :  { %17497 = vmatprep.subr.mxu0 %v20054_v62  ;;  %17517 = vmatmul.mubr.f32.vlgmr.msra.gmra.mxu1 %v7926_v37 }
 0xd6a   :  { %17498 = vmatpush3.msra.mxu0 %v20054_v62  ;;  %17505 = vmatprep.mubr.f32.mxu0 %v7916_v41 }
 0xd6b   :  { %17499 = vmatprep.subr.mxu0 %v20057_v26 }
 0xd6c   :  { %17500 = vmatpush3.msra.mxu0 %v20057_v26 }
 0xd6d   :  { %17501 = vmatprep.subr.mxu0 %v20060_v7 }
 0xd6e   :  { %17502 = vmatpush3.msra.mxu0 %v20060_v7 }
 0xd6f   :  { %17503 = vmatprep.subr.mxu0 %v20064_v13 }
 0xd70   :  { %17504 = vmatpush3.msra.mxu0 %v20064_v13 }
 0xd71   :  { %17506 = vmatmul.mubr.f32.vlgmr.msra.gmra.mxu0 %v7926_v37 }
 0xe17   :  { %v17474_v2 = vpop.f32.mrf.mxu1 }
 0xe19   :  { %v8023_v22 = vpop.f32.mrf.mxu1 }
 0xe1f   :  { %v17496_v50 = vpop.f32.mrf.mxu1 }
 0xe20   :  { %v17463_v1 = vpop.f32.mrf.mxu0 }
 0xe21   :  { %v7933_v4 = vadd.f32 %v17463_v1, %v15948_v6  ;;  %v8193_v7 = vpop.f32.mrf.mxu1 }
 0xe22   :  { %v7922_v10 = vpop.f32.mrf.mxu0 }
 0xe23   :  { %v7923_v5 = vadd.f32 %v15948_v6, %v7922_v10  ;;  %v8030_v62 = vadd.f32 %v17474_v2, %v7933_v4 }
 0xe25   :  { %v8024_v30 = vadd.f32 %v8023_v22, %v7923_v5 }
 0xe28   :  { %v17485_v18 = vpop.f32.mrf.mxu0 }
 0xe29   :  { %v8117_v3 = vadd.f32 %v17485_v18, %v8030_v62  ;;  %v17518_v32 = vpop.f32.mrf.mxu1 }
 0xe2a   :  { %v8109_v26 = vpop.f32.mrf.mxu0 }
 0xe2b   :  { %v8110_v33 = vadd.f32 %v8109_v26, %v8024_v30  ;;  %v8202_v35 = vadd.f32 %v17496_v50, %v8117_v3  ;;  %v8365_v54 = vpop.f32.mrf.mxu1  ;;  %v385_v50 = vld [vmem:[#allocation28 + $0x38] sm:$0xff]  ;;  %v384_v3 = vld [vmem:[#allocation28 + $0x30] sm:$0xff] }
 0xe2c   :  { %v20135_v26 = vand.u32 4294901760, %v385_v50 }
 0xe2d   :  { %v8194_v37 = vadd.f32 %v8193_v7, %v8110_v33  ;;  %v20140_v33 = vand.u32 4294901760, %v384_v3  ;;  %v383_v7 = vld [vmem:[#allocation28 + $0x28] sm:$0xff] }
 0xe2e   :  { %v20138_v30 = vsub.f32 %v385_v50, %v20135_v26  ;;  %17519 = vmatprep.subr.mxu0 %v20135_v26 }
 0xe2f   :  { %17520 = vmatpush3.msra.mxu0 %v20135_v26 }
 0xe30   :  { %17521 = vmatprep.subr.mxu0 %v20140_v33 }
 0xe31   :  { %v17507_v23 = vpop.f32.mrf.mxu0  ;;  %17522 = vmatpush3.msra.mxu0 %v20140_v33 }
 0xe32   :  { %v8291_v13 = vadd.f32 %v17507_v23, %v8202_v35  ;;  %v20145_v35 = vand.u32 4294901760, %v20138_v30  ;;  %v20150_v23 = vand.u32 4294901760, %v383_v7 }
 0xe33   :  { %v8284_v29 = vpop.f32.mrf.mxu0 }
 0xe34   :  { %v8372_v41 = vadd.f32 %v17518_v32, %v8291_v13  ;;  %v8285_v42 = vadd.f32 %v8284_v29, %v8194_v37  ;;  %v20148_v32 = vsub.f32 %v384_v3, %v20140_v33  ;;  %v382_v13 = vld [vmem:[#allocation28 + $0x20] sm:$0xff]  ;;  %v8544_v37 = vsub.f32 %v20138_v30, %v20145_v35  ;;  %17523 = vmatprep.subr.mxu0 %v20150_v23  ;;  %v15949_v3 = vld [vmem:[#allocation23] ss:$0 sm:$0xff] }
 0xe35   :  { %17524 = vmatpush3.msra.mxu0 %v20150_v23 }
 0xe36   :  { %v8376_v59 = vmax.f32 %v8372_v41, 0.0  ;;  %v8366_v52 = vadd.f32 %v8365_v54, %v8285_v42  ;;  %v20157_v29 = vand.u32 4294901760, %v20148_v32  ;;  %v20160_v41 = vsub.f32 %v383_v7, %v20150_v23 }
 0xe37   :  { %v20162_v42 = vand.u32 4294901760, %v382_v13  ;;  %v8545_v54 = vand.u32 4294901760, %v8544_v37  ;;  %v15950_v37 = vld [vmem:[#allocation22] ss:$0 sm:$0xff] }
 0xe38   :  { %v8375_v46 = vmax.f32 %v8366_v52, 0.0  ;;  %v8378_v21 = vadd.f32 %v8376_v59, %v20087_v9  ;;  %v8551_v59 = vsub.f32 %v20148_v32, %v20157_v29  ;;  %v20169_v52 = vand.u32 4294901760, %v20160_v41 }
 0xe39   :  { %17525 = vmatprep.subr.mxu0 %v20162_v42  ;;  %17530 = vmatprep.subr.mxu1 %v8545_v54 }
 0xe3a   :  { %v8382_v14 = vsel %vm1437_vm3, %v8378_v21, 0.0  ;;  %v8377_v0 = vadd.f32 %v8375_v46, %v20089_v39  ;;  %v20172_v46 = vsub.f32 %v382_v13, %v20162_v42  ;;  %17526 = vmatpush3.msra.mxu0 %v20162_v42  ;;  %17531 = vmatpush3.msra.mxu1 %v8545_v54 }
 0xe3b   :  { %8383 = vadd.xlane.f32.xlu1 %v8382_v14  ;;  %v8558_v14 = vsub.f32 %v20160_v41, %v20169_v52  ;;  %17541 = vmatprep.subr.mxu0 %v20138_v30 }
 0xe3c   :  { %v8379_v1 = vsel %vm1437_vm3, %v8377_v0, 0.0 }
 0xe3d   :  { %8380 = vadd.xlane.f32.xlu0 %v8379_v1  ;;  %v8559_v1 = vand.u32 4294901760, %v8558_v14 }
 0xec4   :  { %v8384_v6 = vpop.xlane.xlu1 %8383 }
 0xec5   :  { %v8386_v2 = vmul.f32 0.03125, %v8384_v6 }
 0xec6   :  { %v8381_v10 = vpop.xlane.xlu0 %8380 }
 0xec7   :  { %v8388_v4 = vsub.f32 %v8378_v21, %v8386_v2  ;;  %v8385_v5 = vmul.f32 0.03125, %v8381_v10  ;;  %v8552_v21 = vand.u32 4294901760, %v8551_v59 }
 0xec9   :  { %v20129_v18 = vsub.f32 %v8377_v0, %v8385_v5  ;;  %v8390_v22 = vmul.f32 %v8388_v4, %v8388_v4  ;;  %v20179_v0 = vand.u32 4294901760, %v20172_v46  ;;  %17532 = vmatprep.subr.mxu1 %v8552_v21 }
 0xeca   :  { %17533 = vmatpush3.msra.mxu1 %v8552_v21 }
 0xecb   :  { %v8394_v62 = vsel %vm1437_vm3, %v8390_v22, 0.0  ;;  %v8389_v9 = vmul.f32 %v20129_v18, %v20129_v18  ;;  %v8565_v6 = vsub.f32 %v20172_v46, %v20179_v0  ;;  %17534 = vmatprep.subr.mxu1 %v8559_v1 }
 0xecc   :  { %8395 = vadd.xlane.f32.xlu1 %v8394_v62  ;;  %17535 = vmatpush3.msra.mxu1 %v8559_v1 }
 0xecd   :  { %v8391_v39 = vsel %vm1437_vm3, %v8389_v9, 0.0  ;;  %v8566_v2 = vand.u32 4294901760, %v8565_v6 }
 0xece   :  { %8392 = vadd.xlane.f32.xlu0 %v8391_v39 }
 0xecf   :  { %17536 = vmatprep.subr.mxu1 %v8566_v2 }
 0xed0   :  { %17537 = vmatpush3.msra.mxu1 %v8566_v2 }
 0xed1   :  { %17552 = vmatprep.subr.mxu1 %v20135_v26 }
 0xf55   :  { %v8396_v10 = vpop.xlane.xlu1 %8395 }
 0xf56   :  { %v8398_v5 = vmul.f32 0.03125, %v8396_v10 }
 0xf57   :  { %v8393_v22 = vpop.xlane.xlu0 %8392 }
 0xf58   :  { %v8400_v62 = vadd.f32 1e-05, %v8398_v5  ;;  %v8397_v9 = vmul.f32 0.03125, %v8393_v22  ;;  %v377_v5 = vld [vmem:[#allocation26 + $0x38] sm:$0xff] }
 0xf5a   :  { %18315 = vrsqrt.f32 %v8400_v62  ;;  %v8399_v39 = vadd.f32 1e-05, %v8397_v9  ;;  %v20208_v9 = vand.u32 4294901760, %v377_v5 }
 0xf5c   :  { %18317 = vrsqrt.f32 %v8399_v39  ;;  %v376_v39 = vld [vmem:[#allocation26 + $0x30] sm:$0xff] }
 0xf67   :  { %v18316_v50 = vpop.eup %18315 }
 0xf68   :  { %v8404_v7 = vmul.f32 %v18316_v50, %v8388_v4 }
 0xf69   :  { %v18318_v13 = vpop.eup %18317 }
 0xf6a   :  { %v8412_v54 = vmul.f32 %v15949_v3, %v8404_v7  ;;  %v8403_v59 = vmul.f32 %v18318_v13, %v20129_v18  ;;  %v20216_v7 = vand.u32 4294901760, %v376_v39 }
 0xf6c   :  { %v20186_v21 = vadd.f32 %v15950_v37, %v8412_v54  ;;  %v8411_v14 = vmul.f32 %v15949_v3, %v8403_v59  ;;  %v375_v3 = vld [vmem:[#allocation26 + $0x28] sm:$0xff]  ;;  %v20225_v54 = vsub.f32 %v377_v5, %v20208_v9  ;;  %v374_v59 = vld [vmem:[#allocation26 + $0x20] sm:$0xff] }
 0xf6d   :  { %v20237_v17 = vand.u32 4294901760, %v374_v59 }
 0xf6e   :  { %v8425_v1 = vsel %vm1437_vm3, %v20186_v21, 0  ;;  %v20190_v6 = vadd.f32 %v15950_v37, %v8411_v14  ;;  %v20228_v14 = vand.u32 4294901760, %v375_v3  ;;  %v20244_v8 = vand.u32 4294901760, %v20225_v54 }
 0xf6f   :  { %v20192_v2 = vand.u32 4294901760, %v8425_v1 }
 0xf70   :  { %v8422_v10 = vsel %vm1437_vm3, %v20190_v6, 0 }
 0xf71   :  { %v20196_v4 = vand.u32 4294901760, %v8422_v10  ;;  %v20199_v22 = vsub.f32 %v8425_v1, %v20192_v2 }
 0xf73   :  { %17538 = vmatprep.mubr.f32.mxu1 %v20196_v4  ;;  %v20203_v18 = vsub.f32 %v8422_v10, %v20196_v4  ;;  %v20206_v62 = vand.u32 4294901760, %v20199_v22  ;;  %v20235_v10 = vsub.f32 %v376_v39, %v20216_v7 }
 0xf74   :  { %17539 = vmatmul.mubr.f32.vlgmr.msra.gmra.mxu1 %v20192_v2 }
 0xf75   :  { %17553 = vmatpush3.msra.mxu1 %v20135_v26  ;;  %v20213_v50 = vand.u32 4294901760, %v20203_v18  ;;  %v8509_v37 = vsub.f32 %v20199_v22, %v20206_v62  ;;  %v20256_v39 = vand.u32 4294901760, %v20235_v10 }
 0xf76   :  { %17554 = vmatprep.subr.mxu1 %v20140_v33 }
 0xf77   :  { %17555 = vmatpush3.msra.mxu1 %v20140_v33  ;;  %17560 = vmatprep.mubr.f32.mxu1 %v20213_v50  ;;  %v8499_v13 = vsub.f32 %v20203_v18, %v20213_v50  ;;  %v20241_v5 = vand.u32 4294901760, %v8509_v37  ;;  %v20259_v37 = vsub.f32 %v374_v59, %v20237_v17 }
 0xf78   :  { %17556 = vmatprep.subr.mxu1 %v20150_v23 }
 0xf79   :  { %17557 = vmatpush3.msra.mxu1 %v20150_v23  ;;  %v20231_v1 = vand.u32 4294901760, %v8499_v13  ;;  %v20249_v13 = vsub.f32 %v375_v3, %v20228_v14  ;;  %v9072_v3 = vsub.f32 %v20225_v54, %v20244_v8  ;;  %v20277_v59 = vand.u32 4294901760, %v20259_v37 }
 0xf7a   :  { %17558 = vmatprep.subr.mxu1 %v20162_v42 }
 0xf7b   :  { %17559 = vmatpush3.msra.mxu1 %v20162_v42  ;;  %17527 = vmatprep.mubr.f32.mxu0 %v20231_v1 }
 0xf7c   :  { %17561 = vmatmul.mubr.f32.vlgmr.msra.gmra.mxu1 %v20206_v62  ;;  %17574 = vmatprep.subr.mxu1 %v20135_v26 }
 0xf7d   :  { %17528 = vmatmul.mubr.f32.vlgmr.msra.gmra.mxu0 %v20241_v5  ;;  %17575 = vmatpush3.msra.mxu1 %v20135_v26  ;;  %v20268_v26 = vand.u32 4294901760, %v20249_v13 }
 0xf7e   :  { %17542 = vmatpush3.msra.mxu0 %v20138_v30  ;;  %17582 = vmatprep.mubr.f32.mxu1 %v20196_v4  ;;  %v9079_v30 = vsub.f32 %v20235_v10, %v20256_v39 }
 0xf7f   :  { %17543 = vmatprep.subr.mxu0 %v20148_v32  ;;  %17549 = vmatprep.mubr.f32.mxu0 %v20203_v18 }
 0xf80   :  { %17576 = vmatprep.subr.mxu1 %v20140_v33  ;;  %17544 = vmatpush3.msra.mxu0 %v20148_v32  ;;  %v9073_v32 = vand.u32 4294901760, %v9072_v3 }
 0xf81   :  { %17577 = vmatpush3.msra.mxu1 %v20140_v33  ;;  %17545 = vmatprep.subr.mxu0 %v20160_v41  ;;  %v9086_v33 = vsub.f32 %v20249_v13, %v20268_v26 }
 0xf82   :  { %17578 = vmatprep.subr.mxu1 %v20150_v23  ;;  %17546 = vmatpush3.msra.mxu0 %v20160_v41  ;;  %v9080_v41 = vand.u32 4294901760, %v9079_v30 }
 0xf83   :  { %17579 = vmatpush3.msra.mxu1 %v20150_v23  ;;  %17547 = vmatprep.subr.mxu0 %v20172_v46  ;;  %v9093_v23 = vsub.f32 %v20259_v37, %v20277_v59 }
 0xf84   :  { %17580 = vmatprep.subr.mxu1 %v20162_v42  ;;  %17548 = vmatpush3.msra.mxu0 %v20172_v46  ;;  %v9087_v46 = vand.u32 4294901760, %v9086_v33 }
 0xf85   :  { %17581 = vmatpush3.msra.mxu1 %v20162_v42  ;;  %17550 = vmatmul.mubr.f32.vlgmr.msra.gmra.mxu0 %v20199_v22  ;;  %v9094_v42 = vand.u32 4294901760, %v9093_v23 }
 0xf86   :  { %17563 = vmatprep.subr.mxu0 %v20145_v35  ;;  %17583 = vmatmul.mubr.f32.vlgmr.msra.gmra.mxu1 %v20192_v2 }
 0xf87   :  { %17596 = vmatprep.subr.mxu1 %v9073_v32  ;;  %17564 = vmatpush3.msra.mxu0 %v20145_v35  ;;  %v401_v35 = vld [vmem:[#allocation31 + $0x38] sm:$0xff] }
 0xf88   :  { %17571 = vmatprep.mubr.f32.mxu0 %v20196_v4  ;;  %17597 = vmatpush3.msra.mxu1 %v9073_v32  ;;  %v398_v32 = vld [vmem:[#allocation31 + $0x20] sm:$0xff] }
 0xf89   :  { %17604 = vmatprep.mubr.f32.mxu1 %v20196_v4  ;;  %17565 = vmatprep.subr.mxu0 %v20157_v29  ;;  %v20331_v23 = vand.u32 4294901760, %v398_v32 }
 0xf8a   :  { %17598 = vmatprep.subr.mxu1 %v9080_v41  ;;  %17566 = vmatpush3.msra.mxu0 %v20157_v29  ;;  %v20305_v29 = vand.u32 4294901760, %v401_v35 }
 0xf8b   :  { %17599 = vmatpush3.msra.mxu1 %v9080_v41  ;;  %17567 = vmatprep.subr.mxu0 %v20169_v52 }
 0xf8c   :  { %17600 = vmatprep.subr.mxu1 %v9087_v46  ;;  %17568 = vmatpush3.msra.mxu0 %v20169_v52  ;;  %v400_v52 = vld [vmem:[#allocation31 + $0x30] sm:$0xff]  ;;  %v20318_v30 = vsub.f32 %v401_v35, %v20305_v29 }
 0xf8d   :  { %17601 = vmatpush3.msra.mxu1 %v9087_v46  ;;  %17569 = vmatprep.subr.mxu0 %v20179_v0  ;;  %v20313_v3 = vand.u32 4294901760, %v400_v52 }
 0xf8e   :  { %17602 = vmatprep.subr.mxu1 %v9094_v42  ;;  %17570 = vmatpush3.msra.mxu0 %v20179_v0  ;;  %v399_v0 = vld [vmem:[#allocation31 + $0x28] sm:$0xff]  ;;  %v20336_v46 = vand.u32 4294901760, %v20318_v30 }
 0xf8f   :  { %17603 = vmatpush3.msra.mxu1 %v9094_v42  ;;  %17572 = vmatmul.mubr.f32.vlgmr.msra.gmra.mxu0 %v20192_v2  ;;  %v20322_v33 = vand.u32 4294901760, %v399_v0  ;;  %v20329_v41 = vsub.f32 %v400_v52, %v20313_v3  ;;  %v20351_v52 = vsub.f32 %v398_v32, %v20331_v23 }
 0xf90   :  { %17585 = vmatprep.subr.mxu0 %v20208_v9  ;;  %17605 = vmatmul.mubr.f32.vlgmr.msra.gmra.mxu1 %v20192_v2 }
 0xf91   :  { %17618 = vmatprep.subr.mxu1 %v20208_v9  ;;  %17586 = vmatpush3.msra.mxu0 %v20208_v9  ;;  %v20341_v42 = vsub.f32 %v399_v0, %v20322_v33  ;;  %v20348_v35 = vand.u32 4294901760, %v20329_v41  ;;  %v9600_v0 = vsub.f32 %v20318_v30, %v20336_v46  ;;  %v20369_v32 = vand.u32 4294901760, %v20351_v52 }
 0xf92   :  { %17593 = vmatprep.mubr.f32.mxu0 %v20231_v1  ;;  %17619 = vmatpush3.msra.mxu1 %v20208_v9 }
 0xf93   :  { %17626 = vmatprep.mubr.f32.mxu1 %v20213_v50  ;;  %17587 = vmatprep.subr.mxu0 %v20216_v7 }
 0xf94   :  { %17620 = vmatprep.subr.mxu1 %v20216_v7  ;;  %17588 = vmatpush3.msra.mxu0 %v20216_v7 }
 0xf95   :  { %17621 = vmatpush3.msra.mxu1 %v20216_v7  ;;  %17589 = vmatprep.subr.mxu0 %v20228_v14 }
 0xf96   :  { %17622 = vmatprep.subr.mxu1 %v20228_v14  ;;  %17590 = vmatpush3.msra.mxu0 %v20228_v14 }
 0xf97   :  { %17623 = vmatpush3.msra.mxu1 %v20228_v14  ;;  %17591 = vmatprep.subr.mxu0 %v20237_v17 }
 0xf98   :  { %17624 = vmatprep.subr.mxu1 %v20237_v17  ;;  %17592 = vmatpush3.msra.mxu0 %v20237_v17 }
 0xf99   :  { %17625 = vmatpush3.msra.mxu1 %v20237_v17  ;;  %17594 = vmatmul.mubr.f32.vlgmr.msra.gmra.mxu0 %v20241_v5 }
 0xf9a   :  { %17607 = vmatprep.subr.mxu0 %v20225_v54  ;;  %17627 = vmatmul.mubr.f32.vlgmr.msra.gmra.mxu1 %v20206_v62 }
 0xf9b   :  { %17640 = vmatprep.subr.mxu1 %v20208_v9  ;;  %17608 = vmatpush3.msra.mxu0 %v20225_v54  ;;  %v20360_v54 = vand.u32 4294901760, %v20341_v42 }
 0xf9c   :  { %17615 = vmatprep.mubr.f32.mxu0 %v20203_v18  ;;  %17641 = vmatpush3.msra.mxu1 %v20208_v9  ;;  %v9607_v9 = vsub.f32 %v20329_v41, %v20348_v35 }
 0xf9d   :  { %17648 = vmatprep.mubr.f32.mxu1 %v20196_v4  ;;  %17609 = vmatprep.subr.mxu0 %v20235_v10 }
 0xf9e   :  { %17642 = vmatprep.subr.mxu1 %v20216_v7  ;;  %17610 = vmatpush3.msra.mxu0 %v20235_v10  ;;  %v9601_v10 = vand.u32 4294901760, %v9600_v0 }
 0xf9f   :  { %17643 = vmatpush3.msra.mxu1 %v20216_v7  ;;  %17611 = vmatprep.subr.mxu0 %v20249_v13  ;;  %v9614_v7 = vsub.f32 %v20341_v42, %v20360_v54 }
 0xfa0   :  { %17644 = vmatprep.subr.mxu1 %v20228_v14  ;;  %17612 = vmatpush3.msra.mxu0 %v20249_v13  ;;  %v9608_v13 = vand.u32 4294901760, %v9607_v9 }
 0xfa1   :  { %17645 = vmatpush3.msra.mxu1 %v20228_v14  ;;  %17613 = vmatprep.subr.mxu0 %v20259_v37  ;;  %v9621_v14 = vsub.f32 %v20351_v52, %v20369_v32 }
 0xfa2   :  { %17646 = vmatprep.subr.mxu1 %v20237_v17  ;;  %17614 = vmatpush3.msra.mxu0 %v20259_v37  ;;  %v9615_v37 = vand.u32 4294901760, %v9614_v7 }
 0xfa3   :  { %17647 = vmatpush3.msra.mxu1 %v20237_v17  ;;  %17616 = vmatmul.mubr.f32.vlgmr.msra.gmra.mxu0 %v20199_v22  ;;  %v9622_v17 = vand.u32 4294901760, %v9621_v14 }
 0xfa4   :  { %17629 = vmatprep.subr.mxu0 %v20244_v8  ;;  %17649 = vmatmul.mubr.f32.vlgmr.msra.gmra.mxu1 %v20192_v2 }
 0xfa5   :  { %17662 = vmatprep.subr.mxu1 %v9601_v10  ;;  %17630 = vmatpush3.msra.mxu0 %v20244_v8 }
 0xfa6   :  { %17637 = vmatprep.mubr.f32.mxu0 %v20196_v4  ;;  %17663 = vmatpush3.msra.mxu1 %v9601_v10 }
 0xfa7   :  { %17670 = vmatprep.mubr.f32.mxu1 %v20196_v4  ;;  %17631 = vmatprep.subr.mxu0 %v20256_v39 }
 0xfa8   :  { %17664 = vmatprep.subr.mxu1 %v9608_v13  ;;  %17632 = vmatpush3.msra.mxu0 %v20256_v39 }
 0xfa9   :  { %17665 = vmatpush3.msra.mxu1 %v9608_v13  ;;  %17633 = vmatprep.subr.mxu0 %v20268_v26 }
 0xfaa   :  { %17666 = vmatprep.subr.mxu1 %v9615_v37  ;;  %17634 = vmatpush3.msra.mxu0 %v20268_v26 }
 0xfab   :  { %17667 = vmatpush3.msra.mxu1 %v9615_v37  ;;  %17635 = vmatprep.subr.mxu0 %v20277_v59 }
 0xfac   :  { %17668 = vmatprep.subr.mxu1 %v9622_v17  ;;  %17636 = vmatpush3.msra.mxu0 %v20277_v59 }
 0xfad   :  { %17669 = vmatpush3.msra.mxu1 %v9622_v17  ;;  %17638 = vmatmul.mubr.f32.vlgmr.msra.gmra.mxu0 %v20192_v2 }
 0xfae   :  { %17651 = vmatprep.subr.mxu0 %v20305_v29  ;;  %17671 = vmatmul.mubr.f32.vlgmr.msra.gmra.mxu1 %v20192_v2 }
 0xfaf   :  { %17684 = vmatprep.subr.mxu1 %v20305_v29  ;;  %17652 = vmatpush3.msra.mxu0 %v20305_v29 }
 0xfb0   :  { %17659 = vmatprep.mubr.f32.mxu0 %v20231_v1  ;;  %17685 = vmatpush3.msra.mxu1 %v20305_v29 }
 0xfb1   :  { %17692 = vmatprep.mubr.f32.mxu1 %v20213_v50  ;;  %17653 = vmatprep.subr.mxu0 %v20313_v3 }
 0xfb2   :  { %17686 = vmatprep.subr.mxu1 %v20313_v3  ;;  %17654 = vmatpush3.msra.mxu0 %v20313_v3 }
 0xfb3   :  { %17687 = vmatpush3.msra.mxu1 %v20313_v3  ;;  %17655 = vmatprep.subr.mxu0 %v20322_v33 }
 0xfb4   :  { %17688 = vmatprep.subr.mxu1 %v20322_v33  ;;  %17656 = vmatpush3.msra.mxu0 %v20322_v33 }
 0xfb5   :  { %17689 = vmatpush3.msra.mxu1 %v20322_v33  ;;  %17657 = vmatprep.subr.mxu0 %v20331_v23 }
 0xfb6   :  { %17690 = vmatprep.subr.mxu1 %v20331_v23  ;;  %17658 = vmatpush3.msra.mxu0 %v20331_v23 }
 0xfb7   :  { %17691 = vmatpush3.msra.mxu1 %v20331_v23  ;;  %17660 = vmatmul.mubr.f32.vlgmr.msra.gmra.mxu0 %v20241_v5 }
 0xfb8   :  { %17673 = vmatprep.subr.mxu0 %v20318_v30  ;;  %17693 = vmatmul.mubr.f32.vlgmr.msra.gmra.mxu1 %v20206_v62 }
 0xfb9   :  { %17706 = vmatprep.subr.mxu1 %v20305_v29  ;;  %17674 = vmatpush3.msra.mxu0 %v20318_v30 }
 0xfba   :  { %17681 = vmatprep.mubr.f32.mxu0 %v20203_v18  ;;  %17707 = vmatpush3.msra.mxu1 %v20305_v29 }
 0xfbb   :  { %17714 = vmatprep.mubr.f32.mxu1 %v20196_v4  ;;  %17675 = vmatprep.subr.mxu0 %v20329_v41 }
 0xfbc   :  { %17708 = vmatprep.subr.mxu1 %v20313_v3  ;;  %17676 = vmatpush3.msra.mxu0 %v20329_v41 }
 0xfbd   :  { %17709 = vmatpush3.msra.mxu1 %v20313_v3  ;;  %17677 = vmatprep.subr.mxu0 %v20341_v42 }
 0xfbe   :  { %17710 = vmatprep.subr.mxu1 %v20322_v33  ;;  %17678 = vmatpush3.msra.mxu0 %v20341_v42 }
 0xfbf   :  { %17711 = vmatpush3.msra.mxu1 %v20322_v33  ;;  %17679 = vmatprep.subr.mxu0 %v20351_v52 }
 0xfc0   :  { %17712 = vmatprep.subr.mxu1 %v20331_v23  ;;  %17680 = vmatpush3.msra.mxu0 %v20351_v52 }
 0xfc1   :  { %17713 = vmatpush3.msra.mxu1 %v20331_v23  ;;  %17682 = vmatmul.mubr.f32.vlgmr.msra.gmra.mxu0 %v20199_v22 }
 0xfc2   :  { %17695 = vmatprep.subr.mxu0 %v20336_v46  ;;  %17715 = vmatmul.mubr.f32.vlgmr.msra.gmra.mxu1 %v20192_v2 }
 0xfc3   :  { %17696 = vmatpush3.msra.mxu0 %v20336_v46  ;;  %17703 = vmatprep.mubr.f32.mxu0 %v20196_v4 }
 0xfc4   :  { %17697 = vmatprep.subr.mxu0 %v20348_v35 }
 0xfc5   :  { %17698 = vmatpush3.msra.mxu0 %v20348_v35 }
 0xfc6   :  { %17699 = vmatprep.subr.mxu0 %v20360_v54 }
 0xfc7   :  { %17700 = vmatpush3.msra.mxu0 %v20360_v54 }
 0xfc8   :  { %17701 = vmatprep.subr.mxu0 %v20369_v32 }
 0xfc9   :  { %17702 = vmatpush3.msra.mxu0 %v20369_v32 }
 0xfca   :  { %17704 = vmatmul.mubr.f32.vlgmr.msra.gmra.mxu0 %v20192_v2  ;;  %v20444_v2 = vld [vmem:[#allocation20] ss:$0 sm:$0xff] }
0x1034   :  { %v17540_v22 = vpop.f32.mrf.mxu1 }
0x1036   :  { %v8603_v50 = vpop.f32.mrf.mxu1 }
0x103c   :  { %v17562_v4 = vpop.f32.mrf.mxu1 }
0x103d   :  { %v17529_v8 = vpop.f32.mrf.mxu0 }
0x103e   :  { %v8773_v26 = vpop.f32.mrf.mxu1  ;;  %v8610_v23 = vadd.f32 %v17540_v22, %v17529_v8 }
0x103f   :  { %v8502_v18 = vpop.f32.mrf.mxu0 }
0x1040   :  { %v8604_v5 = vadd.f32 %v8603_v50, %v8502_v18 }
0x1045   :  { %v17551_v62 = vpop.f32.mrf.mxu0 }
0x1046   :  { %v17584_v59 = vpop.f32.mrf.mxu1  ;;  %v8697_v42 = vadd.f32 %v17551_v62, %v8610_v23 }
0x1047   :  { %v8689_v1 = vpop.f32.mrf.mxu0 }
0x1048   :  { %v8690_v39 = vadd.f32 %v8689_v1, %v8604_v5  ;;  %v8945_v41 = vpop.f32.mrf.mxu1  ;;  %v8782_v54 = vadd.f32 %v17562_v4, %v8697_v42 }
0x104a   :  { %v8774_v3 = vadd.f32 %v8773_v26, %v8690_v39 }
0x104f   :  { %v17573_v29 = vpop.f32.mrf.mxu0 }
0x1050   :  { %v8871_v32 = vadd.f32 %v17573_v29, %v8782_v54  ;;  %v17606_v37 = vpop.f32.mrf.mxu1 }
0x1051   :  { %v8864_v30 = vpop.f32.mrf.mxu0 }
0x1052   :  { %v8865_v33 = vadd.f32 %v8864_v30, %v8774_v3  ;;  %v8952_v14 = vadd.f32 %v17584_v59, %v8871_v32  ;;  %v9131_v62 = vpop.f32.mrf.mxu1 }
0x1054   :  { %v8946_v46 = vadd.f32 %v8945_v41, %v8865_v33  ;;  %v10012_v18 = vmul.f32 %v20444_v2, %v8952_v14 }
0x1056   :  { %v10011_v35 = vmul.f32 %v20444_v2, %v8946_v46  ;;  %v10017_v5 = vsel %vm1437_vm3, %v10012_v18, 0 }
0x1057   :  { %v20460_v3 = vand.u32 4294901760, %v10017_v5 }
0x1058   :  { %v10014_v52 = vsel %vm1437_vm3, %v10011_v35, 0 }
0x1059   :  { %v20448_v0 = vand.u32 4294901760, %v10014_v52  ;;  %v17595_v10 = vpop.f32.mrf.mxu0  ;;  %v20463_v35 = vsub.f32 %v10017_v5, %v20460_v3 }
0x105a   :  { %v9138_v50 = vadd.f32 %v17606_v37, %v17595_v10  ;;  %v17628_v4 = vpop.f32.mrf.mxu1 }
0x105b   :  { %v20451_v9 = vsub.f32 %v10014_v52, %v20448_v0  ;;  %17728 = vmatprep.mubr.f32.mxu1 %v20448_v0  ;;  %v9030_v17 = vpop.f32.mrf.mxu0 }
0x105c   :  { %v9132_v39 = vadd.f32 %v9131_v62, %v9030_v17  ;;  %v9301_v30 = vpop.f32.mrf.mxu1 }
0x105d   :  { %v10094_v7 = vand.u32 4294901760, %v20451_v9 }
0x105f   :  { %v10095_v13 = vsub.f32 %v20451_v9, %v10094_v7 }
0x1061   :  { %v10096_v8 = vand.u32 4294901760, %v10095_v13 }
0x1063   :  { %v17617_v22 = vpop.f32.mrf.mxu0  ;;  %17721 = vmatprep.mubr.f32.mxu0 %v10096_v8  ;;  %v10104_v8 = vand.u32 4294901760, %v20463_v35 }
0x1064   :  { %v9225_v26 = vadd.f32 %v17617_v22, %v9138_v50  ;;  %v17650_v33 = vpop.f32.mrf.mxu1  ;;  %v20477_v50 = vld [vmem:[#allocation20 + $0x1] ss:$0 sm:$0xff] }
0x1065   :  { %v9217_v1 = vpop.f32.mrf.mxu0  ;;  %v10105_v5 = vsub.f32 %v20463_v35, %v10104_v8 }
0x1066   :  { %v9218_v29 = vadd.f32 %v9217_v1, %v9132_v39  ;;  %v9310_v59 = vadd.f32 %v17628_v4, %v9225_v26  ;;  %v9473_v10 = vpop.f32.mrf.mxu1  ;;  %v10551_v4 = vmul.f32 %v20477_v50, %v8946_v46 }
0x1068   :  { %v9302_v42 = vadd.f32 %v9301_v30, %v9218_v29  ;;  %v10554_v46 = vsel %vm1437_vm3, %v10551_v4, 0  ;;  %v10106_v30 = vand.u32 4294901760, %v10105_v5 }
0x106d   :  { %v17639_v41 = vpop.f32.mrf.mxu0 }
0x106e   :  { %v9399_v23 = vadd.f32 %v17639_v41, %v9310_v59  ;;  %v10552_v41 = vmul.f32 %v20477_v50, %v8952_v14 }
0x106f   :  { %v9392_v52 = vpop.f32.mrf.mxu0 }
0x1070   :  { %v9480_v54 = vadd.f32 %v17650_v33, %v9399_v23  ;;  %v9393_v32 = vadd.f32 %v9392_v52, %v9302_v42  ;;  %v20506_v42 = vand.u32 4294901760, %v10554_v46  ;;  %v10557_v14 = vsel %vm1437_vm3, %v10552_v41, 0 }
0x1072   :  { %v10023_v13 = vsel %vm1437_vm3, %v9480_v54, 0  ;;  %v9474_v37 = vadd.f32 %v9473_v10, %v9393_v32  ;;  %v20515_v54 = vsub.f32 %v10554_v46, %v20506_v42  ;;  %v20521_v10 = vand.u32 4294901760, %v10557_v14 }
0x1073   :  { %v20466_v17 = vand.u32 4294901760, %v10023_v13 }
0x1074   :  { %v10020_v22 = vsel %vm1437_vm3, %v9474_v37, 0  ;;  %v10628_v4 = vand.u32 4294901760, %v20515_v54 }
0x1075   :  { %v20471_v18 = vsub.f32 %v10023_v13, %v20466_v17  ;;  %v20473_v62 = vand.u32 4294901760, %v10020_v22  ;;  %17717 = vmatprep.subr.mxu0 %v20466_v17  ;;  %v17672_v13 = vpop.f32.mrf.mxu1 }
0x1076   :  { %17718 = vmatpush3.xpose.msra.mxu0 %v20466_v17 }
0x1077   :  { %v20481_v1 = vsub.f32 %v10020_v22, %v20473_v62  ;;  %17719 = vmatprep.subr.mxu0 %v20473_v62  ;;  %v20488_v39 = vand.u32 4294901760, %v20471_v18  ;;  %v17661_v52 = vpop.f32.mrf.mxu0  ;;  %v9659_v46 = vpop.f32.mrf.mxu1 }
0x1078   :  { %v9666_v22 = vadd.f32 %v17672_v13, %v17661_v52 }
0x1079   :  { %v10144_v26 = vsub.f32 %v20471_v18, %v20488_v39  ;;  %v20493_v29 = vand.u32 4294901760, %v20481_v1  ;;  %v9558_v32 = vpop.f32.mrf.mxu0  ;;  %v17694_v41 = vpop.f32.mrf.mxu1 }
0x107a   :  { %17720 = vmatpush3.xpose.msra.mxu0 %v20473_v62 }
0x107b   :  { %17731 = vmatprep.subr.mxu0 %v20471_v18  ;;  %v20498_v59 = vand.u32 4294901760, %v10144_v26  ;;  %v10151_v33 = vsub.f32 %v20481_v1, %v20493_v29  ;;  %v20532_v26 = vsub.f32 %v10557_v14, %v20521_v10 }
0x107d   :  { %17722 = vmatmul.mubr.f32.vlgmr.msra.gmra.mxu0 %v10106_v30  ;;  %17724 = vmatprep.subr.mxu1 %v20498_v59  ;;  %v20504_v23 = vand.u32 4294901760, %v10151_v33  ;;  %v9660_v33 = vadd.f32 %v9659_v46, %v9558_v32  ;;  %v10638_v14 = vand.u32 4294901760, %v20532_v26  ;;  %v9829_v32 = vpop.f32.mrf.mxu1 }
0x107e   :  { %17725 = vmatpush3.xpose.msra.mxu1 %v20498_v59  ;;  %17732 = vmatpush3.xpose.msra.mxu0 %v20471_v18 }
0x107f   :  { %17735 = vmatprep.mubr.f32.mxu0 %v20451_v9  ;;  %17726 = vmatprep.subr.mxu1 %v20504_v23 }
0x1080   :  { %17733 = vmatprep.subr.mxu0 %v20481_v1 }
0x1081   :  { %v17683_v37 = vpop.f32.mrf.mxu0 }
0x1082   :  { %17727 = vmatpush3.xpose.msra.mxu1 %v20504_v23  ;;  %17734 = vmatpush3.xpose.msra.mxu0 %v20481_v1  ;;  %v9753_v5 = vadd.f32 %v17683_v37, %v9666_v22 }
0x1083   :  { %17738 = vmatprep.subr.mxu1 %v20466_v17  ;;  %17745 = vmatprep.subr.mxu0 %v20488_v39  ;;  %v9745_v30 = vpop.f32.mrf.mxu0 }
0x1084   :  { %v9746_v52 = vadd.f32 %v9745_v30, %v9660_v33  ;;  %v9838_v13 = vadd.f32 %v17694_v41, %v9753_v5  ;;  %v10639_v30 = vsub.f32 %v20532_v26, %v10638_v14  ;;  %v17716_v33 = vpop.f32.mrf.mxu1 }
0x1085   :  { %17729 = vmatmul.mubr.f32.vlgmr.msra.gmra.mxu1 %v20460_v3  ;;  %17736 = vmatmul.mubr.f32.vlgmr.msra.gmra.mxu0 %v20463_v35 }
0x1086   :  { %17739 = vmatpush3.xpose.msra.mxu1 %v20466_v17  ;;  %17742 = vmatprep.mubr.f32.mxu1 %v10094_v7  ;;  %v10629_v7 = vsub.f32 %v20515_v54, %v10628_v4  ;;  %v9830_v5 = vadd.f32 %v9829_v32, %v9746_v52  ;;  %v10640_v41 = vand.u32 4294901760, %v10639_v30 }
0x1087   :  { %17746 = vmatpush3.xpose.msra.mxu0 %v20488_v39  ;;  %17749 = vmatprep.mubr.f32.mxu0 %v20448_v0 }
0x1088   :  { %17740 = vmatprep.subr.mxu1 %v20473_v62  ;;  %17747 = vmatprep.subr.mxu0 %v20493_v29  ;;  %v10630_v46 = vand.u32 4294901760, %v10629_v7 }
0x108a   :  { %v17705_v9 = vpop.f32.mrf.mxu0  ;;  %17741 = vmatpush3.xpose.msra.mxu1 %v20473_v62 }
0x108b   :  { %17748 = vmatpush3.xpose.msra.mxu0 %v20493_v29  ;;  %17752 = vmatprep.subr.mxu1 %v20466_v17  ;;  %v9927_v37 = vadd.f32 %v17705_v9, %v9838_v13 }
0x108c   :  { %17759 = vmatprep.subr.mxu0 %v20466_v17  ;;  %v9920_v22 = vpop.f32.mrf.mxu0 }
0x108d   :  { %17743 = vmatmul.mubr.f32.vlgmr.msra.gmra.mxu1 %v10104_v8  ;;  %v20552_v35 = vadd.f32 %v17716_v33, %v9927_v37  ;;  %v9921_v8 = vadd.f32 %v9920_v22, %v9830_v5 }
0x108e   :  { %17750 = vmatmul.mubr.f32.vlgmr.msra.gmra.mxu0 %v20460_v3  ;;  %17753 = vmatpush3.xpose.msra.mxu1 %v20466_v17 }
0x108f   :  { %17756 = vmatprep.mubr.f32.mxu1 %v20448_v0  ;;  %17760 = vmatpush3.xpose.msra.mxu0 %v20466_v17  ;;  %v10001_v0 = vpop.f32.mrf.mxu1  ;;  %v11084_v9 = vmul.f32 %v20477_v50, %v20552_v35 }
0x1090   :  { %17763 = vmatprep.mubr.f32.mxu0 %v10630_v46  ;;  %17754 = vmatprep.subr.mxu1 %v20473_v62  ;;  %v20561_v7 = vadd.f32 %v10001_v0, %v9921_v8  ;;  %v18369_v0 = vld [vmem:[#allocation11 + $0x8] sm:$0xff] }
0x1091   :  { %17761 = vmatprep.subr.mxu0 %v20473_v62  ;;  %v20569_v52 = vand.u32 4294901760, %v11084_v9 }
0x1092   :  { %17755 = vmatpush3.xpose.msra.mxu1 %v20473_v62  ;;  %v11083_v13 = vmul.f32 %v20477_v50, %v20561_v7 }
0x1093   :  { %17762 = vmatpush3.xpose.msra.mxu0 %v20473_v62  ;;  %17766 = vmatprep.subr.mxu1 %v20498_v59 }
0x1094   :  { %17773 = vmatprep.subr.mxu0 %v20471_v18 }
0x1095   :  { %17757 = vmatmul.mubr.f32.vlgmr.msra.gmra.mxu1 %v20460_v3  ;;  %v20579_v3 = vsub.f32 %v11084_v9, %v20569_v52 }
0x1096   :  { %17764 = vmatmul.mubr.f32.vlgmr.msra.gmra.mxu0 %v10640_v41  ;;  %17767 = vmatpush3.xpose.msra.mxu1 %v20498_v59 }
0x1097   :  { %17770 = vmatprep.mubr.f32.mxu1 %v20506_v42  ;;  %17774 = vmatpush3.xpose.msra.mxu0 %v20471_v18  ;;  %v20581_v18 = vand.u32 4294901760, %v11083_v13 }
0x1098   :  { %17777 = vmatprep.mubr.f32.mxu0 %v20515_v54  ;;  %17768 = vmatprep.subr.mxu1 %v20504_v23 }
0x1099   :  { %17775 = vmatprep.subr.mxu0 %v20481_v1  ;;  %v20592_v50 = vsub.f32 %v11083_v13, %v20581_v18 }
0x109a   :  { %17769 = vmatpush3.xpose.msra.mxu1 %v20504_v23 }
0x109b   :  { %17776 = vmatpush3.xpose.msra.mxu0 %v20481_v1  ;;  %17780 = vmatprep.subr.mxu1 %v20466_v17  ;;  %v20596_v1 = vand.u32 4294901760, %v20579_v3  ;;  %v20605_v59 = vand.u32 4294901760, %v20592_v50 }
0x109c   :  { %17787 = vmatprep.subr.mxu0 %v20488_v39 }
0x109d   :  { %17771 = vmatmul.mubr.f32.vlgmr.msra.gmra.mxu1 %v20521_v10  ;;  %v11217_v23 = vsub.f32 %v20592_v50, %v20605_v59 }
0x109e   :  { %17778 = vmatmul.mubr.f32.vlgmr.msra.gmra.mxu0 %v20532_v26  ;;  %17781 = vmatpush3.xpose.msra.mxu1 %v20466_v17 }
0x109f   :  { %17784 = vmatprep.mubr.f32.mxu1 %v10628_v4  ;;  %17788 = vmatpush3.xpose.msra.mxu0 %v20488_v39  ;;  %v11210_v39 = vsub.f32 %v20579_v3, %v20596_v1 }
0x10a0   :  { %17791 = vmatprep.mubr.f32.mxu0 %v20506_v42  ;;  %17782 = vmatprep.subr.mxu1 %v20473_v62 }
0x10a1   :  { %17789 = vmatprep.subr.mxu0 %v20493_v29 }
0x10a2   :  { %17783 = vmatpush3.xpose.msra.mxu1 %v20473_v62 }
0x10a3   :  { %17790 = vmatpush3.xpose.msra.mxu0 %v20493_v29  ;;  %17794 = vmatprep.subr.mxu1 %v20466_v17  ;;  %v11211_v29 = vand.u32 4294901760, %v11210_v39  ;;  %v18370_v39 = vld [vmem:[#allocation11] sm:$0xff] }
0x10a4   :  { %17801 = vmatprep.subr.mxu0 %v20569_v52 }
0x10a5   :  { %17785 = vmatmul.mubr.f32.vlgmr.msra.gmra.mxu1 %v10638_v14 }
0x10a6   :  { %17792 = vmatmul.mubr.f32.vlgmr.msra.gmra.mxu0 %v20521_v10  ;;  %17795 = vmatpush3.xpose.msra.mxu1 %v20466_v17  ;;  %v11218_v17 = vand.u32 4294901760, %v11217_v23 }
0x10a7   :  { %17798 = vmatprep.mubr.f32.mxu1 %v20506_v42  ;;  %17802 = vmatpush3.msra.mxu0 %v20569_v52 }
0x10a8   :  { %17796 = vmatprep.subr.mxu1 %v20473_v62  ;;  %17803 = vmatprep.subr.mxu0 %v20581_v18 }
0x10a9   :  { %17804 = vmatpush3.msra.mxu0 %v20581_v18 }
0x10aa   :  { %17815 = vmatprep.subr.mxu0 %v20579_v3  ;;  %17797 = vmatpush3.xpose.msra.mxu1 %v20473_v62 }
0x10ab   :  { %17808 = vmatprep.subr.mxu1 %v11211_v29 }
0x10ad   :  { %17799 = vmatmul.mubr.f32.vlgmr.msra.gmra.mxu1 %v20521_v10 }
0x10ae   :  { %17809 = vmatpush3.msra.mxu1 %v11211_v29 }
0x10af   :  { %17810 = vmatprep.subr.mxu1 %v11218_v17 }
0x10b0   :  { %17811 = vmatpush3.msra.mxu1 %v11218_v17 }
0x10b1   :  { %17822 = vmatprep.subr.mxu1 %v20569_v52 }
0x113d   :  { %v17723_v42 = vpop.f32.mrf.mxu0 }
0x113e   :  { %v10109_v13 = vadd.f32 %v18369_v0, %v17723_v42 }
0x113f   :  { %v10098_v4 = vpop.f32.mrf.mxu0 }
0x1140   :  { %v10099_v56 = vadd.f32 %v18370_v39, %v10098_v4 }
0x1145   :  { %v17730_v54 = vpop.f32.mrf.mxu1  ;;  %v17737_v26 = vpop.f32.mrf.mxu0 }
0x1146   :  { %v10196_v48 = vadd.f32 %v17730_v54, %v10109_v13 }
0x1147   :  { %v10189_v14 = vpop.f32.mrf.mxu1  ;;  %v10271_v32 = vpop.f32.mrf.mxu0 }
0x1148   :  { %v10190_v51 = vadd.f32 %v10189_v14, %v10099_v56  ;;  %v10279_v27 = vadd.f32 %v17737_v26, %v10196_v48 }
0x114a   :  { %v10272_v19 = vadd.f32 %v10271_v32, %v10190_v51 }
0x114d   :  { %v17744_v37 = vpop.f32.mrf.mxu1 }
0x114e   :  { %v17751_v22 = vpop.f32.mrf.mxu0 }
0x114f   :  { %v10353_v46 = vpop.f32.mrf.mxu1 }
0x1150   :  { %v10438_v62 = vpop.f32.mrf.mxu0  ;;  %v10354_v42 = vadd.f32 %v10353_v46, %v10272_v19 }
0x1152   :  { %v10439_v13 = vadd.f32 %v10438_v62, %v10354_v42 }
0x1155   :  { %v17758_v5 = vpop.f32.mrf.mxu1 }
0x1156   :  { %v17765_v30 = vpop.f32.mrf.mxu0 }
0x1157   :  { %v10517_v33 = vpop.f32.mrf.mxu1  ;;  %v10643_v41 = vadd.f32 %v18369_v0, %v17765_v30  ;;  %v10362_v30 = vadd.f32 %v17744_v37, %v10279_v27 }
0x1158   :  { %v10632_v8 = vpop.f32.mrf.mxu0 }
0x1159   :  { %v10633_v29 = vadd.f32 %v18370_v39, %v10632_v8 }
0x115d   :  { %v17772_v10 = vpop.f32.mrf.mxu1 }
0x115e   :  { %v10730_v23 = vadd.f32 %v17772_v10, %v10643_v41  ;;  %v17779_v17 = vpop.f32.mrf.mxu0  ;;  %v10445_v41 = vadd.f32 %v17751_v22, %v10362_v30 }
0x115f   :  { %v10723_v9 = vpop.f32.mrf.mxu1 }
0x1160   :  { %v10724_v44 = vadd.f32 %v10723_v9, %v10633_v29  ;;  %v10813_v12 = vadd.f32 %v17779_v17, %v10730_v23  ;;  %v10805_v24 = vpop.f32.mrf.mxu0  ;;  %v10524_v56 = vadd.f32 %v17758_v5, %v10445_v41  ;;  %v10549_v41 = vmul.f32 %v20444_v2, %v20561_v7 }
0x1162   :  { %v10806_v31 = vadd.f32 %v10805_v24, %v10724_v44  ;;  %v10518_v44 = vadd.f32 %v10517_v33, %v10439_v13 }
0x1165   :  { %v17786_v20 = vpop.f32.mrf.mxu1 }
0x1166   :  { %v10896_v36 = vadd.f32 %v17786_v20, %v10813_v12  ;;  %v17793_v11 = vpop.f32.mrf.mxu0 }
0x1167   :  { %v10887_v34 = vpop.f32.mrf.mxu1 }
0x1168   :  { %v10888_v45 = vadd.f32 %v10887_v34, %v10806_v31  ;;  %v10979_v0 = vadd.f32 %v17793_v11, %v10896_v36  ;;  %v10972_v8 = vpop.f32.mrf.mxu0  ;;  %v10530_v31 = vsel %vm926_vm2, %v10524_v56, -inf  ;;  %v10527_v11 = vsel %vm926_vm2, %v10518_v44, -inf }
0x116a   :  { %v10973_v4 = vadd.f32 %v10972_v8, %v10888_v45 }
0x116d   :  { %v17800_v10 = vpop.f32.mrf.mxu1 }
0x116e   :  { %v11058_v54 = vadd.f32 %v17800_v10, %v10979_v0  ;;  %v10550_v10 = vmul.f32 %v20444_v2, %v20552_v35 }
0x116f   :  { %v11051_v9 = vpop.f32.mrf.mxu1 }
0x1170   :  { %v11052_v14 = vadd.f32 %v11051_v9, %v10973_v4  ;;  %v11064_v39 = vsel %vm926_vm2, %v11058_v54, -inf  ;;  %v20632_v4 = vand.u32 4294901760, %v10550_v10 }
0x1171   :  { %11065 = vmax.xlane.f32.xlu1 %v11064_v39 }
0x1172   :  { %v11061_v12 = vsel %vm926_vm2, %v11052_v14, -inf }
0x1173   :  { %11062 = vmax.xlane.f32.xlu0 %v11061_v12 }
0x1175   :  { %10531 = vmax.xlane.f32.xlu1 %v10530_v31 }
0x1177   :  { %10528 = vmax.xlane.f32.xlu0 %v10527_v11 }
0x11fa   :  { %v11066_v36 = vpop.xlane.xlu1 %11065 }
0x11fb   :  { %v11068_v45 = vsub.f32 %v11058_v54, %v11066_v36 }
0x11fc   :  { %v11063_v34 = vpop.xlane.xlu0 %11062 }
0x11fd   :  { %v11071_v20 = vmul.f32 1.442695, %v11068_v45  ;;  %v11067_v19 = vsub.f32 %v11052_v14, %v11063_v34  ;;  %v20637_v14 = vsub.f32 %v10550_v10, %v20632_v4 }
0x11fe   :  { %v10532_v51 = vpop.xlane.xlu1 %10531 }
0x11ff   :  { %18319 = vpow2.f32 %v11071_v20  ;;  %v11069_v48 = vmul.f32 1.442695, %v11067_v19  ;;  %v10534_v27 = vsub.f32 %v10524_v56, %v10532_v51  ;;  %v20634_v56 = vand.u32 4294901760, %v10549_v41 }
0x1200   :  { %v10529_v24 = vpop.xlane.xlu0 %10528  ;;  %v20648_v45 = vand.u32 4294901760, %v20637_v14 }
0x1201   :  { %18321 = vpow2.f32 %v11069_v48  ;;  %v10537_v26 = vmul.f32 1.442695, %v10534_v27  ;;  %v10533_v37 = vsub.f32 %v10518_v44, %v10529_v24  ;;  %v20644_v2 = vsub.f32 %v10549_v41, %v20634_v56 }
0x1202   :  { %v11718_v24 = vsub.f32 %v20637_v14, %v20648_v45 }
0x1203   :  { %18323 = vpow2.f32 %v10537_v26  ;;  %v10535_v32 = vmul.f32 1.442695, %v10533_v37  ;;  %v20653_v27 = vand.u32 4294901760, %v20644_v2 }
0x1205   :  { %18325 = vpow2.f32 %v10535_v32 }
0x120c   :  { %v18320_v22 = vpop.eup %18319 }
0x120d   :  { %v11076_v46 = vsel %vm926_vm2, %v18320_v22, 0.0 }
0x120e   :  { %v18322_v5 = vpop.eup %18321  ;;  %11077 = vadd.xlane.f32.xlu1 %v11076_v46  ;;  %v11725_v46 = vsub.f32 %v20644_v2, %v20653_v27 }
0x120f   :  { %v11073_v62 = vsel %vm926_vm2, %v18322_v5, 0.0 }
0x1210   :  { %v18324_v33 = vpop.eup %18323  ;;  %11074 = vadd.xlane.f32.xlu0 %v11073_v62 }
0x1211   :  { %v10542_v29 = vsel %vm926_vm2, %v18324_v33, 0.0 }
0x1212   :  { %v18326_v23 = vpop.eup %18325  ;;  %10543 = vadd.xlane.f32.xlu1 %v10542_v29 }
0x1213   :  { %v10539_v17 = vsel %vm926_vm2, %v18326_v23, 0.0 }
0x1214   :  { %10540 = vadd.xlane.f32.xlu0 %v10539_v17 }
0x1297   :  { %v11078_v30 = vpop.xlane.xlu1 %11077 }
0x1298   :  { %18327 = vrcp.f32 %v11078_v30 }
0x1299   :  { %v11075_v42 = vpop.xlane.xlu0 %11074 }
0x129a   :  { %18329 = vrcp.f32 %v11075_v42 }
0x129b   :  { %v10544_v0 = vpop.xlane.xlu1 %10543 }
0x129d   :  { %v10541_v8 = vpop.xlane.xlu0 %10540 }
0x129e   :  { %18331 = vrcp.f32 %v10541_v8 }
0x129f   :  { %18333 = vrcp.f32 %v10544_v0 }
0x12a5   :  { %v18328_v54 = vpop.eup %18327 }
0x12a6   :  { %v11082_v9 = vmul.f32 %v18328_v54, %v18320_v22 }
0x12a7   :  { %v18330_v13 = vpop.eup %18329 }
0x12a8   :  { %v11080_v39 = vmul.f32 %v18330_v13, %v18322_v5  ;;  %v11089_v44 = vsel %vm926_vm2, %v11082_v9, 0 }
0x12a9   :  { %v20640_v12 = vand.u32 4294901760, %v11089_v44 }
0x12aa   :  { %v11086_v35 = vsel %vm926_vm2, %v11080_v39, 0 }
0x12ab   :  { %v18332_v31 = vpop.eup %18331  ;;  %v11158_v7 = vand.u32 4294901760, %v11086_v35  ;;  %v11169_v11 = vsub.f32 %v11089_v44, %v20640_v12 }
0x12ac   :  { %v18334_v36 = vpop.eup %18333  ;;  %v10546_v34 = vmul.f32 %v18332_v31, %v18326_v23 }
0x12ad   :  { %17812 = vmatprep.mubr.f32.mxu1 %v11158_v7  ;;  %v11159_v20 = vsub.f32 %v11086_v35, %v11158_v7  ;;  %v11170_v19 = vand.u32 4294901760, %v11169_v11  ;;  %v10548_v51 = vmul.f32 %v18334_v36, %v18324_v33  ;;  %v11719_v33 = vand.u32 4294901760, %v11718_v24 }
0x12ae   :  { %17813 = vmatmul.mubr.f32.vlgmr.msra.gmra.mxu1 %v20640_v12  ;;  %v11594_v37 = vsel %vm926_vm2, %v10546_v34, 0 }
0x12af   :  { %17823 = vmatpush3.msra.mxu1 %v20569_v52  ;;  %v11160_v48 = vand.u32 4294901760, %v11159_v20  ;;  %v11171_v26 = vsub.f32 %v11169_v11, %v11170_v19  ;;  %v11666_v5 = vand.u32 4294901760, %v11594_v37  ;;  %v11597_v62 = vsel %vm926_vm2, %v10548_v51, 0 }
0x12b0   :  { %17824 = vmatprep.subr.mxu1 %v20581_v18  ;;  %v11676_v23 = vand.u32 4294901760, %v11597_v62 }
0x12b1   :  { %17825 = vmatpush3.msra.mxu1 %v20581_v18  ;;  %17826 = vmatprep.mubr.f32.mxu1 %v11160_v48  ;;  %v11161_v32 = vsub.f32 %v11159_v20, %v11160_v48  ;;  %v11172_v29 = vand.u32 4294901760, %v11171_v26  ;;  %v11667_v17 = vsub.f32 %v11594_v37, %v11666_v5 }
0x12b2   :  { %17836 = vmatprep.subr.mxu1 %v20569_v52  ;;  %17827 = vmatmul.mubr.f32.vlgmr.msra.gmra.mxu1 %v11170_v19  ;;  %v11677_v30 = vsub.f32 %v11597_v62, %v11676_v23 }
0x12b3   :  { %17837 = vmatpush3.msra.mxu1 %v20569_v52  ;;  %17840 = vmatprep.mubr.f32.mxu1 %v11158_v7  ;;  %v11162_v22 = vand.u32 4294901760, %v11161_v32  ;;  %v11726_v52 = vand.u32 4294901760, %v11725_v46 }
0x12b4   :  { %17838 = vmatprep.subr.mxu1 %v20581_v18 }
0x12b5   :  { %17839 = vmatpush3.msra.mxu1 %v20581_v18  ;;  %17805 = vmatprep.mubr.f32.mxu0 %v11162_v22  ;;  %v11668_v18 = vand.u32 4294901760, %v11667_v17 }
0x12b6   :  { %17850 = vmatprep.subr.mxu1 %v11719_v33  ;;  %17806 = vmatmul.mubr.f32.vlgmr.msra.gmra.mxu0 %v11172_v29 }
0x12b7   :  { %17816 = vmatpush3.msra.mxu0 %v20579_v3  ;;  %17841 = vmatmul.mubr.f32.vlgmr.msra.gmra.mxu1 %v20640_v12  ;;  %v11678_v3 = vand.u32 4294901760, %v11677_v30 }
0x12b8   :  { %17851 = vmatpush3.msra.mxu1 %v11719_v33  ;;  %17817 = vmatprep.subr.mxu0 %v20592_v50 }
0x12b9   :  { %17819 = vmatprep.mubr.f32.mxu0 %v11159_v20  ;;  %17852 = vmatprep.subr.mxu1 %v11726_v52 }
0x12ba   :  { %17854 = vmatprep.mubr.f32.mxu1 %v11666_v5  ;;  %17818 = vmatpush3.msra.mxu0 %v20592_v50  ;;  %v11669_v50 = vsub.f32 %v11667_v17, %v11668_v18 }
0x12bb   :  { %17853 = vmatpush3.msra.mxu1 %v11726_v52  ;;  %17829 = vmatprep.subr.mxu0 %v20596_v1 }
0x12bc   :  { %17864 = vmatprep.subr.mxu1 %v20632_v4  ;;  %17820 = vmatmul.mubr.f32.vlgmr.msra.gmra.mxu0 %v11169_v11  ;;  %v11670_v42 = vand.u32 4294901760, %v11669_v50 }
0x12bd   :  { %17830 = vmatpush3.msra.mxu0 %v20596_v1  ;;  %17855 = vmatmul.mubr.f32.vlgmr.msra.gmra.mxu1 %v11676_v23  ;;  %v11679_v1 = vsub.f32 %v11677_v30, %v11678_v3 }
0x12be   :  { %17865 = vmatpush3.msra.mxu1 %v20632_v4  ;;  %17831 = vmatprep.subr.mxu0 %v20605_v59 }
0x12bf   :  { %17833 = vmatprep.mubr.f32.mxu0 %v11158_v7  ;;  %17866 = vmatprep.subr.mxu1 %v20634_v56 }
0x12c0   :  { %17868 = vmatprep.mubr.f32.mxu1 %v11668_v18  ;;  %17832 = vmatpush3.msra.mxu0 %v20605_v59  ;;  %v11680_v59 = vand.u32 4294901760, %v11679_v1 }
0x12c1   :  { %17867 = vmatpush3.msra.mxu1 %v20634_v56  ;;  %17843 = vmatprep.subr.mxu0 %v20632_v4 }
0x12c2   :  { %17878 = vmatprep.subr.mxu1 %v20632_v4  ;;  %17834 = vmatmul.mubr.f32.vlgmr.msra.gmra.mxu0 %v20640_v12 }
0x12c3   :  { %17844 = vmatpush3.msra.mxu0 %v20632_v4  ;;  %17869 = vmatmul.mubr.f32.vlgmr.msra.gmra.mxu1 %v11678_v3 }
0x12c4   :  { %17879 = vmatpush3.msra.mxu1 %v20632_v4  ;;  %17845 = vmatprep.subr.mxu0 %v20634_v56 }
0x12c5   :  { %17847 = vmatprep.mubr.f32.mxu0 %v11670_v42  ;;  %17880 = vmatprep.subr.mxu1 %v20634_v56 }
0x12c6   :  { %17882 = vmatprep.mubr.f32.mxu1 %v11666_v5  ;;  %17846 = vmatpush3.msra.mxu0 %v20634_v56 }
0x12c7   :  { %17881 = vmatpush3.msra.mxu1 %v20634_v56  ;;  %17857 = vmatprep.subr.mxu0 %v20637_v14 }
0x12c8   :  { %17848 = vmatmul.mubr.f32.vlgmr.msra.gmra.mxu0 %v11680_v59  ;;  %17883 = vmatmul.mubr.f32.vlgmr.msra.gmra.mxu1 %v11676_v23 }
0x12c9   :  { %17858 = vmatpush3.msra.mxu0 %v20637_v14  ;;  %17861 = vmatprep.mubr.f32.mxu0 %v11667_v17 }
0x12ca   :  { %17859 = vmatprep.subr.mxu0 %v20644_v2 }
0x12cb   :  { %17860 = vmatpush3.msra.mxu0 %v20644_v2 }
0x12cc   :  { %17871 = vmatprep.subr.mxu0 %v20648_v45  ;;  %17862 = vmatmul.mubr.f32.vlgmr.msra.gmra.mxu0 %v11677_v30 }
0x12cd   :  { %17872 = vmatpush3.msra.mxu0 %v20648_v45  ;;  %17875 = vmatprep.mubr.f32.mxu0 %v11666_v5 }
0x12ce   :  { %17873 = vmatprep.subr.mxu0 %v20653_v27 }
0x12cf   :  { %17874 = vmatpush3.msra.mxu0 %v20653_v27 }
0x12d0   :  { %17876 = vmatmul.mubr.f32.vlgmr.msra.gmra.mxu0 %v11676_v23 }
0x136e   :  { %v17814_v0 = vpop.f32.mrf.mxu1 }
0x1370   :  { %v11255_v8 = vpop.f32.mrf.mxu1 }
0x1372   :  { %v17828_v10 = vpop.f32.mrf.mxu1 }
0x1374   :  { %v11419_v41 = vpop.f32.mrf.mxu1 }
0x1376   :  { %v17807_v4 = vpop.f32.mrf.mxu0 }
0x1377   :  { %v17842_v54 = vpop.f32.mrf.mxu1  ;;  %v11262_v13 = vadd.f32 %v17814_v0, %v17807_v4 }
0x1378   :  { %v11164_v9 = vpop.f32.mrf.mxu0 }
0x1379   :  { %v11583_v56 = vpop.f32.mrf.mxu1  ;;  %v11256_v39 = vadd.f32 %v11255_v8, %v11164_v9 }
0x137c   :  { %v17821_v14 = vpop.f32.mrf.mxu0 }
0x137d   :  { %v11345_v44 = vadd.f32 %v17821_v14, %v11262_v13  ;;  %v17856_v2 = vpop.f32.mrf.mxu1 }
0x137e   :  { %v11337_v12 = vpop.f32.mrf.mxu0 }
0x137f   :  { %v11338_v35 = vadd.f32 %v11337_v12, %v11256_v39  ;;  %v11428_v31 = vadd.f32 %v17828_v10, %v11345_v44  ;;  %v11763_v45 = vpop.f32.mrf.mxu1 }
0x1381   :  { %v11420_v7 = vadd.f32 %v11419_v41, %v11338_v35  ;;  %v393_v35 = vld [vmem:[#allocation29 + $0x38] sm:$0xff] }
0x1382   :  { %v17835_v11 = vpop.f32.mrf.mxu0 }
0x1383   :  { %v11511_v36 = vadd.f32 %v17835_v11, %v11428_v31  ;;  %v17870_v48 = vpop.f32.mrf.mxu1  ;;  %v392_v31 = vld [vmem:[#allocation29 + $0x30] sm:$0xff]  ;;  %v391_v11 = vld [vmem:[#allocation29 + $0x28] sm:$0xff] }
0x1384   :  { %v11504_v34 = vpop.f32.mrf.mxu0 }
0x1385   :  { %v11505_v20 = vadd.f32 %v11504_v34, %v11420_v7  ;;  %v11590_v19 = vadd.f32 %v17842_v54, %v11511_v36  ;;  %v11927_v22 = vpop.f32.mrf.mxu1  ;;  %v20707_v7 = vand.u32 4294901760, %v392_v31  ;;  %v20717_v34 = vand.u32 4294901760, %v391_v11 }
0x1387   :  { %v11584_v51 = vadd.f32 %v11583_v56, %v11505_v20  ;;  %v390_v20 = vld [vmem:[#allocation29 + $0x20] sm:$0xff] }
0x1388   :  { %v17849_v27 = vpop.f32.mrf.mxu0  ;;  %v17884_v52 = vpop.f32.mrf.mxu1 }
0x1389   :  { %v11683_v24 = vadd.f32 %v17849_v27, %v11590_v19  ;;  %v20729_v27 = vand.u32 4294901760, %v390_v20 }
0x138a   :  { %v11672_v26 = vpop.f32.mrf.mxu0  ;;  %v12091_v42 = vpop.f32.mrf.mxu1 }
0x138b   :  { %v11673_v37 = vadd.f32 %v11672_v26, %v11584_v51  ;;  %v11770_v32 = vadd.f32 %v17856_v2, %v11683_v24 }
0x138c   :  { %v17863_v46 = vpop.f32.mrf.mxu0 }
0x138d   :  { %v11853_v5 = vadd.f32 %v17863_v46, %v11770_v32  ;;  %v11764_v62 = vadd.f32 %v11763_v45, %v11673_v37  ;;  %v20715_v45 = vsub.f32 %v392_v31, %v20707_v7  ;;  %v20739_v32 = vsub.f32 %v390_v20, %v20729_v27 }
0x138e   :  { %v11845_v33 = vpop.f32.mrf.mxu0 }
0x138f   :  { %v11846_v29 = vadd.f32 %v11845_v33, %v11764_v62  ;;  %v11936_v23 = vadd.f32 %v17870_v48, %v11853_v5  ;;  %v20724_v51 = vand.u32 4294901760, %v20715_v45  ;;  %v20727_v48 = vsub.f32 %v391_v11, %v20717_v34 }
0x1390   :  { %v17877_v17 = vpop.f32.mrf.mxu0  ;;  %v20746_v5 = vand.u32 4294901760, %v20739_v32 }
0x1391   :  { %v12019_v30 = vadd.f32 %v17877_v17, %v11936_v23  ;;  %v11928_v18 = vadd.f32 %v11927_v22, %v11846_v29  ;;  %v12275_v26 = vsub.f32 %v20715_v45, %v20724_v51  ;;  %v20736_v37 = vand.u32 4294901760, %v20727_v48 }
0x1392   :  { %v12012_v3 = vpop.f32.mrf.mxu0  ;;  %v12289_v33 = vsub.f32 %v20739_v32, %v20746_v5 }
0x1393   :  { %v12098_v50 = vadd.f32 %v17884_v52, %v12019_v30  ;;  %v12013_v1 = vadd.f32 %v12012_v3, %v11928_v18  ;;  %v12276_v22 = vand.u32 4294901760, %v12275_v26  ;;  %v12282_v46 = vsub.f32 %v20727_v48, %v20736_v37 }
0x1394   :  { %v12290_v29 = vand.u32 4294901760, %v12289_v33 }
0x1395   :  { %v12092_v59 = vadd.f32 %v12091_v42, %v12013_v1  ;;  %v12102_v0 = vadd.f32 %v12098_v50, %v20186_v21  ;;  %v12283_v62 = vand.u32 4294901760, %v12282_v46  ;;  %v15951_v1 = vld [vmem:[%s21161_s17 + $0x1] ss:$0 sm:$0xff] }
0x1397   :  { %v12106_v8 = vsel %vm1437_vm3, %v12102_v0, 0.0  ;;  %v12101_v10 = vadd.f32 %v12092_v59, %v20190_v6  ;;  %v20702_v6 = vand.u32 4294901760, %v393_v35 }
0x1398   :  { %12107 = vadd.xlane.f32.xlu1 %v12106_v8 }
0x1399   :  { %v12103_v41 = vsel %vm1437_vm3, %v12101_v10, 0.0  ;;  %v20705_v2 = vsub.f32 %v393_v35, %v20702_v6  ;;  %17885 = vmatprep.subr.mxu0 %v20702_v6 }
0x139a   :  { %12104 = vadd.xlane.f32.xlu0 %v12103_v41  ;;  %17886 = vmatpush3.msra.mxu0 %v20702_v6 }
0x139b   :  { %v20712_v36 = vand.u32 4294901760, %v20705_v2  ;;  %17887 = vmatprep.subr.mxu0 %v20707_v7 }
0x139c   :  { %17888 = vmatpush3.msra.mxu0 %v20707_v7 }
0x139d   :  { %v12268_v19 = vsub.f32 %v20705_v2, %v20712_v36  ;;  %17889 = vmatprep.subr.mxu0 %v20717_v34 }
0x139e   :  { %17890 = vmatpush3.msra.mxu0 %v20717_v34 }
0x139f   :  { %v12269_v24 = vand.u32 4294901760, %v12268_v19  ;;  %17891 = vmatprep.subr.mxu0 %v20729_v27 }
0x13a0   :  { %17892 = vmatpush3.msra.mxu0 %v20729_v27 }
0x13a1   :  { %17896 = vmatprep.subr.mxu1 %v12269_v24  ;;  %17907 = vmatprep.subr.mxu0 %v20705_v2 }
0x13a2   :  { %17897 = vmatpush3.msra.mxu1 %v12269_v24 }
0x13a3   :  { %17898 = vmatprep.subr.mxu1 %v12276_v22 }
0x13a4   :  { %17899 = vmatpush3.msra.mxu1 %v12276_v22 }
0x13a5   :  { %17900 = vmatprep.subr.mxu1 %v12283_v62 }
0x13a6   :  { %17901 = vmatpush3.msra.mxu1 %v12283_v62 }
0x13a7   :  { %17902 = vmatprep.subr.mxu1 %v12290_v29 }
0x13a8   :  { %17903 = vmatpush3.msra.mxu1 %v12290_v29 }
0x13a9   :  { %17918 = vmatprep.subr.mxu1 %v20702_v6 }
0x1421   :  { %v12108_v4 = vpop.xlane.xlu1 %12107 }
0x1422   :  { %v12110_v54 = vmul.f32 0.03125, %v12108_v4 }
0x1423   :  { %v12105_v9 = vpop.xlane.xlu0 %12104 }
0x1424   :  { %v12112_v13 = vsub.f32 %v12102_v0, %v12110_v54  ;;  %v12109_v56 = vmul.f32 0.03125, %v12105_v9  ;;  %v15952_v0 = vld [vmem:[#allocation25 + $0x1] ss:$0 sm:$0xff] }
0x1426   :  { %v12111_v14 = vsub.f32 %v12101_v10, %v12109_v56  ;;  %v12114_v39 = vmul.f32 %v12112_v13, %v12112_v13 }
0x1428   :  { %v12118_v44 = vsel %vm1437_vm3, %v12114_v39, 0.0  ;;  %v12113_v12 = vmul.f32 %v12111_v14, %v12111_v14 }
0x1429   :  { %12119 = vadd.xlane.f32.xlu1 %v12118_v44 }
0x142a   :  { %v12115_v21 = vsel %vm1437_vm3, %v12113_v12, 0.0 }
0x142b   :  { %12116 = vadd.xlane.f32.xlu0 %v12115_v21 }
0x14b2   :  { %v12120_v23 = vpop.xlane.xlu1 %12119 }
0x14b3   :  { %v12122_v52 = vmul.f32 0.03125, %v12120_v23 }
0x14b4   :  { %v12117_v17 = vpop.xlane.xlu0 %12116 }
0x14b5   :  { %v12124_v30 = vadd.f32 1e-05, %v12122_v52  ;;  %v12121_v18 = vmul.f32 0.03125, %v12117_v17 }
0x14b7   :  { %18335 = vrsqrt.f32 %v12124_v30  ;;  %v12123_v3 = vadd.f32 1e-05, %v12121_v18 }
0x14b9   :  { %18337 = vrsqrt.f32 %v12123_v3 }
0x14c4   :  { %v18336_v50 = vpop.eup %18335 }
0x14c5   :  { %v12128_v42 = vmul.f32 %v18336_v50, %v12112_v13 }
0x14c6   :  { %v18338_v59 = vpop.eup %18337 }
0x14c7   :  { %v12127_v8 = vmul.f32 %v18338_v59, %v12111_v14  ;;  %v12136_v10 = vmul.f32 %v15951_v1, %v12128_v42 }
0x14c9   :  { %v12135_v41 = vmul.f32 %v15951_v1, %v12127_v8  ;;  %v20755_v4 = vadd.f32 %v15952_v0, %v12136_v10 }
0x14cb   :  { %v20757_v54 = vadd.f32 %v15952_v0, %v12135_v41  ;;  %v12149_v9 = vsel %vm1437_vm3, %v20755_v4, 0 }
0x14cc   :  { %v12230_v56 = vand.u32 4294901760, %v12149_v9 }
0x14cd   :  { %v12146_v39 = vsel %vm1437_vm3, %v20757_v54, 0 }
0x14ce   :  { %v12220_v44 = vand.u32 4294901760, %v12146_v39  ;;  %v12231_v12 = vsub.f32 %v12149_v9, %v12230_v56 }
0x14d0   :  { %17904 = vmatprep.mubr.f32.mxu1 %v12220_v44  ;;  %v12221_v13 = vsub.f32 %v12146_v39, %v12220_v44  ;;  %v12232_v21 = vand.u32 4294901760, %v12231_v12 }
0x14d1   :  { %17905 = vmatmul.mubr.f32.vlgmr.msra.gmra.mxu1 %v12230_v56 }
0x14d2   :  { %17919 = vmatpush3.msra.mxu1 %v20702_v6  ;;  %v12222_v14 = vand.u32 4294901760, %v12221_v13  ;;  %v12233_v31 = vsub.f32 %v12231_v12, %v12232_v21 }
0x14d3   :  { %17920 = vmatprep.subr.mxu1 %v20707_v7 }
0x14d4   :  { %17921 = vmatpush3.msra.mxu1 %v20707_v7  ;;  %17926 = vmatprep.mubr.f32.mxu1 %v12222_v14  ;;  %v12223_v35 = vsub.f32 %v12221_v13, %v12222_v14  ;;  %v12234_v20 = vand.u32 4294901760, %v12233_v31  ;;  %v18372_v14 = vld [vmem:[#allocation10] sm:$0xff] }
0x14d5   :  { %17922 = vmatprep.subr.mxu1 %v20717_v34 }
0x14d6   :  { %17923 = vmatpush3.msra.mxu1 %v20717_v34  ;;  %v12224_v11 = vand.u32 4294901760, %v12223_v35 }
0x14d7   :  { %17924 = vmatprep.subr.mxu1 %v20729_v27 }
0x14d8   :  { %17925 = vmatpush3.msra.mxu1 %v20729_v27  ;;  %17893 = vmatprep.mubr.f32.mxu0 %v12224_v11 }
0x14d9   :  { %17927 = vmatmul.mubr.f32.vlgmr.msra.gmra.mxu1 %v12232_v21  ;;  %17940 = vmatprep.subr.mxu1 %v20702_v6 }
0x14da   :  { %17894 = vmatmul.mubr.f32.vlgmr.msra.gmra.mxu0 %v12234_v20  ;;  %17941 = vmatpush3.msra.mxu1 %v20702_v6 }
0x14db   :  { %17908 = vmatpush3.msra.mxu0 %v20705_v2  ;;  %17948 = vmatprep.mubr.f32.mxu1 %v12220_v44 }
0x14dc   :  { %17909 = vmatprep.subr.mxu0 %v20715_v45  ;;  %17915 = vmatprep.mubr.f32.mxu0 %v12221_v13 }
0x14dd   :  { %17942 = vmatprep.subr.mxu1 %v20707_v7  ;;  %17910 = vmatpush3.msra.mxu0 %v20715_v45 }
0x14de   :  { %17943 = vmatpush3.msra.mxu1 %v20707_v7  ;;  %17911 = vmatprep.subr.mxu0 %v20727_v48 }
0x14df   :  { %17944 = vmatprep.subr.mxu1 %v20717_v34  ;;  %17912 = vmatpush3.msra.mxu0 %v20727_v48 }
0x14e0   :  { %17945 = vmatpush3.msra.mxu1 %v20717_v34  ;;  %17913 = vmatprep.subr.mxu0 %v20739_v32 }
0x14e1   :  { %17946 = vmatprep.subr.mxu1 %v20729_v27  ;;  %17914 = vmatpush3.msra.mxu0 %v20739_v32 }
0x14e2   :  { %17947 = vmatpush3.msra.mxu1 %v20729_v27  ;;  %17916 = vmatmul.mubr.f32.vlgmr.msra.gmra.mxu0 %v12231_v12  ;;  %v18371_v12 = vld [vmem:[#allocation10 + $0x8] sm:$0xff] }
0x14e3   :  { %17929 = vmatprep.subr.mxu0 %v20712_v36  ;;  %17949 = vmatmul.mubr.f32.vlgmr.msra.gmra.mxu1 %v12230_v56 }
0x14e4   :  { %17930 = vmatpush3.msra.mxu0 %v20712_v36  ;;  %17937 = vmatprep.mubr.f32.mxu0 %v12220_v44 }
0x14e5   :  { %17931 = vmatprep.subr.mxu0 %v20724_v51  ;;  %17958 = vmatprep.subr.mxu1 %v19784_v47 }
0x14e6   :  { %17932 = vmatpush3.msra.mxu0 %v20724_v51  ;;  %17959 = vmatpush3.xpose.msra.mxu1 %v19784_v47 }
0x14e7   :  { %17933 = vmatprep.subr.mxu0 %v20736_v37  ;;  %17960 = vmatprep.subr.mxu1 %v19794_v61 }
0x14e8   :  { %17934 = vmatpush3.msra.mxu0 %v20736_v37 }
0x14e9   :  { %17935 = vmatprep.subr.mxu0 %v20746_v5 }
0x14ea   :  { %17936 = vmatpush3.msra.mxu0 %v20746_v5  ;;  %17961 = vmatpush3.xpose.msra.mxu1 %v19794_v61 }
0x14eb   :  { %17938 = vmatmul.mubr.f32.vlgmr.msra.gmra.mxu0 %v12230_v56  ;;  %17951 = vmatprep.subr.mxu0 %v19764_v55 }
0x14ec   :  { %17972 = vmatprep.subr.mxu1 %v19764_v55  ;;  %17952 = vmatpush3.xpose.msra.mxu0 %v19764_v55 }
0x14ed   :  { %17953 = vmatprep.subr.mxu0 %v19775_v63 }
0x14f0   :  { %17954 = vmatpush3.xpose.msra.mxu0 %v19775_v63 }
0x14f1   :  { %17965 = vmatprep.subr.mxu0 %v19767_v57 }
0x1591   :  { %v17906_v6 = vpop.f32.mrf.mxu1 }
0x1593   :  { %v12327_v36 = vpop.f32.mrf.mxu1 }
0x1599   :  { %v17928_v61 = vpop.f32.mrf.mxu1 }
0x159a   :  { %v17895_v47 = vpop.f32.mrf.mxu0 }
0x159b   :  { %v12334_v45 = vadd.f32 %v17906_v6, %v17895_v47  ;;  %v12497_v27 = vpop.f32.mrf.mxu1 }
0x159c   :  { %v12226_v2 = vpop.f32.mrf.mxu0 }
0x159d   :  { %v12328_v19 = vadd.f32 %v12327_v36, %v12226_v2 }
0x15a2   :  { %v17917_v7 = vpop.f32.mrf.mxu0 }
0x15a3   :  { %v12421_v51 = vadd.f32 %v17917_v7, %v12334_v45  ;;  %v17950_v26 = vpop.f32.mrf.mxu1 }
0x15a4   :  { %v12413_v34 = vpop.f32.mrf.mxu0 }
0x15a5   :  { %v12414_v48 = vadd.f32 %v12413_v34, %v12328_v19  ;;  %v12506_v24 = vadd.f32 %v17928_v61, %v12421_v51  ;;  %v12669_v33 = vpop.f32.mrf.mxu1 }
0x15a7   :  { %v12498_v22 = vadd.f32 %v12497_v27, %v12414_v48 }
0x15ab   :  { %v17939_v37 = vpop.f32.mrf.mxu0 }
0x15ac   :  { %v12595_v32 = vadd.f32 %v17939_v37, %v12506_v24 }
0x15ad   :  { %v12588_v46 = vpop.f32.mrf.mxu0 }
0x15ae   :  { %v12676_v5 = vadd.f32 %v17950_v26, %v12595_v32  ;;  %v12589_v62 = vadd.f32 %v12588_v46, %v12498_v22 }
0x15b0   :  { %v12683_v29 = vsel %vm1437_vm3, %v12676_v5, 0  ;;  %v12670_v23 = vadd.f32 %v12669_v33, %v12589_v62 }
0x15b1   :  { %v20804_v52 = vand.u32 4294901760, %v12683_v29 }
0x15b2   :  { %v12680_v17 = vsel %vm1437_vm3, %v12670_v23, 0 }
0x15b3   :  { %v20808_v30 = vsub.f32 %v12683_v29, %v20804_v52  ;;  %v20810_v18 = vand.u32 4294901760, %v12680_v17 }
0x15b5   :  { %v12753_v3 = vsub.f32 %v12680_v17, %v20810_v18  ;;  %17962 = vmatprep.mubr.f32.mxu1 %v20810_v18  ;;  %v12764_v50 = vand.u32 4294901760, %v20808_v30 }
0x15b6   :  { %17963 = vmatmul.mubr.f32.vlgmr.msra.gmra.mxu1 %v20804_v52 }
0x15b7   :  { %17973 = vmatpush3.xpose.msra.mxu1 %v19764_v55  ;;  %v12754_v1 = vand.u32 4294901760, %v12753_v3  ;;  %v12765_v42 = vsub.f32 %v20808_v30, %v12764_v50 }
0x15b8   :  { %17974 = vmatprep.subr.mxu1 %v19775_v63 }
0x15b9   :  { %17976 = vmatprep.mubr.f32.mxu1 %v12754_v1  ;;  %v12755_v59 = vsub.f32 %v12753_v3, %v12754_v1  ;;  %v12766_v8 = vand.u32 4294901760, %v12765_v42 }
0x15bb   :  { %17975 = vmatpush3.xpose.msra.mxu1 %v19775_v63  ;;  %v12756_v0 = vand.u32 4294901760, %v12755_v59 }
0x15bc   :  { %17986 = vmatprep.subr.mxu1 %v19764_v55 }
0x15bd   :  { %17955 = vmatprep.mubr.f32.mxu0 %v12756_v0 }
0x15be   :  { %17977 = vmatmul.mubr.f32.vlgmr.msra.gmra.mxu1 %v12764_v50  ;;  %17956 = vmatmul.mubr.f32.vlgmr.msra.gmra.mxu0 %v12766_v8 }
0x15bf   :  { %17966 = vmatpush3.xpose.msra.mxu0 %v19767_v57  ;;  %17987 = vmatpush3.xpose.msra.mxu1 %v19764_v55  ;;  %v21246_v55 = vld [vmem:[#allocation44_spill] sm:$0xff]  ;;  %v21247_v57 = vld [vmem:[#allocation51_spill] sm:$0xff] }
0x15c0   :  { %17990 = vmatprep.mubr.f32.mxu1 %v20810_v18  ;;  %17969 = vmatprep.mubr.f32.mxu0 %v12753_v3 }
0x15c1   :  { %17967 = vmatprep.subr.mxu0 %v19780_v38  ;;  %17988 = vmatprep.subr.mxu1 %v19775_v63 }
0x15c3   :  { %17968 = vmatpush3.xpose.msra.mxu0 %v19780_v38  ;;  %17989 = vmatpush3.xpose.msra.mxu1 %v19775_v63  ;;  %v21249_v63 = vld [vmem:[#allocation46_spill] sm:$0xff]  ;;  %v21250_v38 = vld [vmem:[#allocation47_spill] sm:$0xff] }
0x15c4   :  { %17979 = vmatprep.subr.mxu0 %v19773_v60  ;;  %18000 = vmatprep.subr.mxu1 %v19840_v49 }
0x15c6   :  { %17970 = vmatmul.mubr.f32.vlgmr.msra.gmra.mxu0 %v20808_v30  ;;  %17991 = vmatmul.mubr.f32.vlgmr.msra.gmra.mxu1 %v20804_v52 }
0x15c7   :  { %17980 = vmatpush3.xpose.msra.mxu0 %v19773_v60  ;;  %17983 = vmatprep.mubr.f32.mxu0 %v20810_v18  ;;  %v21248_v60 = vld [vmem:[#allocation45_spill] sm:$0xff] }
0x15c8   :  { %18001 = vmatpush3.xpose.msra.mxu1 %v19840_v49  ;;  %18004 = vmatprep.mubr.f32.mxu1 %v20810_v18 }
0x15c9   :  { %17981 = vmatprep.subr.mxu0 %v19787_v58  ;;  %18002 = vmatprep.subr.mxu1 %v19850_v53 }
0x15cb   :  { %17982 = vmatpush3.xpose.msra.mxu0 %v19787_v58 }
0x15cc   :  { %18003 = vmatpush3.xpose.msra.mxu1 %v19850_v53  ;;  %17993 = vmatprep.subr.mxu0 %v19801_v15 }
0x15cd   :  { %18014 = vmatprep.subr.mxu1 %v19801_v15 }
0x15ce   :  { %17984 = vmatmul.mubr.f32.vlgmr.msra.gmra.mxu0 %v20804_v52 }
0x15cf   :  { %18005 = vmatmul.mubr.f32.vlgmr.msra.gmra.mxu1 %v20804_v52  ;;  %17994 = vmatpush3.xpose.msra.mxu0 %v19801_v15 }
0x15d0   :  { %17997 = vmatprep.mubr.f32.mxu0 %v12756_v0  ;;  %18015 = vmatpush3.xpose.msra.mxu1 %v19801_v15 }
0x15d1   :  { %18018 = vmatprep.mubr.f32.mxu1 %v12754_v1  ;;  %17995 = vmatprep.subr.mxu0 %v19818_v25 }
0x15d2   :  { %18016 = vmatprep.subr.mxu1 %v19818_v25 }
0x15d3   :  { %17996 = vmatpush3.xpose.msra.mxu0 %v19818_v25 }
0x15d4   :  { %18017 = vmatpush3.xpose.msra.mxu1 %v19818_v25  ;;  %18007 = vmatprep.subr.mxu0 %v19813_v16 }
0x15d5   :  { %18028 = vmatprep.subr.mxu1 %v19801_v15 }
0x15d6   :  { %17998 = vmatmul.mubr.f32.vlgmr.msra.gmra.mxu0 %v12766_v8 }
0x15d7   :  { %18019 = vmatmul.mubr.f32.vlgmr.msra.gmra.mxu1 %v12764_v50  ;;  %18008 = vmatpush3.xpose.msra.mxu0 %v19813_v16 }
0x15d8   :  { %18011 = vmatprep.mubr.f32.mxu0 %v12753_v3  ;;  %18029 = vmatpush3.xpose.msra.mxu1 %v19801_v15 }
0x15d9   :  { %18032 = vmatprep.mubr.f32.mxu1 %v20810_v18  ;;  %18009 = vmatprep.subr.mxu0 %v19828_v40 }
0x15da   :  { %18030 = vmatprep.subr.mxu1 %v19818_v25 }
0x15db   :  { %18010 = vmatpush3.xpose.msra.mxu0 %v19828_v40 }
0x15dc   :  { %18031 = vmatpush3.xpose.msra.mxu1 %v19818_v25  ;;  %18021 = vmatprep.subr.mxu0 %v19825_v28 }
0x15dd   :  { %18042 = vmatprep.subr.mxu1 %v19925_v43 }
0x15de   :  { %18012 = vmatmul.mubr.f32.vlgmr.msra.gmra.mxu0 %v20808_v30 }
0x15df   :  { %18033 = vmatmul.mubr.f32.vlgmr.msra.gmra.mxu1 %v20804_v52  ;;  %18022 = vmatpush3.xpose.msra.mxu0 %v19825_v28 }
0x15e0   :  { %18025 = vmatprep.mubr.f32.mxu0 %v20810_v18  ;;  %18023 = vmatprep.subr.mxu0 %v21246_v55 }
0x15e1   :  { %18043 = vmatpush3.msra.mxu1 %v19925_v43 }
0x15e2   :  { %18044 = vmatprep.subr.mxu1 %v21247_v57 }
0x15e3   :  { %18024 = vmatpush3.xpose.msra.mxu0 %v21246_v55  ;;  %18045 = vmatpush3.msra.mxu1 %v21247_v57 }
0x15e4   :  { %18056 = vmatprep.subr.mxu1 %v21248_v60  ;;  %18035 = vmatprep.subr.mxu0 %v21248_v60 }
0x15e6   :  { %18026 = vmatmul.mubr.f32.vlgmr.msra.gmra.mxu0 %v20804_v52 }
0x15e7   :  { %18036 = vmatpush3.msra.mxu0 %v21248_v60 }
0x15e8   :  { %18037 = vmatprep.subr.mxu0 %v21249_v63 }
0x15e9   :  { %18038 = vmatpush3.msra.mxu0 %v21249_v63 }
0x15ea   :  { %18049 = vmatprep.subr.mxu0 %v21250_v38 }
0x1676   :  { %v17964_v15 = vpop.f32.mrf.mxu1 }
0x1678   :  { %v12849_v28 = vpop.f32.mrf.mxu1 }
0x167e   :  { %v17957_v58 = vpop.f32.mrf.mxu0  ;;  %v17978_v40 = vpop.f32.mrf.mxu1 }
0x167f   :  { %v12769_v13 = vadd.f32 %v18371_v12, %v17957_v58 }
0x1680   :  { %v12758_v16 = vpop.f32.mrf.mxu0  ;;  %v13013_v43 = vpop.f32.mrf.mxu1 }
0x1681   :  { %v12759_v35 = vadd.f32 %v18372_v14, %v12758_v16  ;;  %v12856_v47 = vadd.f32 %v17964_v15, %v12769_v13 }
0x1683   :  { %v12850_v45 = vadd.f32 %v12849_v28, %v12759_v35 }
0x1686   :  { %v17971_v25 = vpop.f32.mrf.mxu0  ;;  %v17992_v10 = vpop.f32.mrf.mxu1 }
0x1687   :  { %v12939_v36 = vadd.f32 %v17971_v25, %v12856_v47 }
0x1688   :  { %v12931_v49 = vpop.f32.mrf.mxu0  ;;  %v13177_v56 = vpop.f32.mrf.mxu1 }
0x1689   :  { %v12932_v19 = vadd.f32 %v12931_v49, %v12850_v45  ;;  %v13022_v27 = vadd.f32 %v17978_v40, %v12939_v36 }
0x168b   :  { %v13014_v22 = vadd.f32 %v13013_v43, %v12932_v19 }
0x168e   :  { %v17985_v53 = vpop.f32.mrf.mxu0 }
0x168f   :  { %v18006_v39 = vpop.f32.mrf.mxu1  ;;  %v13105_v32 = vadd.f32 %v17985_v53, %v13022_v27 }
0x1690   :  { %v13098_v41 = vpop.f32.mrf.mxu0 }
0x1691   :  { %v13373_v11 = vpop.f32.mrf.mxu1  ;;  %v13099_v33 = vadd.f32 %v13098_v41, %v13014_v22  ;;  %v13184_v18 = vadd.f32 %v17992_v10, %v13105_v32 }
0x1693   :  { %v13178_v50 = vadd.f32 %v13177_v56, %v13099_v33  ;;  %v13190_v1 = vsel %vm926_vm2, %v13184_v18, -inf }
0x1695   :  { %v13187_v42 = vsel %vm926_vm2, %v13178_v50, -inf }
0x1696   :  { %v17999_v9 = vpop.f32.mrf.mxu0 }
0x1697   :  { %v13293_v21 = vadd.f32 %v18371_v12, %v17999_v9  ;;  %v18020_v2 = vpop.f32.mrf.mxu1 }
0x1698   :  { %v13282_v44 = vpop.f32.mrf.mxu0 }
0x1699   :  { %v13283_v31 = vadd.f32 %v18372_v14, %v13282_v44  ;;  %v13380_v6 = vadd.f32 %v18006_v39, %v13293_v21  ;;  %v13537_v48 = vpop.f32.mrf.mxu1 }
0x169b   :  { %v13374_v34 = vadd.f32 %v13373_v11, %v13283_v31 }
0x169e   :  { %v18013_v20 = vpop.f32.mrf.mxu0 }
0x169f   :  { %v13463_v61 = vadd.f32 %v18013_v20, %v13380_v6  ;;  %v18034_v26 = vpop.f32.mrf.mxu1 }
0x16a0   :  { %v13455_v7 = vpop.f32.mrf.mxu0 }
0x16a1   :  { %v13456_v51 = vadd.f32 %v13455_v7, %v13374_v34  ;;  %v13546_v24 = vadd.f32 %v18020_v2, %v13463_v61  ;;  %v13701_v52 = vpop.f32.mrf.mxu1 }
0x16a3   :  { %v13538_v5 = vadd.f32 %v13537_v48, %v13456_v51 }
0x16a6   :  { %v18027_v37 = vpop.f32.mrf.mxu0 }
0x16a7   :  { %v13629_v46 = vadd.f32 %v18027_v37, %v13546_v24 }
0x16a8   :  { %v13622_v62 = vpop.f32.mrf.mxu0 }
0x16a9   :  { %v13623_v29 = vadd.f32 %v13622_v62, %v13538_v5  ;;  %v13708_v23 = vadd.f32 %v18034_v26, %v13629_v46 }
0x16ab   :  { %v13714_v17 = vsel %vm926_vm2, %v13708_v23, -inf  ;;  %v13702_v30 = vadd.f32 %v13701_v52, %v13623_v29  ;;  %v21251_v29 = vld [vmem:[#allocation58_spill] sm:$0xff] }
0x16ac   :  { %13715 = vmax.xlane.f32.xlu1 %v13714_v17  ;;  %v21254_v17 = vld [vmem:[#allocation49_spill] sm:$0xff] }
0x16ad   :  { %v13711_v3 = vsel %vm926_vm2, %v13702_v30, -inf }
0x16ae   :  { %13712 = vmax.xlane.f32.xlu0 %v13711_v3 }
0x16b0   :  { %13191 = vmax.xlane.f32.xlu1 %v13190_v1 }
0x16b2   :  { %13188 = vmax.xlane.f32.xlu0 %v13187_v42 }
0x1735   :  { %v13716_v59 = vpop.xlane.xlu1 %13715 }
0x1736   :  { %v13718_v0 = vsub.f32 %v13708_v23, %v13716_v59  ;;  %v21252_v23 = vld [vmem:[#allocation48_spill] sm:$0xff] }
0x1737   :  { %v13713_v8 = vpop.xlane.xlu0 %13712 }
0x1738   :  { %v13721_v55 = vmul.f32 1.442695, %v13718_v0  ;;  %v13717_v57 = vsub.f32 %v13702_v30, %v13713_v8  ;;  %v21256_v30 = vld [vmem:[#allocation50_spill] sm:$0xff]  ;;  %v21259_v8 = vld [vmem:[#allocation55_spill] sm:$0xff] }
0x1739   :  { %v13192_v58 = vpop.xlane.xlu1 %13191  ;;  %v21258_v0 = vld [vmem:[#allocation54_spill] sm:$0xff] }
0x173a   :  { %18339 = vpow2.f32 %v13721_v55  ;;  %v13719_v15 = vmul.f32 1.442695, %v13717_v57  ;;  %v13194_v16 = vsub.f32 %v13184_v18, %v13192_v58  ;;  %v21260_v55 = vld [vmem:[#allocation56_spill] sm:$0xff]  ;;  %v21261_v57 = vld [vmem:[#allocation57_spill] sm:$0xff] }
0x173b   :  { %v13189_v25 = vpop.xlane.xlu0 %13188 }
0x173c   :  { %18341 = vpow2.f32 %v13719_v15  ;;  %v13197_v28 = vmul.f32 1.442695, %v13194_v16  ;;  %v13193_v40 = vsub.f32 %v13178_v50, %v13189_v25  ;;  %v21257_v50 = vld [vmem:[#allocation53_spill] sm:$0xff] }
0x173e   :  { %18343 = vpow2.f32 %v13197_v28  ;;  %v13195_v49 = vmul.f32 1.442695, %v13193_v40 }
0x1740   :  { %18345 = vpow2.f32 %v13195_v49 }
0x1747   :  { %v18340_v53 = vpop.eup %18339 }
0x1748   :  { %v13726_v43 = vsel %vm926_vm2, %v18340_v53, 0.0 }
0x1749   :  { %v18342_v10 = vpop.eup %18341  ;;  %13727 = vadd.xlane.f32.xlu1 %v13726_v43 }
0x174a   :  { %v13723_v41 = vsel %vm926_vm2, %v18342_v10, 0.0 }
0x174b   :  { %v18344_v9 = vpop.eup %18343  ;;  %13724 = vadd.xlane.f32.xlu0 %v13723_v41 }
0x174c   :  { %v13202_v56 = vsel %vm926_vm2, %v18344_v9, 0.0 }
0x174d   :  { %v18346_v39 = vpop.eup %18345  ;;  %13203 = vadd.xlane.f32.xlu1 %v13202_v56 }
0x174e   :  { %v13199_v44 = vsel %vm926_vm2, %v18346_v39, 0.0 }
0x174f   :  { %13200 = vadd.xlane.f32.xlu0 %v13199_v44 }
0x17d2   :  { %v13728_v12 = vpop.xlane.xlu1 %13727 }
0x17d3   :  { %18347 = vrcp.f32 %v13728_v12 }
0x17d4   :  { %v13725_v13 = vpop.xlane.xlu0 %13724 }
0x17d5   :  { %18349 = vrcp.f32 %v13725_v13 }
0x17d6   :  { %v13204_v21 = vpop.xlane.xlu1 %13203 }
0x17d8   :  { %v13201_v14 = vpop.xlane.xlu0 %13200 }
0x17d9   :  { %18351 = vrcp.f32 %v13201_v14 }
0x17da   :  { %18353 = vrcp.f32 %v13204_v21 }
0x17e0   :  { %v18348_v35 = vpop.eup %18347 }
0x17e1   :  { %v13732_v31 = vmul.f32 %v18348_v35, %v18340_v53 }
0x17e2   :  { %v18350_v11 = vpop.eup %18349 }
0x17e3   :  { %v13730_v20 = vmul.f32 %v18350_v11, %v18342_v10  ;;  %v13737_v47 = vsel %vm926_vm2, %v13732_v31, 0 }
0x17e4   :  { %v13816_v6 = vand.u32 4294901760, %v13737_v47 }
0x17e5   :  { %v13734_v2 = vsel %vm926_vm2, %v13730_v20, 0 }
0x17e6   :  { %v18352_v7 = vpop.eup %18351  ;;  %v13806_v36 = vand.u32 4294901760, %v13734_v2  ;;  %v13817_v45 = vsub.f32 %v13737_v47, %v13816_v6 }
0x17e7   :  { %v18354_v61 = vpop.eup %18353  ;;  %v13206_v34 = vmul.f32 %v18352_v7, %v18346_v39 }
0x17e8   :  { %18046 = vmatprep.mubr.f32.mxu1 %v13806_v36  ;;  %v13807_v19 = vsub.f32 %v13734_v2, %v13806_v36  ;;  %v13818_v51 = vand.u32 4294901760, %v13817_v45  ;;  %v13208_v48 = vmul.f32 %v18354_v61, %v18344_v9 }
0x17e9   :  { %18047 = vmatmul.mubr.f32.vlgmr.msra.gmra.mxu1 %v13816_v6  ;;  %v14242_v24 = vsel %vm926_vm2, %v13206_v34, 0 }
0x17ea   :  { %18057 = vmatpush3.msra.mxu1 %v21248_v60  ;;  %v13808_v27 = vand.u32 4294901760, %v13807_v19  ;;  %v13819_v26 = vsub.f32 %v13817_v45, %v13818_v51  ;;  %v14314_v32 = vand.u32 4294901760, %v14242_v24  ;;  %v14245_v46 = vsel %vm926_vm2, %v13208_v48, 0 }
0x17eb   :  { %18058 = vmatprep.subr.mxu1 %v21249_v63  ;;  %v14324_v62 = vand.u32 4294901760, %v14245_v46 }
0x17ec   :  { %18059 = vmatpush3.msra.mxu1 %v21249_v63  ;;  %18060 = vmatprep.mubr.f32.mxu1 %v13808_v27  ;;  %v13809_v37 = vsub.f32 %v13807_v19, %v13808_v27  ;;  %v13820_v5 = vand.u32 4294901760, %v13819_v26  ;;  %v14315_v33 = vsub.f32 %v14242_v24, %v14314_v32 }
0x17ed   :  { %18061 = vmatmul.mubr.f32.vlgmr.msra.gmra.mxu1 %v13818_v51  ;;  %18070 = vmatprep.subr.mxu1 %v21248_v60  ;;  %v14325_v52 = vsub.f32 %v14245_v46, %v14324_v62 }
0x17ee   :  { %18071 = vmatpush3.msra.mxu1 %v21248_v60  ;;  %18074 = vmatprep.mubr.f32.mxu1 %v13806_v36  ;;  %v13810_v22 = vand.u32 4294901760, %v13809_v37  ;;  %v21253_v60 = vld [vmem:[#allocation59_spill] sm:$0xff] }
0x17ef   :  { %18072 = vmatprep.subr.mxu1 %v21249_v63  ;;  %v14326_v18 = vand.u32 4294901760, %v14325_v52 }
0x17f0   :  { %18039 = vmatprep.mubr.f32.mxu0 %v13810_v22  ;;  %18073 = vmatpush3.msra.mxu1 %v21249_v63  ;;  %v14316_v63 = vand.u32 4294901760, %v14315_v33 }
0x17f1   :  { %18040 = vmatmul.mubr.f32.vlgmr.msra.gmra.mxu0 %v13820_v5  ;;  %18075 = vmatmul.mubr.f32.vlgmr.msra.gmra.mxu1 %v13816_v6  ;;  %v14327_v42 = vsub.f32 %v14325_v52, %v14326_v18 }
0x17f2   :  { %18050 = vmatpush3.msra.mxu0 %v21250_v38  ;;  %18084 = vmatprep.subr.mxu1 %v21251_v29  ;;  %v21255_v38 = vld [vmem:[#allocation52_spill] sm:$0xff]  ;;  %v14317_v3 = vsub.f32 %v14315_v33, %v14316_v63 }
0x17f3   :  { %18051 = vmatprep.subr.mxu0 %v21252_v23  ;;  %18053 = vmatprep.mubr.f32.mxu0 %v13807_v19  ;;  %v14328_v59 = vand.u32 4294901760, %v14327_v42 }
0x17f4   :  { %18085 = vmatpush3.msra.mxu1 %v21251_v29  ;;  %18088 = vmatprep.mubr.f32.mxu1 %v14314_v32  ;;  %v14318_v1 = vand.u32 4294901760, %v14317_v3 }
0x17f5   :  { %18052 = vmatpush3.msra.mxu0 %v21252_v23  ;;  %18086 = vmatprep.subr.mxu1 %v21253_v60 }
0x17f6   :  { %18063 = vmatprep.subr.mxu0 %v21254_v17  ;;  %18087 = vmatpush3.msra.mxu1 %v21253_v60 }
0x17f7   :  { %18054 = vmatmul.mubr.f32.vlgmr.msra.gmra.mxu0 %v13817_v45  ;;  %18089 = vmatmul.mubr.f32.vlgmr.msra.gmra.mxu1 %v14324_v62 }
0x17f8   :  { %18064 = vmatpush3.msra.mxu0 %v21254_v17  ;;  %18098 = vmatprep.subr.mxu1 %v21255_v38 }
0x17f9   :  { %18065 = vmatprep.subr.mxu0 %v21256_v30  ;;  %18067 = vmatprep.mubr.f32.mxu0 %v13806_v36 }
0x17fa   :  { %18099 = vmatpush3.msra.mxu1 %v21255_v38  ;;  %18102 = vmatprep.mubr.f32.mxu1 %v14316_v63 }
0x17fb   :  { %18066 = vmatpush3.msra.mxu0 %v21256_v30  ;;  %18100 = vmatprep.subr.mxu1 %v21257_v50 }
0x17fc   :  { %18077 = vmatprep.subr.mxu0 %v21255_v38  ;;  %18101 = vmatpush3.msra.mxu1 %v21257_v50 }
0x17fd   :  { %18068 = vmatmul.mubr.f32.vlgmr.msra.gmra.mxu0 %v13816_v6  ;;  %18103 = vmatmul.mubr.f32.vlgmr.msra.gmra.mxu1 %v14326_v18 }
0x17fe   :  { %18078 = vmatpush3.msra.mxu0 %v21255_v38  ;;  %18112 = vmatprep.subr.mxu1 %v21255_v38 }
0x17ff   :  { %18079 = vmatprep.subr.mxu0 %v21257_v50  ;;  %18081 = vmatprep.mubr.f32.mxu0 %v14318_v1 }
0x1800   :  { %18113 = vmatpush3.msra.mxu1 %v21255_v38  ;;  %18116 = vmatprep.mubr.f32.mxu1 %v14314_v32 }
0x1801   :  { %18080 = vmatpush3.msra.mxu0 %v21257_v50  ;;  %18114 = vmatprep.subr.mxu1 %v21257_v50 }
0x1802   :  { %18091 = vmatprep.subr.mxu0 %v21258_v0  ;;  %18115 = vmatpush3.msra.mxu1 %v21257_v50 }
0x1803   :  { %18082 = vmatmul.mubr.f32.vlgmr.msra.gmra.mxu0 %v14328_v59  ;;  %18117 = vmatmul.mubr.f32.vlgmr.msra.gmra.mxu1 %v14324_v62 }
0x1804   :  { %18092 = vmatpush3.msra.mxu0 %v21258_v0  ;;  %18095 = vmatprep.mubr.f32.mxu0 %v14315_v33 }
0x1805   :  { %18093 = vmatprep.subr.mxu0 %v21259_v8 }
0x1806   :  { %18094 = vmatpush3.msra.mxu0 %v21259_v8 }
0x1807   :  { %18105 = vmatprep.subr.mxu0 %v21260_v55  ;;  %18096 = vmatmul.mubr.f32.vlgmr.msra.gmra.mxu0 %v14325_v52 }
0x1808   :  { %18106 = vmatpush3.msra.mxu0 %v21260_v55  ;;  %18109 = vmatprep.mubr.f32.mxu0 %v14314_v32  ;;  %v349_v55 = vld [vmem:[%s21156_s12 + $0x30] sm:$0xff] }
0x1809   :  { %18107 = vmatprep.subr.mxu0 %v21261_v57 }
0x180a   :  { %18108 = vmatpush3.msra.mxu0 %v21261_v57 }
0x180b   :  { %18110 = vmatmul.mubr.f32.vlgmr.msra.gmra.mxu0 %v14324_v62 }
0x18a9   :  { %v18048_v58 = vpop.f32.mrf.mxu1 }
0x18ab   :  { %v13903_v15 = vpop.f32.mrf.mxu1 }
0x18ad   :  { %v18062_v16 = vpop.f32.mrf.mxu1 }
0x18af   :  { %v14067_v25 = vpop.f32.mrf.mxu1 }
0x18b1   :  { %v18041_v28 = vpop.f32.mrf.mxu0  ;;  %v18076_v40 = vpop.f32.mrf.mxu1 }
0x18b2   :  { %v13910_v53 = vadd.f32 %v18048_v58, %v18041_v28  ;;  %v20944_v58 = vand.u32 4294901760, %v349_v55 }
0x18b3   :  { %v13812_v49 = vpop.f32.mrf.mxu0  ;;  %v14231_v43 = vpop.f32.mrf.mxu1 }
0x18b4   :  { %v13904_v41 = vadd.f32 %v13903_v15, %v13812_v49  ;;  %v348_v15 = vld [vmem:[%s21156_s12 + $0x28] sm:$0xff] }
0x18b5   :  { %v20957_v28 = vand.u32 4294901760, %v348_v15 }
0x18b7   :  { %v18055_v10 = vpop.f32.mrf.mxu0  ;;  %v18090_v12 = vpop.f32.mrf.mxu1 }
0x18b8   :  { %v13993_v9 = vadd.f32 %v18055_v10, %v13910_v53 }
0x18b9   :  { %v13985_v56 = vpop.f32.mrf.mxu0  ;;  %v14411_v35 = vpop.f32.mrf.mxu1 }
0x18ba   :  { %v13986_v39 = vadd.f32 %v13985_v56, %v13904_v41  ;;  %v14076_v44 = vadd.f32 %v18062_v16, %v13993_v9 }
0x18bc   :  { %v14068_v13 = vadd.f32 %v14067_v25, %v13986_v39  ;;  %v20955_v25 = vsub.f32 %v349_v55, %v20944_v58 }
0x18bd   :  { %v18069_v21 = vpop.f32.mrf.mxu0  ;;  %v18104_v6 = vpop.f32.mrf.mxu1 }
0x18be   :  { %v14159_v14 = vadd.f32 %v18069_v21, %v14076_v44  ;;  %v20967_v53 = vand.u32 4294901760, %v20955_v25 }
0x18bf   :  { %v14152_v31 = vpop.f32.mrf.mxu0  ;;  %v14575_v34 = vpop.f32.mrf.mxu1 }
0x18c0   :  { %v14153_v11 = vadd.f32 %v14152_v31, %v14068_v13  ;;  %v14238_v20 = vadd.f32 %v18076_v40, %v14159_v14  ;;  %v347_v40 = vld [vmem:[%s21156_s12 + $0x20] sm:$0xff]  ;;  %v14929_v9 = vsub.f32 %v20955_v25, %v20967_v53 }
0x18c1   :  { %v20972_v10 = vand.u32 4294901760, %v347_v40 }
0x18c2   :  { %v14232_v47 = vadd.f32 %v14231_v43, %v14153_v11  ;;  %v20970_v43 = vsub.f32 %v348_v15, %v20957_v28  ;;  %v14930_v44 = vand.u32 4294901760, %v14929_v9 }
0x18c3   :  { %v18083_v2 = vpop.f32.mrf.mxu0  ;;  %v18118_v37 = vpop.f32.mrf.mxu1  ;;  %v20982_v39 = vsub.f32 %v347_v40, %v20972_v10 }
0x18c4   :  { %v14331_v7 = vadd.f32 %v18083_v2, %v14238_v20  ;;  %v20979_v56 = vand.u32 4294901760, %v20970_v43 }
0x18c5   :  { %v14320_v36 = vpop.f32.mrf.mxu0  ;;  %v14739_v29 = vpop.f32.mrf.mxu1  ;;  %v20989_v13 = vand.u32 4294901760, %v20982_v39 }
0x18c6   :  { %v14321_v45 = vadd.f32 %v14320_v36, %v14232_v47  ;;  %v14418_v61 = vadd.f32 %v18090_v12, %v14331_v7  ;;  %v14936_v12 = vsub.f32 %v20970_v43, %v20979_v56  ;;  %v15953_v36 = vld [vmem:[%s21163_s19 + $0x1] ss:$0 sm:$0xff] }
0x18c7   :  { %v18097_v19 = vpop.f32.mrf.mxu0  ;;  %v14943_v14 = vsub.f32 %v20982_v39, %v20989_v13 }
0x18c8   :  { %v14501_v51 = vadd.f32 %v18097_v19, %v14418_v61  ;;  %v14412_v48 = vadd.f32 %v14411_v35, %v14321_v45  ;;  %v14937_v21 = vand.u32 4294901760, %v14936_v12 }
0x18c9   :  { %v14493_v27 = vpop.f32.mrf.mxu0  ;;  %v14944_v35 = vand.u32 4294901760, %v14943_v14 }
0x18ca   :  { %v14494_v24 = vadd.f32 %v14493_v27, %v14412_v48  ;;  %v14584_v26 = vadd.f32 %v18104_v6, %v14501_v51 }
0x18cb   :  { %v18111_v32 = vpop.f32.mrf.mxu0 }
0x18cc   :  { %v14667_v22 = vadd.f32 %v18111_v32, %v14584_v26  ;;  %v14576_v46 = vadd.f32 %v14575_v34, %v14494_v24  ;;  %v15954_v34 = vld [vmem:[%s21162_s18 + $0x1] ss:$0 sm:$0xff] }
0x18cd   :  { %v14660_v5 = vpop.f32.mrf.mxu0 }
0x18ce   :  { %v14746_v62 = vadd.f32 %v18118_v37, %v14667_v22  ;;  %v14661_v33 = vadd.f32 %v14660_v5, %v14576_v46 }
0x18d0   :  { %v14740_v23 = vadd.f32 %v14739_v29, %v14661_v33  ;;  %v14750_v60 = vadd.f32 %v14746_v62, %v20755_v4 }
0x18d2   :  { %v14754_v52 = vsel %vm1437_vm3, %v14750_v60, 0.0  ;;  %v14749_v63 = vadd.f32 %v14740_v23, %v20757_v54  ;;  %v350_v54 = vld [vmem:[%s21156_s12 + $0x38] sm:$0xff] }
0x18d3   :  { %14755 = vadd.xlane.f32.xlu1 %v14754_v52  ;;  %v20936_v8 = vand.u32 4294901760, %v350_v54 }
0x18d4   :  { %v14751_v17 = vsel %vm1437_vm3, %v14749_v63, 0.0 }
0x18d5   :  { %14752 = vadd.xlane.f32.xlu0 %v14751_v17  ;;  %v20942_v57 = vsub.f32 %v350_v54, %v20936_v8  ;;  %18119 = vmatprep.subr.mxu0 %v20936_v8 }
0x18d6   :  { %18120 = vmatpush3.msra.mxu0 %v20936_v8 }
0x18d7   :  { %v20952_v16 = vand.u32 4294901760, %v20942_v57  ;;  %18121 = vmatprep.subr.mxu0 %v20944_v58 }
0x18d8   :  { %18122 = vmatpush3.msra.mxu0 %v20944_v58 }
0x18d9   :  { %v14922_v49 = vsub.f32 %v20942_v57, %v20952_v16  ;;  %18123 = vmatprep.subr.mxu0 %v20957_v28 }
0x18da   :  { %18124 = vmatpush3.msra.mxu0 %v20957_v28 }
0x18db   :  { %v14923_v41 = vand.u32 4294901760, %v14922_v49  ;;  %18125 = vmatprep.subr.mxu0 %v20972_v10 }
0x18dc   :  { %18126 = vmatpush3.msra.mxu0 %v20972_v10 }
0x18dd   :  { %18130 = vmatprep.subr.mxu1 %v14923_v41  ;;  %18141 = vmatprep.subr.mxu0 %v20942_v57 }
0x18de   :  { %18131 = vmatpush3.msra.mxu1 %v14923_v41 }
0x18df   :  { %18132 = vmatprep.subr.mxu1 %v14930_v44 }
0x18e0   :  { %18133 = vmatpush3.msra.mxu1 %v14930_v44 }
0x18e1   :  { %18134 = vmatprep.subr.mxu1 %v14937_v21 }
0x18e2   :  { %18135 = vmatpush3.msra.mxu1 %v14937_v21 }
0x18e3   :  { %18136 = vmatprep.subr.mxu1 %v14944_v35 }
0x18e4   :  { %18137 = vmatpush3.msra.mxu1 %v14944_v35 }
0x18e5   :  { %18152 = vmatprep.subr.mxu1 %v20936_v8 }
0x195c   :  { %v14756_v38 = vpop.xlane.xlu1 %14755 }
0x195d   :  { %v14758_v30 = vmul.f32 0.03125, %v14756_v38  ;;  %v366_v38 = vld [vmem:[%s21165_s21 + $0x10] sm:$0xff] }
0x195e   :  { %v14753_v18 = vpop.xlane.xlu0 %14752 }
0x195f   :  { %v14760_v3 = vsub.f32 %v14750_v60, %v14758_v30  ;;  %v14757_v50 = vmul.f32 0.03125, %v14753_v18  ;;  %v21050_v18 = vand.u32 4294901760, %v366_v38 }
0x1961   :  { %v14759_v1 = vsub.f32 %v14749_v63, %v14757_v50  ;;  %v14762_v42 = vmul.f32 %v14760_v3, %v14760_v3  ;;  %v367_v63 = vld [vmem:[%s21165_s21 + $0x18] sm:$0xff] }
0x1962   :  { %v21042_v17 = vand.u32 4294901760, %v367_v63 }
0x1963   :  { %v14766_v59 = vsel %vm1437_vm3, %v14762_v42, 0.0  ;;  %v14761_v0 = vmul.f32 %v14759_v1, %v14759_v1 }
0x1964   :  { %14767 = vadd.xlane.f32.xlu1 %v14766_v59  ;;  %v21048_v30 = vsub.f32 %v367_v63, %v21042_v17  ;;  %v364_v59 = vld [vmem:[%s21165_s21] sm:$0xff] }
0x1965   :  { %v14763_v4 = vsel %vm1437_vm3, %v14761_v0, 0.0 }
0x1966   :  { %14764 = vadd.xlane.f32.xlu0 %v14763_v4  ;;  %v21058_v50 = vand.u32 4294901760, %v21048_v30 }
0x1968   :  { %v15466_v0 = vsub.f32 %v21048_v30, %v21058_v50 }
0x196a   :  { %v15467_v55 = vand.u32 4294901760, %v15466_v0 }
0x19ed   :  { %v14768_v31 = vpop.xlane.xlu1 %14767 }
0x19ee   :  { %v14770_v11 = vmul.f32 0.03125, %v14768_v31 }
0x19ef   :  { %v14765_v20 = vpop.xlane.xlu0 %14764 }
0x19f0   :  { %v14772_v47 = vadd.f32 1e-05, %v14770_v11  ;;  %v14769_v6 = vmul.f32 0.03125, %v14765_v20 }
0x19f2   :  { %18355 = vrsqrt.f32 %v14772_v47  ;;  %v14771_v2 = vadd.f32 1e-05, %v14769_v6 }
0x19f4   :  { %18357 = vrsqrt.f32 %v14771_v2 }
0x19ff   :  { %v18356_v7 = vpop.eup %18355 }
0x1a00   :  { %v14776_v45 = vmul.f32 %v18356_v7, %v14760_v3  ;;  %v365_v3 = vld [vmem:[%s21165_s21 + $0x8] sm:$0xff] }
0x1a01   :  { %v18358_v61 = vpop.eup %18357  ;;  %v21063_v42 = vand.u32 4294901760, %v365_v3 }
0x1a02   :  { %v14775_v19 = vmul.f32 %v18358_v61, %v14759_v1  ;;  %v14784_v51 = vmul.f32 %v15953_v36, %v14776_v45  ;;  %v21061_v1 = vsub.f32 %v366_v38, %v21050_v18  ;;  %v15956_v38 = vld [vmem:[%s21164_s20] ss:$0 sm:$0xff]  ;;  %s18818_s20 = smov [#allocation32]  }
0x1a03   :  { %v21076_v54 = vsub.f32 %v365_v3, %v21063_v42  ;;  %s15919_s10 = sshll.u32 %s18818_s20, 4  ;;  %s15920_s10 = int_to_ptr.vmem [resolvable:$true] %s15919_s10 }
0x1a04   :  { %v14783_v48 = vmul.f32 %v15953_v36, %v14775_v19  ;;  %v21001_v27 = vadd.f32 %v15954_v34, %v14784_v51  ;;  %v21073_v4 = vand.u32 4294901760, %v21061_v1  ;;  %s18753_s16 = scalar_lea.vmem %s15920_s10, 256  ;;  %p18758_p12 = scmp.lt.s32.totalorder %s15920_s10, %s15920_s10 }
0x1a05   :  { %p18754_p11 = scmp.ne.s32.totalorder %s15920_s10, %s18753_s16  ;;  %p18759_p13 = scmp.lt.s32.totalorder %s18753_s16, %s18753_s16 }
0x1a06   :  { %v21003_v24 = vadd.f32 %v15954_v34, %v14783_v48  ;;  %v14803_v26 = vsel %vm1437_vm3, %v21001_v27, 0 }
0x1a07   :  { %v14884_v37 = vand.u32 4294901760, %v14803_v26  ;;  %p18760_p0 = por %p18759_p13, %p18758_p12 }
0x1a08   :  { %v14800_v32 = vsel %vm1437_vm3, %v21003_v24, 0 }
0x1a09   :  { %v14874_v22 = vand.u32 4294901760, %v14800_v32  ;;  %v14885_v46 = vsub.f32 %v14803_v26, %v14884_v37  ;;  %p18761_p1 = pnand %p18760_p0, %p18754_p11 }
0x1a0b   :  { %18138 = vmatprep.mubr.f32.mxu1 %v14874_v22  ;;  %v14875_v5 = vsub.f32 %v14800_v32, %v14874_v22  ;;  %v14886_v62 = vand.u32 4294901760, %v14885_v46 }
0x1a0c   :  { %18139 = vmatmul.mubr.f32.vlgmr.msra.gmra.mxu1 %v14884_v37 }
0x1a0d   :  { %18153 = vmatpush3.msra.mxu1 %v20936_v8  ;;  %v14876_v33 = vand.u32 4294901760, %v14875_v5  ;;  %v14887_v23 = vsub.f32 %v14885_v46, %v14886_v62 }
0x1a0e   :  { %18154 = vmatprep.subr.mxu1 %v20944_v58 }
0x1a0f   :  { %18155 = vmatpush3.msra.mxu1 %v20944_v58  ;;  %18160 = vmatprep.mubr.f32.mxu1 %v14876_v33  ;;  %v14877_v29 = vsub.f32 %v14875_v5, %v14876_v33  ;;  %v14888_v52 = vand.u32 4294901760, %v14887_v23 }
0x1a10   :  { %18156 = vmatprep.subr.mxu1 %v20957_v28 }
0x1a11   :  { %18157 = vmatpush3.msra.mxu1 %v20957_v28  ;;  %v14878_v60 = vand.u32 4294901760, %v14877_v29 }
0x1a12   :  { %18158 = vmatprep.subr.mxu1 %v20972_v10 }
0x1a13   :  { %18159 = vmatpush3.msra.mxu1 %v20972_v10  ;;  %18127 = vmatprep.mubr.f32.mxu0 %v14878_v60 }
0x1a14   :  { %18161 = vmatmul.mubr.f32.vlgmr.msra.gmra.mxu1 %v14886_v62  ;;  %18174 = vmatprep.subr.mxu1 %v20936_v8 }
0x1a15   :  { %18128 = vmatmul.mubr.f32.vlgmr.msra.gmra.mxu0 %v14888_v52  ;;  %18175 = vmatpush3.msra.mxu1 %v20936_v8  ;;  %v21078_v8 = vand.u32 4294901760, %v364_v59 }
0x1a16   :  { %18142 = vmatpush3.msra.mxu0 %v20942_v57  ;;  %18182 = vmatprep.mubr.f32.mxu1 %v14874_v22  ;;  %v15473_v57 = vsub.f32 %v21061_v1, %v21073_v4 }
0x1a17   :  { %18143 = vmatprep.subr.mxu0 %v20955_v25  ;;  %18149 = vmatprep.mubr.f32.mxu0 %v14875_v5  ;;  %v21088_v15 = vsub.f32 %v364_v59, %v21078_v8 }
0x1a18   :  { %18176 = vmatprep.subr.mxu1 %v20944_v58  ;;  %18144 = vmatpush3.msra.mxu0 %v20955_v25 }
0x1a19   :  { %18177 = vmatpush3.msra.mxu1 %v20944_v58  ;;  %18145 = vmatprep.subr.mxu0 %v20970_v43  ;;  %v21085_v58 = vand.u32 4294901760, %v21076_v54 }
0x1a1a   :  { %18178 = vmatprep.subr.mxu1 %v20957_v28  ;;  %18146 = vmatpush3.msra.mxu0 %v20970_v43 }
0x1a1b   :  { %18179 = vmatpush3.msra.mxu1 %v20957_v28  ;;  %18147 = vmatprep.subr.mxu0 %v20982_v39  ;;  %v15480_v25 = vsub.f32 %v21076_v54, %v21085_v58  ;;  %v21095_v28 = vand.u32 4294901760, %v21088_v15 }
0x1a1c   :  { %18180 = vmatprep.subr.mxu1 %v20972_v10  ;;  %18148 = vmatpush3.msra.mxu0 %v20982_v39 }
0x1a1d   :  { %18181 = vmatpush3.msra.mxu1 %v20972_v10  ;;  %18150 = vmatmul.mubr.f32.vlgmr.msra.gmra.mxu0 %v14885_v46  ;;  %v15481_v40 = vand.u32 4294901760, %v15480_v25  ;;  %v15487_v49 = vsub.f32 %v21088_v15, %v21095_v28  ;;  %v15955_v10 = vld [vmem:[#allocation19 + $0x1] ss:$0 sm:$0xff] }
0x1a1e   :  { %18163 = vmatprep.subr.mxu0 %v20952_v16  ;;  %18183 = vmatmul.mubr.f32.vlgmr.msra.gmra.mxu1 %v14884_v37 }
0x1a1f   :  { %18164 = vmatpush3.msra.mxu0 %v20952_v16  ;;  %18171 = vmatprep.mubr.f32.mxu0 %v14874_v22  ;;  %v15474_v16 = vand.u32 4294901760, %v15473_v57 }
0x1a20   :  { %18165 = vmatprep.subr.mxu0 %v20967_v53  ;;  %18196 = vmatprep.subr.mxu1 %v15467_v55 }
0x1a21   :  { %18166 = vmatpush3.msra.mxu0 %v20967_v53  ;;  %18197 = vmatpush3.msra.mxu1 %v15467_v55  ;;  %v15488_v53 = vand.u32 4294901760, %v15487_v49  ;;  %v15958_v49 = vld [vmem:[#allocation8] ss:$0 sm:$0xff] }
0x1a22   :  { %18167 = vmatprep.subr.mxu0 %v20979_v56  ;;  %18198 = vmatprep.subr.mxu1 %v15474_v16 }
0x1a23   :  { %18168 = vmatpush3.msra.mxu0 %v20979_v56  ;;  %18199 = vmatpush3.msra.mxu1 %v15474_v16 }
0x1a24   :  { %18169 = vmatprep.subr.mxu0 %v20989_v13  ;;  %18200 = vmatprep.subr.mxu1 %v15481_v40 }
0x1a25   :  { %18170 = vmatpush3.msra.mxu0 %v20989_v13  ;;  %18201 = vmatpush3.msra.mxu1 %v15481_v40  ;;  %v15957_v40 = vld [vmem:[#allocation7] ss:$0 sm:$0xff] }
0x1a26   :  { %18172 = vmatmul.mubr.f32.vlgmr.msra.gmra.mxu0 %v14884_v37  ;;  %18185 = vmatprep.subr.mxu0 %v21042_v17 }
0x1a27   :  { %18186 = vmatpush3.msra.mxu0 %v21042_v17  ;;  %18202 = vmatprep.subr.mxu1 %v15488_v53 }
0x1a28   :  { %18187 = vmatprep.subr.mxu0 %v21050_v18  ;;  %18203 = vmatpush3.msra.mxu1 %v15488_v53 }
0x1a29   :  { %18188 = vmatpush3.msra.mxu0 %v21050_v18  ;;  %18218 = vmatprep.subr.mxu1 %v21042_v17 }
0x1a2a   :  { %18189 = vmatprep.subr.mxu0 %v21063_v42 }
0x1a2b   :  { %18190 = vmatpush3.msra.mxu0 %v21063_v42 }
0x1a2c   :  { %18191 = vmatprep.subr.mxu0 %v21078_v8 }
0x1a2d   :  { %18192 = vmatpush3.msra.mxu0 %v21078_v8 }
0x1a2e   :  { %18207 = vmatprep.subr.mxu0 %v21048_v30 }
0x1acc   :  { %v18140_v41 = vpop.f32.mrf.mxu1 }
0x1ace   :  { %v14981_v12 = vpop.f32.mrf.mxu1 }
0x1ad4   :  { %v18162_v21 = vpop.f32.mrf.mxu1 }
0x1ad5   :  { %v18129_v43 = vpop.f32.mrf.mxu0 }
0x1ad6   :  { %v14891_v56 = vadd.f32 %v18129_v43, %v15955_v10  ;;  %v15151_v20 = vpop.f32.mrf.mxu1 }
0x1ad7   :  { %v14880_v9 = vpop.f32.mrf.mxu0 }
0x1ad8   :  { %v14881_v39 = vadd.f32 %v15955_v10, %v14880_v9  ;;  %v14988_v13 = vadd.f32 %v18140_v41, %v14891_v56 }
0x1ada   :  { %v14982_v31 = vadd.f32 %v14981_v12, %v14881_v39 }
0x1add   :  { %v18151_v44 = vpop.f32.mrf.mxu0 }
0x1ade   :  { %v15075_v35 = vadd.f32 %v18151_v44, %v14988_v13  ;;  %v18184_v6 = vpop.f32.mrf.mxu1 }
0x1adf   :  { %v15067_v14 = vpop.f32.mrf.mxu0 }
0x1ae0   :  { %v15068_v11 = vadd.f32 %v15067_v14, %v14982_v31  ;;  %v15160_v47 = vadd.f32 %v18162_v21, %v15075_v35  ;;  %v15323_v19 = vpop.f32.mrf.mxu1 }
0x1ae2   :  { %v15152_v36 = vadd.f32 %v15151_v20, %v15068_v11 }
0x1ae6   :  { %v18173_v2 = vpop.f32.mrf.mxu0 }
0x1ae7   :  { %v15249_v7 = vadd.f32 %v18173_v2, %v15160_v47 }
0x1ae8   :  { %v15242_v45 = vpop.f32.mrf.mxu0 }
0x1ae9   :  { %v15330_v61 = vadd.f32 %v18184_v6, %v15249_v7  ;;  %v15243_v34 = vadd.f32 %v15242_v45, %v15152_v36 }
0x1aeb   :  { %v15334_v51 = vmax.f32 %v15330_v61, 0.0  ;;  %v15324_v48 = vadd.f32 %v15323_v19, %v15243_v34 }
0x1aed   :  { %v15336_v26 = vadd.f32 %v15334_v51, %v21001_v27  ;;  %v15333_v37 = vmax.f32 %v15324_v48, 0.0 }
0x1aef   :  { %v15347_v32 = vsel %vm1437_vm3, %v15336_v26, 0  ;;  %v15335_v22 = vadd.f32 %v15333_v37, %v21003_v24 }
0x1af0   :  { %v15428_v46 = vand.u32 4294901760, %v15347_v32 }
0x1af1   :  { %v15344_v5 = vsel %vm1437_vm3, %v15335_v22, 0 }
0x1af2   :  { %v15429_v62 = vsub.f32 %v15347_v32, %v15428_v46  ;;  %v15418_v33 = vand.u32 4294901760, %v15344_v5 }
0x1af4   :  { %18204 = vmatprep.mubr.f32.mxu1 %v15418_v33  ;;  %v15419_v29 = vsub.f32 %v15344_v5, %v15418_v33  ;;  %v15430_v23 = vand.u32 4294901760, %v15429_v62 }
0x1af5   :  { %18205 = vmatmul.mubr.f32.vlgmr.msra.gmra.mxu1 %v15428_v46 }
0x1af6   :  { %18219 = vmatpush3.msra.mxu1 %v21042_v17  ;;  %v15420_v60 = vand.u32 4294901760, %v15419_v29  ;;  %v15431_v52 = vsub.f32 %v15429_v62, %v15430_v23 }
0x1af7   :  { %18220 = vmatprep.subr.mxu1 %v21050_v18 }
0x1af8   :  { %18221 = vmatpush3.msra.mxu1 %v21050_v18  ;;  %18226 = vmatprep.mubr.f32.mxu1 %v15420_v60  ;;  %v15421_v27 = vsub.f32 %v15419_v29, %v15420_v60  ;;  %v15432_v63 = vand.u32 4294901760, %v15431_v52 }
0x1af9   :  { %18222 = vmatprep.subr.mxu1 %v21063_v42 }
0x1afa   :  { %18223 = vmatpush3.msra.mxu1 %v21063_v42  ;;  %v15422_v24 = vand.u32 4294901760, %v15421_v27 }
0x1afb   :  { %18224 = vmatprep.subr.mxu1 %v21078_v8 }
0x1afc   :  { %18225 = vmatpush3.msra.mxu1 %v21078_v8  ;;  %18193 = vmatprep.mubr.f32.mxu0 %v15422_v24 }
0x1afd   :  { %18227 = vmatmul.mubr.f32.vlgmr.msra.gmra.mxu1 %v15430_v23  ;;  %18240 = vmatprep.subr.mxu1 %v21042_v17 }
0x1afe   :  { %18194 = vmatmul.mubr.f32.vlgmr.msra.gmra.mxu0 %v15432_v63  ;;  %18241 = vmatpush3.msra.mxu1 %v21042_v17 }
0x1aff   :  { %18208 = vmatpush3.msra.mxu0 %v21048_v30  ;;  %18248 = vmatprep.mubr.f32.mxu1 %v15418_v33 }
0x1b00   :  { %18209 = vmatprep.subr.mxu0 %v21061_v1  ;;  %18215 = vmatprep.mubr.f32.mxu0 %v15419_v29 }
0x1b01   :  { %18242 = vmatprep.subr.mxu1 %v21050_v18  ;;  %18210 = vmatpush3.msra.mxu0 %v21061_v1 }
0x1b02   :  { %18243 = vmatpush3.msra.mxu1 %v21050_v18  ;;  %18211 = vmatprep.subr.mxu0 %v21076_v54 }
0x1b03   :  { %18244 = vmatprep.subr.mxu1 %v21063_v42  ;;  %18212 = vmatpush3.msra.mxu0 %v21076_v54 }
0x1b04   :  { %18245 = vmatpush3.msra.mxu1 %v21063_v42  ;;  %18213 = vmatprep.subr.mxu0 %v21088_v15 }
0x1b05   :  { %18246 = vmatprep.subr.mxu1 %v21078_v8  ;;  %18214 = vmatpush3.msra.mxu0 %v21088_v15 }
0x1b06   :  { %18247 = vmatpush3.msra.mxu1 %v21078_v8  ;;  %18216 = vmatmul.mubr.f32.vlgmr.msra.gmra.mxu0 %v15429_v62 }
0x1b07   :  { %18229 = vmatprep.subr.mxu0 %v21058_v50  ;;  %18249 = vmatmul.mubr.f32.vlgmr.msra.gmra.mxu1 %v15428_v46 }
0x1b08   :  { %18230 = vmatpush3.msra.mxu0 %v21058_v50  ;;  %18237 = vmatprep.mubr.f32.mxu0 %v15418_v33 }
0x1b09   :  { %18231 = vmatprep.subr.mxu0 %v21073_v4 }
0x1b0a   :  { %18232 = vmatpush3.msra.mxu0 %v21073_v4 }
0x1b0b   :  { %18233 = vmatprep.subr.mxu0 %v21085_v58 }
0x1b0c   :  { %18234 = vmatpush3.msra.mxu0 %v21085_v58 }
0x1b0d   :  { %18235 = vmatprep.subr.mxu0 %v21095_v28 }
0x1b0e   :  { %18236 = vmatpush3.msra.mxu0 %v21095_v28 }
0x1b0f   :  { %18238 = vmatmul.mubr.f32.vlgmr.msra.gmra.mxu0 %v15428_v46 }
0x1bb5   :  { %v18206_v30 = vpop.f32.mrf.mxu1 }
0x1bb7   :  { %v15525_v42 = vpop.f32.mrf.mxu1 }
0x1bbd   :  { %v18228_v0 = vpop.f32.mrf.mxu1 }
0x1bbe   :  { %v18195_v17 = vpop.f32.mrf.mxu0 }
0x1bbf   :  { %v15435_v3 = vadd.f32 %v18195_v17, %v15956_v38  ;;  %v15695_v57 = vpop.f32.mrf.mxu1 }
0x1bc0   :  { %v15424_v18 = vpop.f32.mrf.mxu0 }
0x1bc1   :  { %v15425_v50 = vadd.f32 %v15956_v38, %v15424_v18  ;;  %v15532_v59 = vadd.f32 %v18206_v30, %v15435_v3 }
0x1bc3   :  { %v15526_v8 = vadd.f32 %v15525_v42, %v15425_v50 }
0x1bc6   :  { %v18217_v1 = vpop.f32.mrf.mxu0 }
0x1bc7   :  { %v15619_v54 = vadd.f32 %v18217_v1, %v15532_v59  ;;  %v18250_v15 = vpop.f32.mrf.mxu1 }
0x1bc8   :  { %v15611_v4 = vpop.f32.mrf.mxu0 }
0x1bc9   :  { %v15612_v55 = vadd.f32 %v15611_v4, %v15526_v8  ;;  %v15704_v58 = vadd.f32 %v18228_v0, %v15619_v54  ;;  %v15867_v41 = vpop.f32.mrf.mxu1 }
0x1bcb   :  { %v15696_v28 = vadd.f32 %v15695_v57, %v15612_v55 }
0x1bcf   :  { %v18239_v16 = vpop.f32.mrf.mxu0 }
0x1bd0   :  { %v15793_v25 = vadd.f32 %v18239_v16, %v15704_v58 }
0x1bd1   :  { %v15786_v53 = vpop.f32.mrf.mxu0 }
0x1bd2   :  { %v15874_v43 = vadd.f32 %v18250_v15, %v15793_v25  ;;  %v15787_v10 = vadd.f32 %v15786_v53, %v15696_v28 }
0x1bd4   :  { %v15884_v9 = vsub.f32 %v15957_v40, %v15874_v43  ;;  %v15900_v56 = vsub.f32 %v15958_v49, %v15874_v43  ;;  %v15868_v39 = vadd.f32 %v15867_v41, %v15787_v10 }
0x1bd6   :  { %v15886_v44 = vmul.f32 0.5, %v15884_v9  ;;  %v15902_v12 = vmul.f32 0.5, %v15900_v56  ;;  %v15883_v13 = vsub.f32 %v15957_v40, %v15868_v39  ;;  %v15899_v21 = vsub.f32 %v15958_v49, %v15868_v39 }
0x1bd8   :  { %18359 = vtanh.f32 %v15886_v44  ;;  %v15885_v14 = vmul.f32 0.5, %v15883_v13  ;;  %v15901_v35 = vmul.f32 0.5, %v15899_v21 }
0x1bd9   :  { %18361 = vtanh.f32 %v15902_v12 }
0x1bda   :  { %18363 = vtanh.f32 %v15885_v14 }
0x1bdb   :  { %18365 = vtanh.f32 %v15901_v35 }
0x1be5   :  { %v18360_v31 = vpop.eup %18359 }
0x1be6   :  { %v18362_v11 = vpop.eup %18361  ;;  %v15890_v20 = vadd.f32 1.0, %v18360_v31 }
0x1be7   :  { %v18364_v47 = vpop.eup %18363  ;;  %v15906_v6 = vadd.f32 1.0, %v18362_v11 }
0x1be8   :  { %v18366_v2 = vpop.eup %18365  ;;  %v15892_v7 = vmul.f32 0.5, %v15890_v20  ;;  %v15889_v36 = vadd.f32 1.0, %v18364_v47 }
0x1be9   :  { %v15908_v45 = vmul.f32 0.5, %v15906_v6  ;;  %v15905_v61 = vadd.f32 1.0, %v18366_v2 }
0x1bea   :  { %v15891_v34 = vmul.f32 0.5, %v15889_v36 }
0x1beb   :  { %v15907_v19 = vmul.f32 0.5, %v15905_v61  ;;  %v15910_v51 = vsub.f32 %v15892_v7, %v15908_v45 }
0x1bed   :  { %v15909_v48 = vsub.f32 %v15891_v34, %v15907_v19  ;;  %15913 = vst.msk [vmem:[#allocation32 + $0x8] sm:$0xff] %vm15911_vm4, %v15910_v51 }
0x1bef   :  { %15912 = vst.msk [vmem:[#allocation32] sm:$0xff] %vm15911_vm4, %v15909_v48 }
0x1bf0   :  { %18764 = shalt.err (!%p18761_p1)
}
0x1bf1   :  { %s21262_s24 = sld [smem:[#allocation72_spill]] }
0x1bf7   :  { %15925 = dma.vmem_to_hbm [thread:$0]  %s15920_s10, 256, %s21262_s24, [#allocation4], %s18797_s5, %s18797_s5, %s18798_s28  }
0x1bf8   :  { %18793 = dma.done.wait [#allocation4], 256  }
0x1bf9   :  { %18794 = vsyncadd [#allocation4], 4294967040 }
0x1bfa   :  { %15929 = vsyncpa [#allocation3], 1 }
0x1bfb   :  { %15930 = vsyncpa [#allocation6], 1 }
0x1bfc   :  { %15931 = vsyncpa [#allocation9], 1 }
0x1bfd   :  { %15932 = vsyncpa [#allocation12], 1 }
0x1bfe   :  { %15933 = vsyncpa [#allocation15], 1 }
0x1bff   :  { %15934 = vsyncpa [#allocation18], 1 }
0x1c00   :  { %15935 = vsyncpa [#allocation21], 1 }
0x1c01   :  { %15936 = vsyncpa [#allocation24], 1 }
0x1c02   :  { %15937 = vsyncpa [#allocation27], 1 }
0x1c03   :  { %15938 = vsyncpa [#allocation30], 1 }
0x1c04   :  { %15939 = vsyncpa [#allocation4], 1 }

</bundles_post_ra>
